<compile_context>
chip_gen: v6e
topology: v6e:2x2x1
jax: 0.10.0
libtpu: 0.0.40
codegen_flags: <defaults>
</compile_context>

<pallas_src>
import functools

import jax
import jax.numpy as jnp
from jax.experimental import pallas as pl
from jax.experimental.pallas import tpu as pltpu


def _gelu_tanh(x):
    # torch.nn.functional.gelu(x, approximate='tanh')
    c = 0.7978845608028654  # sqrt(2/pi)
    return 0.5 * x * (1.0 + jnp.tanh(c * (x + 0.044715 * x * x * x)))


def _layernorm(x, w, b, eps):
    # Two-pass form (matches torch LayerNorm; avoids E[x^2]-E[x]^2 cancellation).
    mu = jnp.mean(x, axis=-1, keepdims=True)
    xc = x - mu
    var = jnp.mean(xc * xc, axis=-1, keepdims=True)
    return xc * jax.lax.rsqrt(var + eps) * w + b


def _vit_kernel(patches_ref, pos_ref, wp_ref, bp_ref,
                ln1_w_ref, ln1_b_ref,
                wq_ref, bq_ref, wk_ref, bk_ref, wv_ref, bv_ref,
                wo_ref, bo_ref,
                ln2_w_ref, ln2_b_ref,
                w1_ref, b1_ref, w2_ref, b2_ref,
                postln_w_ref, postln_b_ref,
                out_ref,
                h_scratch, attn_scratch,
                *, b_block, seq_len, num_heads, head_dim, mlp_chunk, eps):
    l = pl.program_id(1)
    n_layers = pl.num_programs(1)
    S = seq_len
    hd = head_dim
    M = b_block * S

    # ---- embeddings (patch projection + position embedding), once per batch block ----
    @pl.when(l == 0)
    def _():
        patches = patches_ref[...].reshape(M, -1)                         # bf16 (M, P)
        emb = jnp.dot(patches, wp_ref[...],
                      preferred_element_type=jnp.float32)                 # (M, D) f32
        h_scratch[...] = emb + bp_ref[...] + pos_ref[...]

    x = h_scratch[...]                                                    # (M, D) f32
    D = x.shape[-1]

    # ---------------- LayerNorm 1 ----------------
    h = _layernorm(x, ln1_w_ref[...], ln1_b_ref[...], eps)
    hb = h.astype(jnp.bfloat16)

    # ------- QKV projections (weights stored (in, out): no in-kernel .T) -------
    q = jnp.dot(hb, wq_ref[...], preferred_element_type=jnp.float32) + bq_ref[...]
    k = jnp.dot(hb, wk_ref[...], preferred_element_type=jnp.float32) + bk_ref[...]
    v = jnp.dot(hb, wv_ref[...], preferred_element_type=jnp.float32) + bv_ref[...]

    # ---- multi-head attention: per image, per head (no (H,S,S) tensor, no big
    #      swapaxes relayouts; only one (S,S) score slab live at a time). ----
    # The 1/sqrt(head_dim) scale is folded into wq/bq on the host.
    dn = (((1,), (1,)), ((), ()))                     # contract last dims: q @ k^T
    for b in range(b_block):
        r0 = b * S
        o_heads = []
        for h_i in range(num_heads):
            c0 = h_i * hd
            qh = q[r0:r0 + S, c0:c0 + hd].astype(jnp.bfloat16)            # (S, hd)
            kh = k[r0:r0 + S, c0:c0 + hd].astype(jnp.bfloat16)
            vh = v[r0:r0 + S, c0:c0 + hd].astype(jnp.bfloat16)
            s = jax.lax.dot_general(qh, kh, dn,
                                    preferred_element_type=jnp.float32)   # (S, S) f32
            s = s - jnp.max(s, axis=-1, keepdims=True)
            p = jnp.exp(s)
            p = p * pl.reciprocal(jnp.sum(p, axis=-1, keepdims=True), approx=True)
            o_heads.append(jnp.dot(p.astype(jnp.bfloat16), vh,
                                   preferred_element_type=jnp.float32))   # (S, hd)
        # lane-dense (S, D) slab per image -> unmasked stores
        attn_scratch[pl.ds(r0, S), :] = jnp.concatenate(o_heads, axis=-1)

    attn = jnp.dot(attn_scratch[...].astype(jnp.bfloat16), wo_ref[...],
                   preferred_element_type=jnp.float32) + bo_ref[...]
    x1 = attn + x                                                         # residual 1

    # ---------------- LayerNorm 2 + tanh-GELU MLP (tiled over I) ----------------
    h2 = _layernorm(x1, ln2_w_ref[...], ln2_b_ref[...], eps)
    h2b = h2.astype(jnp.bfloat16)
    inter = w1_ref.shape[1]
    n_chunks = inter // mlp_chunk
    y = x1 + b2_ref[...]                  # residual 2 + fc2 bias folded into the init
    for ci in range(n_chunks):
        i0 = ci * mlp_chunk
        mc = jnp.dot(h2b, w1_ref[:, i0:i0 + mlp_chunk],
                     preferred_element_type=jnp.float32) + b1_ref[:, i0:i0 + mlp_chunk]
        mc = _gelu_tanh(mc)                                               # f32 on EUP
        y = y + jnp.dot(mc.astype(jnp.bfloat16), w2_ref[i0:i0 + mlp_chunk, :],
                        preferred_element_type=jnp.float32)

    h_scratch[...] = y                                                    # layer carry

    # ---- post layernorm, fused into the last layer step ----
    @pl.when(l == n_layers - 1)
    def _():
        z = _layernorm(y, postln_w_ref[...], postln_b_ref[...], eps)
        out_ref[...] = z.reshape(b_block, S, D).astype(out_ref.dtype)


def _pick_b_block(batch, seq, dim):
    """Largest divisor of batch keeping the activation slab modest."""
    best = 1
    for cand in range(1, batch + 1):
        if batch % cand == 0 and cand * seq <= 1024 and cand * seq * dim * 4 <= (4 << 20):
            best = cand
    return best


def _pick_chunk(total, target):
    c = min(total, target)
    while total % c:
        c -= 1
    return c


def _vmem_limit_bytes(layer_arrays, const_arrays, post_arrays,
                      b_block, seq, patch_dim, dim, n_layers):
    def nbytes(a):
        return int(a.size) * a.dtype.itemsize
    per_layer = sum(nbytes(a) // n_layers for a in layer_arrays)
    consts = sum(nbytes(a) for a in const_arrays) + sum(nbytes(a) for a in post_arrays)
    io = b_block * seq * patch_dim * 2 + b_block * seq * dim * 4
    scratch = 2 * b_block * seq * dim * 4
    footprint = 2 * (per_layer + io) + consts + scratch      # double-buffered streams
    # generous headroom for compiler-internal temporaries; clamp to a v7x-safe cap.
    return int(min(max(2 * footprint + (16 << 20), 32 << 20), 56 << 20))


def siglip_vision_transformer(pixel_values, params, *, patch_size, num_heads, eps,
                              b_block=None):
    """Full SiglipVisionTransformer forward. pixel_values: (B, C, H, W) f32."""
    B, C, H, W = pixel_values.shape
    p = patch_size
    gh, gw = H // p, W // p
    S = gh * gw
    P = C * p * p
    D = params["wp"].shape[1]
    L = params["wq"].shape[0]
    inter = params["w1"].shape[2]
    head_dim = D // num_heads

    if b_block is None:
        b_block = _pick_b_block(B, S, D)
    M = b_block * S
    n_bb = B // b_block

    # Non-overlapping patch extraction: Conv2d(kernel=stride=patch) is a
    # per-patch linear projection.  Feature flatten order (c, ph, pw) matches
    # torch's conv weight.reshape(D, C*p*p).  Cast to bf16 on the host (the
    # matmul operand is bf16 anyway) -> half the patch DMA traffic.
    patches = pixel_values.reshape(B, C, gh, p, gw, p)
    patches = patches.transpose(0, 2, 4, 1, 3, 5).reshape(B, S, P).astype(jnp.bfloat16)

    # Position embedding pre-tiled to the batch block on the host (no in-kernel
    # broadcast_in_dim).
    pos_tiled = jnp.tile(params["pos"], (b_block, 1))                     # (M, D)

    mlp_chunk = _pick_chunk(inter, 512)

    const_arrays = [pos_tiled, params["wp"], params["bp"]]
    layer_arrays = [params[n] for n in (
        "ln1_w", "ln1_b", "wq", "bq", "wk", "bk", "wv", "bv", "wo", "bo",
        "ln2_w", "ln2_b", "w1", "b1", "w2", "b2")]
    post_arrays = [params["postln_w"], params["postln_b"]]

    patches_spec = pl.BlockSpec((b_block, S, P), lambda bb, l: (bb, 0, 0))
    const_specs = [pl.BlockSpec(a.shape, lambda bb, l: (0, 0)) for a in const_arrays]
    layer_specs = [pl.BlockSpec((None,) + a.shape[1:], lambda bb, l: (l, 0, 0))
                   for a in layer_arrays]
    post_specs = [pl.BlockSpec(a.shape, lambda bb, l: (0, 0)) for a in post_arrays]

    kernel = functools.partial(_vit_kernel, b_block=b_block, seq_len=S,
                               num_heads=num_heads, head_dim=head_dim,
                               mlp_chunk=mlp_chunk, eps=eps)

    vmem_limit = _vmem_limit_bytes(layer_arrays, const_arrays, post_arrays,
                                   b_block, S, P, D, L)

    return pl.pallas_call(
        kernel,
        out_shape=jax.ShapeDtypeStruct((B, S, D), jnp.float32),
        grid=(n_bb, L),
        in_specs=[patches_spec] + const_specs + layer_specs + post_specs,
        out_specs=pl.BlockSpec((b_block, S, D), lambda bb, l: (bb, 0, 0)),
        scratch_shapes=[pltpu.VMEM((M, D), jnp.float32),     # layer-carried activations
                        pltpu.VMEM((M, D), jnp.float32)],    # attention output slab
        compiler_params=pltpu.CompilerParams(
            dimension_semantics=("parallel", "arbitrary"),
            vmem_limit_bytes=vmem_limit),
    )(patches, *const_arrays, *layer_arrays, *post_arrays)


# ------------------------- deterministic parameter init ----------------------
def init_params(key, *, num_layers, hidden, intermediate, patch_dim, seq_len,
                num_heads):
    head_dim = hidden // num_heads
    attn_scale = float(head_dim) ** (-0.5)
    ks = iter(jax.random.split(key, 40))

    def mat(in_f, out_f):
        # stored as (in_features, out_features) == torch Linear weight, transposed
        return jax.random.normal(next(ks), (in_f, out_f), jnp.float32) * in_f ** -0.5

    def lmat(in_f, out_f):
        return (jax.random.normal(next(ks), (num_layers, in_f, out_f), jnp.float32)
                * in_f ** -0.5)

    def lvec(n, scl=0.01):
        return scl * jax.random.normal(next(ks), (num_layers, 1, n), jnp.float32)

    wq = lmat(hidden, hidden) * attn_scale          # attention scale folded in
    bq = lvec(hidden) * attn_scale

    return {
        # embeddings (patch projection weight is the flattened Conv2d kernel)
        "wp": mat(patch_dim, hidden).astype(jnp.bfloat16),
        "bp": 0.01 * jax.random.normal(next(ks), (1, hidden), jnp.float32),
        "pos": 0.02 * jax.random.normal(next(ks), (seq_len, hidden), jnp.float32),
        # encoder layers, stacked along a leading L axis
        "ln1_w": 1.0 + lvec(hidden, 0.02), "ln1_b": lvec(hidden),
        "wq": wq.astype(jnp.bfloat16), "bq": bq,
        "wk": lmat(hidden, hidden).astype(jnp.bfloat16), "bk": lvec(hidden),
        "wv": lmat(hidden, hidden).astype(jnp.bfloat16), "bv": lvec(hidden),
        "wo": lmat(hidden, hidden).astype(jnp.bfloat16), "bo": lvec(hidden),
        "ln2_w": 1.0 + lvec(hidden, 0.02), "ln2_b": lvec(hidden),
        "w1": lmat(hidden, intermediate).astype(jnp.bfloat16), "b1": lvec(intermediate),
        "w2": lmat(intermediate, hidden).astype(jnp.bfloat16), "b2": lvec(hidden),
        # post layernorm
        "postln_w": jnp.ones((1, hidden), jnp.float32),
        "postln_b": jnp.zeros((1, hidden), jnp.float32),
    }


if __name__ == "__main__":
    # Small SiglipVisionConfig-consistent shapes (lane-dense hidden=128):
    #   hidden_size=128, intermediate_size=256, num_attention_heads=4,
    #   num_hidden_layers=2, num_channels=3, image_size=32, patch_size=8,
    #   layer_norm_eps=1e-6  ->  seq_len = (32/8)^2 = 16 patch tokens.
    B = 2
    CHANNELS, IMAGE, PATCH = 3, 32, 8
    HIDDEN, INTER, HEADS, LAYERS = 128, 256, 4, 2
    EPS = 1e-6
    SEQ = (IMAGE // PATCH) ** 2
    PDIM = CHANNELS * PATCH * PATCH

    root = jax.random.PRNGKey(0)
    k_x, k_p = jax.random.split(root)
    pixel_values = jax.random.normal(k_x, (B, CHANNELS, IMAGE, IMAGE), jnp.float32)
    params = init_params(k_p, num_layers=LAYERS, hidden=HIDDEN,
                         intermediate=INTER, patch_dim=PDIM, seq_len=SEQ,
                         num_heads=HEADS)

    # attention_dropout is 0.0 and never applied in the reference forward.
    out = siglip_vision_transformer(pixel_values, params,
                                    patch_size=PATCH, num_heads=HEADS, eps=EPS)
    out = jax.block_until_ready(out)
    assert out.shape == (B, SEQ, HIDDEN) and out.dtype == jnp.float32

    print("KERNEL_OK")
</pallas_src>

<mosaic_0001>
module attributes {stable_mosaic.version = 11 : i64} {
  func.func @_vit_kernel(%arg0: i32, %arg1: i32, %arg2: memref<2x16x192xbf16, #tpu.memory_space<vmem>>, %arg3: memref<32x128xf32, #tpu.memory_space<vmem>>, %arg4: memref<192x128xbf16, #tpu.memory_space<vmem>>, %arg5: memref<1x128xf32, #tpu.memory_space<vmem>>, %arg6: memref<1x1x128xf32, #tpu.memory_space<vmem>>, %arg7: memref<1x1x128xf32, #tpu.memory_space<vmem>>, %arg8: memref<1x128x128xbf16, #tpu.memory_space<vmem>>, %arg9: memref<1x1x128xf32, #tpu.memory_space<vmem>>, %arg10: memref<1x128x128xbf16, #tpu.memory_space<vmem>>, %arg11: memref<1x1x128xf32, #tpu.memory_space<vmem>>, %arg12: memref<1x128x128xbf16, #tpu.memory_space<vmem>>, %arg13: memref<1x1x128xf32, #tpu.memory_space<vmem>>, %arg14: memref<1x128x128xbf16, #tpu.memory_space<vmem>>, %arg15: memref<1x1x128xf32, #tpu.memory_space<vmem>>, %arg16: memref<1x1x128xf32, #tpu.memory_space<vmem>>, %arg17: memref<1x1x128xf32, #tpu.memory_space<vmem>>, %arg18: memref<1x128x256xbf16, #tpu.memory_space<vmem>>, %arg19: memref<1x1x256xf32, #tpu.memory_space<vmem>>, %arg20: memref<1x256x128xbf16, #tpu.memory_space<vmem>>, %arg21: memref<1x1x128xf32, #tpu.memory_space<vmem>>, %arg22: memref<1x128xf32, #tpu.memory_space<vmem>>, %arg23: memref<1x128xf32, #tpu.memory_space<vmem>>, %arg24: memref<2x16x128xf32, #tpu.memory_space<vmem>>, %arg25: memref<32x128xf32, #tpu.memory_space<vmem>>, %arg26: memref<32x128xf32, #tpu.memory_space<vmem>>) attributes {dimension_semantics = [#tpu.dimension_semantics<parallel>, #tpu.dimension_semantics<arbitrary>], iteration_bounds = array<i64: 1, 2>, scalar_prefetch = 0 : i64, scratch_operands = 2 : i64, tpu.core_type = #tpu.core_type<tc>, window_params = [{transform_indices = @transform_0, window_bounds = array<i64: 2, 16, 192>}, {pipeline_mode = #tpu.pipeline_mode<synchronous>, transform_indices = @transform_1, window_bounds = array<i64: 32, 128>}, {pipeline_mode = #tpu.pipeline_mode<synchronous>, transform_indices = @transform_2, window_bounds = array<i64: 192, 128>}, {pipeline_mode = #tpu.pipeline_mode<synchronous>, transform_indices = @transform_3, window_bounds = array<i64: 1, 128>}, {transform_indices = @transform_4, window_bounds = array<i64: 1, 1, 128>}, {transform_indices = @transform_5, window_bounds = array<i64: 1, 1, 128>}, {transform_indices = @transform_6, window_bounds = array<i64: 1, 128, 128>}, {transform_indices = @transform_7, window_bounds = array<i64: 1, 1, 128>}, {transform_indices = @transform_8, window_bounds = array<i64: 1, 128, 128>}, {transform_indices = @transform_9, window_bounds = array<i64: 1, 1, 128>}, {transform_indices = @transform_10, window_bounds = array<i64: 1, 128, 128>}, {transform_indices = @transform_11, window_bounds = array<i64: 1, 1, 128>}, {transform_indices = @transform_12, window_bounds = array<i64: 1, 128, 128>}, {transform_indices = @transform_13, window_bounds = array<i64: 1, 1, 128>}, {transform_indices = @transform_14, window_bounds = array<i64: 1, 1, 128>}, {transform_indices = @transform_15, window_bounds = array<i64: 1, 1, 128>}, {transform_indices = @transform_16, window_bounds = array<i64: 1, 128, 256>}, {transform_indices = @transform_17, window_bounds = array<i64: 1, 1, 256>}, {transform_indices = @transform_18, window_bounds = array<i64: 1, 256, 128>}, {transform_indices = @transform_19, window_bounds = array<i64: 1, 1, 128>}, {pipeline_mode = #tpu.pipeline_mode<synchronous>, transform_indices = @transform_20, window_bounds = array<i64: 1, 128>}, {pipeline_mode = #tpu.pipeline_mode<synchronous>, transform_indices = @transform_21, window_bounds = array<i64: 1, 128>}, {transform_indices = @transform_22, window_bounds = array<i64: 2, 16, 128>}]} {
    %c0_i32 = arith.constant 0 : i32
    %0 = arith.cmpi eq, %arg1, %c0_i32 : i32
    %1 = arith.extui %0 : i1 to i32
    %c0_i32_0 = arith.constant 0 : i32
    %2 = arith.cmpi ne, %1, %c0_i32_0 : i32
    scf.if %2 {
      %c0_109 = arith.constant 0 : index
      %c0_110 = arith.constant 0 : index
      %c0_111 = arith.constant 0 : index
      %274 = vector.load %arg2[%c0_109, %c0_110, %c0_111] : memref<2x16x192xbf16, #tpu.memory_space<vmem>>, vector<2x16x192xbf16>
      %275 = vector.shape_cast %274 : vector<2x16x192xbf16> to vector<32x192xbf16>
      %c0_112 = arith.constant 0 : index
      %c0_113 = arith.constant 0 : index
      %276 = vector.load %arg4[%c0_112, %c0_113] : memref<192x128xbf16, #tpu.memory_space<vmem>>, vector<192x128xbf16>
      %cst_114 = arith.constant dense<0.000000e+00> : vector<32x128xf32>
      %277 = tpu.matmul %275, %276, %cst_114 {dimension_numbers = #tpu.dot_dimension_numbers<[1], [0], [0], [1], [0, 0, 1, 1], [], []>} : vector<32x192xbf16>, vector<192x128xbf16>, vector<32x128xf32> -> vector<32x128xf32>
      %c0_115 = arith.constant 0 : index
      %c0_116 = arith.constant 0 : index
      %278 = vector.load %arg5[%c0_115, %c0_116] : memref<1x128xf32, #tpu.memory_space<vmem>>, vector<1x128xf32>
      %279 = vector.broadcast %278 : vector<1x128xf32> to vector<32x128xf32>
      %280 = arith.addf %277, %279 : vector<32x128xf32>
      %c0_117 = arith.constant 0 : index
      %c0_118 = arith.constant 0 : index
      %281 = vector.load %arg3[%c0_117, %c0_118] : memref<32x128xf32, #tpu.memory_space<vmem>>, vector<32x128xf32>
      %282 = arith.addf %280, %281 : vector<32x128xf32>
      %c0_119 = arith.constant 0 : index
      %c0_120 = arith.constant 0 : index
      %283 = vector.load %arg25[%c0_119, %c0_120] : memref<32x128xf32, #tpu.memory_space<vmem>>, vector<32x128xf32>
      tpu.vector_store %arg25[%c0_119, %c0_120], %282 {strides = array<i32>} : memref<32x128xf32, #tpu.memory_space<vmem>>, vector<32x128xf32>,
    } else {
    }
    %c0 = arith.constant 0 : index
    %c0_1 = arith.constant 0 : index
    %3 = vector.load %arg25[%c0, %c0_1] : memref<32x128xf32, #tpu.memory_space<vmem>>, vector<32x128xf32>
    %c0_2 = arith.constant 0 : index
    %c0_3 = arith.constant 0 : index
    %c0_4 = arith.constant 0 : index
    %4 = vector.load %arg6[%c0_2, %c0_3, %c0_4] : memref<1x1x128xf32, #tpu.memory_space<vmem>>, vector<1x1x128xf32>
    %5 = vector.shape_cast %4 : vector<1x1x128xf32> to vector<1x128xf32>
    %c0_5 = arith.constant 0 : index
    %c0_6 = arith.constant 0 : index
    %c0_7 = arith.constant 0 : index
    %6 = vector.load %arg7[%c0_5, %c0_6, %c0_7] : memref<1x1x128xf32, #tpu.memory_space<vmem>>, vector<1x1x128xf32>
    %7 = vector.shape_cast %6 : vector<1x1x128xf32> to vector<1x128xf32>
    %cst = arith.constant dense<0.000000e+00> : vector<32xf32>
    %8 = vector.multi_reduction <add>, %3, %cst [1] : vector<32x128xf32> to vector<32xf32>
    %9 = vector.shape_cast %8 : vector<32xf32> to vector<32x1xf32>
    %cst_8 = arith.constant 1.280000e+02 : f32
    %10 = vector.broadcast %cst_8 : f32 to vector<32x1xf32>
    %11 = arith.divf %9, %10 : vector<32x1xf32>
    %12 = vector.broadcast %11 : vector<32x1xf32> to vector<32x128xf32>
    %13 = arith.subf %3, %12 : vector<32x128xf32>
    %14 = arith.mulf %13, %13 : vector<32x128xf32>
    %cst_9 = arith.constant dense<0.000000e+00> : vector<32xf32>
    %15 = vector.multi_reduction <add>, %14, %cst_9 [1] : vector<32x128xf32> to vector<32xf32>
    %16 = vector.shape_cast %15 : vector<32xf32> to vector<32x1xf32>
    %cst_10 = arith.constant 1.280000e+02 : f32
    %17 = vector.broadcast %cst_10 : f32 to vector<32x1xf32>
    %18 = arith.divf %16, %17 : vector<32x1xf32>
    %cst_11 = arith.constant 9.99999997E-7 : f32
    %19 = vector.broadcast %cst_11 : f32 to vector<32x1xf32>
    %20 = arith.addf %18, %19 : vector<32x1xf32>
    %21 = math.rsqrt %20 : vector<32x1xf32>
    %22 = vector.broadcast %21 : vector<32x1xf32> to vector<32x128xf32>
    %23 = arith.mulf %13, %22 : vector<32x128xf32>
    %24 = vector.broadcast %5 : vector<1x128xf32> to vector<32x128xf32>
    %25 = arith.mulf %23, %24 : vector<32x128xf32>
    %26 = vector.broadcast %7 : vector<1x128xf32> to vector<32x128xf32>
    %27 = arith.addf %25, %26 : vector<32x128xf32>
    %28 = arith.truncf %27 : vector<32x128xf32> to vector<32x128xbf16>
    %c0_12 = arith.constant 0 : index
    %c0_13 = arith.constant 0 : index
    %c0_14 = arith.constant 0 : index
    %29 = vector.load %arg8[%c0_12, %c0_13, %c0_14] : memref<1x128x128xbf16, #tpu.memory_space<vmem>>, vector<1x128x128xbf16>
    %30 = vector.shape_cast %29 : vector<1x128x128xbf16> to vector<128x128xbf16>
    %cst_15 = arith.constant dense<0.000000e+00> : vector<32x128xf32>
    %31 = tpu.matmul %28, %30, %cst_15 {dimension_numbers = #tpu.dot_dimension_numbers<[1], [0], [0], [1], [0, 0, 1, 1], [], []>} : vector<32x128xbf16>, vector<128x128xbf16>, vector<32x128xf32> -> vector<32x128xf32>
    %c0_16 = arith.constant 0 : index
    %c0_17 = arith.constant 0 : index
    %c0_18 = arith.constant 0 : index
    %32 = vector.load %arg9[%c0_16, %c0_17, %c0_18] : memref<1x1x128xf32, #tpu.memory_space<vmem>>, vector<1x1x128xf32>
    %33 = vector.shape_cast %32 : vector<1x1x128xf32> to vector<1x128xf32>
    %34 = vector.broadcast %33 : vector<1x128xf32> to vector<32x128xf32>
    %35 = arith.addf %31, %34 : vector<32x128xf32>
    %c0_19 = arith.constant 0 : index
    %c0_20 = arith.constant 0 : index
    %c0_21 = arith.constant 0 : index
    %36 = vector.load %arg10[%c0_19, %c0_20, %c0_21] : memref<1x128x128xbf16, #tpu.memory_space<vmem>>, vector<1x128x128xbf16>
    %37 = vector.shape_cast %36 : vector<1x128x128xbf16> to vector<128x128xbf16>
    %cst_22 = arith.constant dense<0.000000e+00> : vector<32x128xf32>
    %38 = tpu.matmul %28, %37, %cst_22 {dimension_numbers = #tpu.dot_dimension_numbers<[1], [0], [0], [1], [0, 0, 1, 1], [], []>} : vector<32x128xbf16>, vector<128x128xbf16>, vector<32x128xf32> -> vector<32x128xf32>
    %c0_23 = arith.constant 0 : index
    %c0_24 = arith.constant 0 : index
    %c0_25 = arith.constant 0 : index
    %39 = vector.load %arg11[%c0_23, %c0_24, %c0_25] : memref<1x1x128xf32, #tpu.memory_space<vmem>>, vector<1x1x128xf32>
    %40 = vector.shape_cast %39 : vector<1x1x128xf32> to vector<1x128xf32>
    %41 = vector.broadcast %40 : vector<1x128xf32> to vector<32x128xf32>
    %42 = arith.addf %38, %41 : vector<32x128xf32>
    %c0_26 = arith.constant 0 : index
    %c0_27 = arith.constant 0 : index
    %c0_28 = arith.constant 0 : index
    %43 = vector.load %arg12[%c0_26, %c0_27, %c0_28] : memref<1x128x128xbf16, #tpu.memory_space<vmem>>, vector<1x128x128xbf16>
    %44 = vector.shape_cast %43 : vector<1x128x128xbf16> to vector<128x128xbf16>
    %cst_29 = arith.constant dense<0.000000e+00> : vector<32x128xf32>
    %45 = tpu.matmul %28, %44, %cst_29 {dimension_numbers = #tpu.dot_dimension_numbers<[1], [0], [0], [1], [0, 0, 1, 1], [], []>} : vector<32x128xbf16>, vector<128x128xbf16>, vector<32x128xf32> -> vector<32x128xf32>
    %c0_30 = arith.constant 0 : index
    %c0_31 = arith.constant 0 : index
    %c0_32 = arith.constant 0 : index
    %46 = vector.load %arg13[%c0_30, %c0_31, %c0_32] : memref<1x1x128xf32, #tpu.memory_space<vmem>>, vector<1x1x128xf32>
    %47 = vector.shape_cast %46 : vector<1x1x128xf32> to vector<1x128xf32>
    %48 = vector.broadcast %47 : vector<1x128xf32> to vector<32x128xf32>
    %49 = arith.addf %45, %48 : vector<32x128xf32>
    %50 = vector.extract_strided_slice %35 {offsets = [0, 0], sizes = [16, 32], strides = [1, 1]} : vector<32x128xf32> to vector<16x32xf32>
    %51 = arith.truncf %50 : vector<16x32xf32> to vector<16x32xbf16>
    %52 = vector.extract_strided_slice %42 {offsets = [0, 0], sizes = [16, 32], strides = [1, 1]} : vector<32x128xf32> to vector<16x32xf32>
    %53 = arith.truncf %52 : vector<16x32xf32> to vector<16x32xbf16>
    %54 = vector.extract_strided_slice %49 {offsets = [0, 0], sizes = [16, 32], strides = [1, 1]} : vector<32x128xf32> to vector<16x32xf32>
    %55 = arith.truncf %54 : vector<16x32xf32> to vector<16x32xbf16>
    %cst_33 = arith.constant dense<0.000000e+00> : vector<16x16xf32>
    %56 = tpu.matmul %51, %53, %cst_33 {dimension_numbers = #tpu.dot_dimension_numbers<[1], [1], [0], [0], [0, 0, 1, 0], [], []>} : vector<16x32xbf16>, vector<16x32xbf16>, vector<16x16xf32> -> vector<16x16xf32>
    %cst_34 = arith.constant dense<0xFF800000> : vector<16xf32>
    %57 = vector.multi_reduction <maximumf>, %56, %cst_34 [1] : vector<16x16xf32> to vector<16xf32>
    %58 = vector.shape_cast %57 : vector<16xf32> to vector<16x1xf32>
    %59 = vector.broadcast %58 : vector<16x1xf32> to vector<16x16xf32>
    %60 = arith.subf %56, %59 : vector<16x16xf32>
    %61 = math.exp %60 : vector<16x16xf32>
    %cst_35 = arith.constant dense<0.000000e+00> : vector<16xf32>
    %62 = vector.multi_reduction <add>, %61, %cst_35 [1] : vector<16x16xf32> to vector<16xf32>
    %63 = vector.shape_cast %62 : vector<16xf32> to vector<16x1xf32>
    %64 = tpu.reciprocal %63 {approx = true} : vector<16x1xf32> -> vector<16x1xf32>
    %65 = vector.broadcast %64 : vector<16x1xf32> to vector<16x16xf32>
    %66 = arith.mulf %61, %65 : vector<16x16xf32>
    %67 = arith.truncf %66 : vector<16x16xf32> to vector<16x16xbf16>
    %cst_36 = arith.constant dense<0.000000e+00> : vector<16x32xf32>
    %68 = tpu.matmul %67, %55, %cst_36 {dimension_numbers = #tpu.dot_dimension_numbers<[1], [0], [0], [1], [0, 0, 1, 1], [], []>} : vector<16x16xbf16>, vector<16x32xbf16>, vector<16x32xf32> -> vector<16x32xf32>
    %69 = vector.extract_strided_slice %35 {offsets = [0, 32], sizes = [16, 32], strides = [1, 1]} : vector<32x128xf32> to vector<16x32xf32>
    %70 = arith.truncf %69 : vector<16x32xf32> to vector<16x32xbf16>
    %71 = vector.extract_strided_slice %42 {offsets = [0, 32], sizes = [16, 32], strides = [1, 1]} : vector<32x128xf32> to vector<16x32xf32>
    %72 = arith.truncf %71 : vector<16x32xf32> to vector<16x32xbf16>
    %73 = vector.extract_strided_slice %49 {offsets = [0, 32], sizes = [16, 32], strides = [1, 1]} : vector<32x128xf32> to vector<16x32xf32>
    %74 = arith.truncf %73 : vector<16x32xf32> to vector<16x32xbf16>
    %cst_37 = arith.constant dense<0.000000e+00> : vector<16x16xf32>
    %75 = tpu.matmul %70, %72, %cst_37 {dimension_numbers = #tpu.dot_dimension_numbers<[1], [1], [0], [0], [0, 0, 1, 0], [], []>} : vector<16x32xbf16>, vector<16x32xbf16>, vector<16x16xf32> -> vector<16x16xf32>
    %cst_38 = arith.constant dense<0xFF800000> : vector<16xf32>
    %76 = vector.multi_reduction <maximumf>, %75, %cst_38 [1] : vector<16x16xf32> to vector<16xf32>
    %77 = vector.shape_cast %76 : vector<16xf32> to vector<16x1xf32>
    %78 = vector.broadcast %77 : vector<16x1xf32> to vector<16x16xf32>
    %79 = arith.subf %75, %78 : vector<16x16xf32>
    %80 = math.exp %79 : vector<16x16xf32>
    %cst_39 = arith.constant dense<0.000000e+00> : vector<16xf32>
    %81 = vector.multi_reduction <add>, %80, %cst_39 [1] : vector<16x16xf32> to vector<16xf32>
    %82 = vector.shape_cast %81 : vector<16xf32> to vector<16x1xf32>
    %83 = tpu.reciprocal %82 {approx = true} : vector<16x1xf32> -> vector<16x1xf32>
    %84 = vector.broadcast %83 : vector<16x1xf32> to vector<16x16xf32>
    %85 = arith.mulf %80, %84 : vector<16x16xf32>
    %86 = arith.truncf %85 : vector<16x16xf32> to vector<16x16xbf16>
    %cst_40 = arith.constant dense<0.000000e+00> : vector<16x32xf32>
    %87 = tpu.matmul %86, %74, %cst_40 {dimension_numbers = #tpu.dot_dimension_numbers<[1], [0], [0], [1], [0, 0, 1, 1], [], []>} : vector<16x16xbf16>, vector<16x32xbf16>, vector<16x32xf32> -> vector<16x32xf32>
    %88 = vector.extract_strided_slice %35 {offsets = [0, 64], sizes = [16, 32], strides = [1, 1]} : vector<32x128xf32> to vector<16x32xf32>
    %89 = arith.truncf %88 : vector<16x32xf32> to vector<16x32xbf16>
    %90 = vector.extract_strided_slice %42 {offsets = [0, 64], sizes = [16, 32], strides = [1, 1]} : vector<32x128xf32> to vector<16x32xf32>
    %91 = arith.truncf %90 : vector<16x32xf32> to vector<16x32xbf16>
    %92 = vector.extract_strided_slice %49 {offsets = [0, 64], sizes = [16, 32], strides = [1, 1]} : vector<32x128xf32> to vector<16x32xf32>
    %93 = arith.truncf %92 : vector<16x32xf32> to vector<16x32xbf16>
    %cst_41 = arith.constant dense<0.000000e+00> : vector<16x16xf32>
    %94 = tpu.matmul %89, %91, %cst_41 {dimension_numbers = #tpu.dot_dimension_numbers<[1], [1], [0], [0], [0, 0, 1, 0], [], []>} : vector<16x32xbf16>, vector<16x32xbf16>, vector<16x16xf32> -> vector<16x16xf32>
    %cst_42 = arith.constant dense<0xFF800000> : vector<16xf32>
    %95 = vector.multi_reduction <maximumf>, %94, %cst_42 [1] : vector<16x16xf32> to vector<16xf32>
    %96 = vector.shape_cast %95 : vector<16xf32> to vector<16x1xf32>
    %97 = vector.broadcast %96 : vector<16x1xf32> to vector<16x16xf32>
    %98 = arith.subf %94, %97 : vector<16x16xf32>
    %99 = math.exp %98 : vector<16x16xf32>
    %cst_43 = arith.constant dense<0.000000e+00> : vector<16xf32>
    %100 = vector.multi_reduction <add>, %99, %cst_43 [1] : vector<16x16xf32> to vector<16xf32>
    %101 = vector.shape_cast %100 : vector<16xf32> to vector<16x1xf32>
    %102 = tpu.reciprocal %101 {approx = true} : vector<16x1xf32> -> vector<16x1xf32>
    %103 = vector.broadcast %102 : vector<16x1xf32> to vector<16x16xf32>
    %104 = arith.mulf %99, %103 : vector<16x16xf32>
    %105 = arith.truncf %104 : vector<16x16xf32> to vector<16x16xbf16>
    %cst_44 = arith.constant dense<0.000000e+00> : vector<16x32xf32>
    %106 = tpu.matmul %105, %93, %cst_44 {dimension_numbers = #tpu.dot_dimension_numbers<[1], [0], [0], [1], [0, 0, 1, 1], [], []>} : vector<16x16xbf16>, vector<16x32xbf16>, vector<16x32xf32> -> vector<16x32xf32>
    %107 = vector.extract_strided_slice %35 {offsets = [0, 96], sizes = [16, 32], strides = [1, 1]} : vector<32x128xf32> to vector<16x32xf32>
    %108 = arith.truncf %107 : vector<16x32xf32> to vector<16x32xbf16>
    %109 = vector.extract_strided_slice %42 {offsets = [0, 96], sizes = [16, 32], strides = [1, 1]} : vector<32x128xf32> to vector<16x32xf32>
    %110 = arith.truncf %109 : vector<16x32xf32> to vector<16x32xbf16>
    %111 = vector.extract_strided_slice %49 {offsets = [0, 96], sizes = [16, 32], strides = [1, 1]} : vector<32x128xf32> to vector<16x32xf32>
    %112 = arith.truncf %111 : vector<16x32xf32> to vector<16x32xbf16>
    %cst_45 = arith.constant dense<0.000000e+00> : vector<16x16xf32>
    %113 = tpu.matmul %108, %110, %cst_45 {dimension_numbers = #tpu.dot_dimension_numbers<[1], [1], [0], [0], [0, 0, 1, 0], [], []>} : vector<16x32xbf16>, vector<16x32xbf16>, vector<16x16xf32> -> vector<16x16xf32>
    %cst_46 = arith.constant dense<0xFF800000> : vector<16xf32>
    %114 = vector.multi_reduction <maximumf>, %113, %cst_46 [1] : vector<16x16xf32> to vector<16xf32>
    %115 = vector.shape_cast %114 : vector<16xf32> to vector<16x1xf32>
    %116 = vector.broadcast %115 : vector<16x1xf32> to vector<16x16xf32>
    %117 = arith.subf %113, %116 : vector<16x16xf32>
    %118 = math.exp %117 : vector<16x16xf32>
    %cst_47 = arith.constant dense<0.000000e+00> : vector<16xf32>
    %119 = vector.multi_reduction <add>, %118, %cst_47 [1] : vector<16x16xf32> to vector<16xf32>
    %120 = vector.shape_cast %119 : vector<16xf32> to vector<16x1xf32>
    %121 = tpu.reciprocal %120 {approx = true} : vector<16x1xf32> -> vector<16x1xf32>
    %122 = vector.broadcast %121 : vector<16x1xf32> to vector<16x16xf32>
    %123 = arith.mulf %118, %122 : vector<16x16xf32>
    %124 = arith.truncf %123 : vector<16x16xf32> to vector<16x16xbf16>
    %cst_48 = arith.constant dense<0.000000e+00> : vector<16x32xf32>
    %125 = tpu.matmul %124, %112, %cst_48 {dimension_numbers = #tpu.dot_dimension_numbers<[1], [0], [0], [1], [0, 0, 1, 1], [], []>} : vector<16x16xbf16>, vector<16x32xbf16>, vector<16x32xf32> -> vector<16x32xf32>
    %126 = tpu.concatenate %68, %87, %106, %125 in 1 : vector<16x32xf32>, vector<16x32xf32>, vector<16x32xf32>, vector<16x32xf32> -> vector<16x128xf32>
    %c0_49 = arith.constant 0 : index
    %c0_50 = arith.constant 0 : index
    %127 = vector.load %arg26[%c0_49, %c0_50] : memref<32x128xf32, #tpu.memory_space<vmem>>, vector<16x128xf32>
    tpu.vector_store %arg26[%c0_49, %c0_50], %126 {strides = array<i32>} : memref<32x128xf32, #tpu.memory_space<vmem>>, vector<16x128xf32>,
    %128 = vector.extract_strided_slice %35 {offsets = [16, 0], sizes = [16, 32], strides = [1, 1]} : vector<32x128xf32> to vector<16x32xf32>
    %129 = arith.truncf %128 : vector<16x32xf32> to vector<16x32xbf16>
    %130 = vector.extract_strided_slice %42 {offsets = [16, 0], sizes = [16, 32], strides = [1, 1]} : vector<32x128xf32> to vector<16x32xf32>
    %131 = arith.truncf %130 : vector<16x32xf32> to vector<16x32xbf16>
    %132 = vector.extract_strided_slice %49 {offsets = [16, 0], sizes = [16, 32], strides = [1, 1]} : vector<32x128xf32> to vector<16x32xf32>
    %133 = arith.truncf %132 : vector<16x32xf32> to vector<16x32xbf16>
    %cst_51 = arith.constant dense<0.000000e+00> : vector<16x16xf32>
    %134 = tpu.matmul %129, %131, %cst_51 {dimension_numbers = #tpu.dot_dimension_numbers<[1], [1], [0], [0], [0, 0, 1, 0], [], []>} : vector<16x32xbf16>, vector<16x32xbf16>, vector<16x16xf32> -> vector<16x16xf32>
    %cst_52 = arith.constant dense<0xFF800000> : vector<16xf32>
    %135 = vector.multi_reduction <maximumf>, %134, %cst_52 [1] : vector<16x16xf32> to vector<16xf32>
    %136 = vector.shape_cast %135 : vector<16xf32> to vector<16x1xf32>
    %137 = vector.broadcast %136 : vector<16x1xf32> to vector<16x16xf32>
    %138 = arith.subf %134, %137 : vector<16x16xf32>
    %139 = math.exp %138 : vector<16x16xf32>
    %cst_53 = arith.constant dense<0.000000e+00> : vector<16xf32>
    %140 = vector.multi_reduction <add>, %139, %cst_53 [1] : vector<16x16xf32> to vector<16xf32>
    %141 = vector.shape_cast %140 : vector<16xf32> to vector<16x1xf32>
    %142 = tpu.reciprocal %141 {approx = true} : vector<16x1xf32> -> vector<16x1xf32>
    %143 = vector.broadcast %142 : vector<16x1xf32> to vector<16x16xf32>
    %144 = arith.mulf %139, %143 : vector<16x16xf32>
    %145 = arith.truncf %144 : vector<16x16xf32> to vector<16x16xbf16>
    %cst_54 = arith.constant dense<0.000000e+00> : vector<16x32xf32>
    %146 = tpu.matmul %145, %133, %cst_54 {dimension_numbers = #tpu.dot_dimension_numbers<[1], [0], [0], [1], [0, 0, 1, 1], [], []>} : vector<16x16xbf16>, vector<16x32xbf16>, vector<16x32xf32> -> vector<16x32xf32>
    %147 = vector.extract_strided_slice %35 {offsets = [16, 32], sizes = [16, 32], strides = [1, 1]} : vector<32x128xf32> to vector<16x32xf32>
    %148 = arith.truncf %147 : vector<16x32xf32> to vector<16x32xbf16>
    %149 = vector.extract_strided_slice %42 {offsets = [16, 32], sizes = [16, 32], strides = [1, 1]} : vector<32x128xf32> to vector<16x32xf32>
    %150 = arith.truncf %149 : vector<16x32xf32> to vector<16x32xbf16>
    %151 = vector.extract_strided_slice %49 {offsets = [16, 32], sizes = [16, 32], strides = [1, 1]} : vector<32x128xf32> to vector<16x32xf32>
    %152 = arith.truncf %151 : vector<16x32xf32> to vector<16x32xbf16>
    %cst_55 = arith.constant dense<0.000000e+00> : vector<16x16xf32>
    %153 = tpu.matmul %148, %150, %cst_55 {dimension_numbers = #tpu.dot_dimension_numbers<[1], [1], [0], [0], [0, 0, 1, 0], [], []>} : vector<16x32xbf16>, vector<16x32xbf16>, vector<16x16xf32> -> vector<16x16xf32>
    %cst_56 = arith.constant dense<0xFF800000> : vector<16xf32>
    %154 = vector.multi_reduction <maximumf>, %153, %cst_56 [1] : vector<16x16xf32> to vector<16xf32>
    %155 = vector.shape_cast %154 : vector<16xf32> to vector<16x1xf32>
    %156 = vector.broadcast %155 : vector<16x1xf32> to vector<16x16xf32>
    %157 = arith.subf %153, %156 : vector<16x16xf32>
    %158 = math.exp %157 : vector<16x16xf32>
    %cst_57 = arith.constant dense<0.000000e+00> : vector<16xf32>
    %159 = vector.multi_reduction <add>, %158, %cst_57 [1] : vector<16x16xf32> to vector<16xf32>
    %160 = vector.shape_cast %159 : vector<16xf32> to vector<16x1xf32>
    %161 = tpu.reciprocal %160 {approx = true} : vector<16x1xf32> -> vector<16x1xf32>
    %162 = vector.broadcast %161 : vector<16x1xf32> to vector<16x16xf32>
    %163 = arith.mulf %158, %162 : vector<16x16xf32>
    %164 = arith.truncf %163 : vector<16x16xf32> to vector<16x16xbf16>
    %cst_58 = arith.constant dense<0.000000e+00> : vector<16x32xf32>
    %165 = tpu.matmul %164, %152, %cst_58 {dimension_numbers = #tpu.dot_dimension_numbers<[1], [0], [0], [1], [0, 0, 1, 1], [], []>} : vector<16x16xbf16>, vector<16x32xbf16>, vector<16x32xf32> -> vector<16x32xf32>
    %166 = vector.extract_strided_slice %35 {offsets = [16, 64], sizes = [16, 32], strides = [1, 1]} : vector<32x128xf32> to vector<16x32xf32>
    %167 = arith.truncf %166 : vector<16x32xf32> to vector<16x32xbf16>
    %168 = vector.extract_strided_slice %42 {offsets = [16, 64], sizes = [16, 32], strides = [1, 1]} : vector<32x128xf32> to vector<16x32xf32>
    %169 = arith.truncf %168 : vector<16x32xf32> to vector<16x32xbf16>
    %170 = vector.extract_strided_slice %49 {offsets = [16, 64], sizes = [16, 32], strides = [1, 1]} : vector<32x128xf32> to vector<16x32xf32>
    %171 = arith.truncf %170 : vector<16x32xf32> to vector<16x32xbf16>
    %cst_59 = arith.constant dense<0.000000e+00> : vector<16x16xf32>
    %172 = tpu.matmul %167, %169, %cst_59 {dimension_numbers = #tpu.dot_dimension_numbers<[1], [1], [0], [0], [0, 0, 1, 0], [], []>} : vector<16x32xbf16>, vector<16x32xbf16>, vector<16x16xf32> -> vector<16x16xf32>
    %cst_60 = arith.constant dense<0xFF800000> : vector<16xf32>
    %173 = vector.multi_reduction <maximumf>, %172, %cst_60 [1] : vector<16x16xf32> to vector<16xf32>
    %174 = vector.shape_cast %173 : vector<16xf32> to vector<16x1xf32>
    %175 = vector.broadcast %174 : vector<16x1xf32> to vector<16x16xf32>
    %176 = arith.subf %172, %175 : vector<16x16xf32>
    %177 = math.exp %176 : vector<16x16xf32>
    %cst_61 = arith.constant dense<0.000000e+00> : vector<16xf32>
    %178 = vector.multi_reduction <add>, %177, %cst_61 [1] : vector<16x16xf32> to vector<16xf32>
    %179 = vector.shape_cast %178 : vector<16xf32> to vector<16x1xf32>
    %180 = tpu.reciprocal %179 {approx = true} : vector<16x1xf32> -> vector<16x1xf32>
    %181 = vector.broadcast %180 : vector<16x1xf32> to vector<16x16xf32>
    %182 = arith.mulf %177, %181 : vector<16x16xf32>
    %183 = arith.truncf %182 : vector<16x16xf32> to vector<16x16xbf16>
    %cst_62 = arith.constant dense<0.000000e+00> : vector<16x32xf32>
    %184 = tpu.matmul %183, %171, %cst_62 {dimension_numbers = #tpu.dot_dimension_numbers<[1], [0], [0], [1], [0, 0, 1, 1], [], []>} : vector<16x16xbf16>, vector<16x32xbf16>, vector<16x32xf32> -> vector<16x32xf32>
    %185 = vector.extract_strided_slice %35 {offsets = [16, 96], sizes = [16, 32], strides = [1, 1]} : vector<32x128xf32> to vector<16x32xf32>
    %186 = arith.truncf %185 : vector<16x32xf32> to vector<16x32xbf16>
    %187 = vector.extract_strided_slice %42 {offsets = [16, 96], sizes = [16, 32], strides = [1, 1]} : vector<32x128xf32> to vector<16x32xf32>
    %188 = arith.truncf %187 : vector<16x32xf32> to vector<16x32xbf16>
    %189 = vector.extract_strided_slice %49 {offsets = [16, 96], sizes = [16, 32], strides = [1, 1]} : vector<32x128xf32> to vector<16x32xf32>
    %190 = arith.truncf %189 : vector<16x32xf32> to vector<16x32xbf16>
    %cst_63 = arith.constant dense<0.000000e+00> : vector<16x16xf32>
    %191 = tpu.matmul %186, %188, %cst_63 {dimension_numbers = #tpu.dot_dimension_numbers<[1], [1], [0], [0], [0, 0, 1, 0], [], []>} : vector<16x32xbf16>, vector<16x32xbf16>, vector<16x16xf32> -> vector<16x16xf32>
    %cst_64 = arith.constant dense<0xFF800000> : vector<16xf32>
    %192 = vector.multi_reduction <maximumf>, %191, %cst_64 [1] : vector<16x16xf32> to vector<16xf32>
    %193 = vector.shape_cast %192 : vector<16xf32> to vector<16x1xf32>
    %194 = vector.broadcast %193 : vector<16x1xf32> to vector<16x16xf32>
    %195 = arith.subf %191, %194 : vector<16x16xf32>
    %196 = math.exp %195 : vector<16x16xf32>
    %cst_65 = arith.constant dense<0.000000e+00> : vector<16xf32>
    %197 = vector.multi_reduction <add>, %196, %cst_65 [1] : vector<16x16xf32> to vector<16xf32>
    %198 = vector.shape_cast %197 : vector<16xf32> to vector<16x1xf32>
    %199 = tpu.reciprocal %198 {approx = true} : vector<16x1xf32> -> vector<16x1xf32>
    %200 = vector.broadcast %199 : vector<16x1xf32> to vector<16x16xf32>
    %201 = arith.mulf %196, %200 : vector<16x16xf32>
    %202 = arith.truncf %201 : vector<16x16xf32> to vector<16x16xbf16>
    %cst_66 = arith.constant dense<0.000000e+00> : vector<16x32xf32>
    %203 = tpu.matmul %202, %190, %cst_66 {dimension_numbers = #tpu.dot_dimension_numbers<[1], [0], [0], [1], [0, 0, 1, 1], [], []>} : vector<16x16xbf16>, vector<16x32xbf16>, vector<16x32xf32> -> vector<16x32xf32>
    %204 = tpu.concatenate %146, %165, %184, %203 in 1 : vector<16x32xf32>, vector<16x32xf32>, vector<16x32xf32>, vector<16x32xf32> -> vector<16x128xf32>
    %c16 = arith.constant 16 : index
    %c0_67 = arith.constant 0 : index
    %205 = vector.load %arg26[%c16, %c0_67] : memref<32x128xf32, #tpu.memory_space<vmem>>, vector<16x128xf32>
    tpu.vector_store %arg26[%c16, %c0_67], %204 {strides = array<i32>} : memref<32x128xf32, #tpu.memory_space<vmem>>, vector<16x128xf32>,
    %c0_68 = arith.constant 0 : index
    %c0_69 = arith.constant 0 : index
    %206 = vector.load %arg26[%c0_68, %c0_69] : memref<32x128xf32, #tpu.memory_space<vmem>>, vector<32x128xf32>
    %207 = arith.truncf %206 : vector<32x128xf32> to vector<32x128xbf16>
    %c0_70 = arith.constant 0 : index
    %c0_71 = arith.constant 0 : index
    %c0_72 = arith.constant 0 : index
    %208 = vector.load %arg14[%c0_70, %c0_71, %c0_72] : memref<1x128x128xbf16, #tpu.memory_space<vmem>>, vector<1x128x128xbf16>
    %209 = vector.shape_cast %208 : vector<1x128x128xbf16> to vector<128x128xbf16>
    %cst_73 = arith.constant dense<0.000000e+00> : vector<32x128xf32>
    %210 = tpu.matmul %207, %209, %cst_73 {dimension_numbers = #tpu.dot_dimension_numbers<[1], [0], [0], [1], [0, 0, 1, 1], [], []>} : vector<32x128xbf16>, vector<128x128xbf16>, vector<32x128xf32> -> vector<32x128xf32>
    %c0_74 = arith.constant 0 : index
    %c0_75 = arith.constant 0 : index
    %c0_76 = arith.constant 0 : index
    %211 = vector.load %arg15[%c0_74, %c0_75, %c0_76] : memref<1x1x128xf32, #tpu.memory_space<vmem>>, vector<1x1x128xf32>
    %212 = vector.shape_cast %211 : vector<1x1x128xf32> to vector<1x128xf32>
    %213 = vector.broadcast %212 : vector<1x128xf32> to vector<32x128xf32>
    %214 = arith.addf %210, %213 : vector<32x128xf32>
    %215 = arith.addf %214, %3 : vector<32x128xf32>
    %c0_77 = arith.constant 0 : index
    %c0_78 = arith.constant 0 : index
    %c0_79 = arith.constant 0 : index
    %216 = vector.load %arg16[%c0_77, %c0_78, %c0_79] : memref<1x1x128xf32, #tpu.memory_space<vmem>>, vector<1x1x128xf32>
    %217 = vector.shape_cast %216 : vector<1x1x128xf32> to vector<1x128xf32>
    %c0_80 = arith.constant 0 : index
    %c0_81 = arith.constant 0 : index
    %c0_82 = arith.constant 0 : index
    %218 = vector.load %arg17[%c0_80, %c0_81, %c0_82] : memref<1x1x128xf32, #tpu.memory_space<vmem>>, vector<1x1x128xf32>
    %219 = vector.shape_cast %218 : vector<1x1x128xf32> to vector<1x128xf32>
    %cst_83 = arith.constant dense<0.000000e+00> : vector<32xf32>
    %220 = vector.multi_reduction <add>, %215, %cst_83 [1] : vector<32x128xf32> to vector<32xf32>
    %221 = vector.shape_cast %220 : vector<32xf32> to vector<32x1xf32>
    %cst_84 = arith.constant 1.280000e+02 : f32
    %222 = vector.broadcast %cst_84 : f32 to vector<32x1xf32>
    %223 = arith.divf %221, %222 : vector<32x1xf32>
    %224 = vector.broadcast %223 : vector<32x1xf32> to vector<32x128xf32>
    %225 = arith.subf %215, %224 : vector<32x128xf32>
    %226 = arith.mulf %225, %225 : vector<32x128xf32>
    %cst_85 = arith.constant dense<0.000000e+00> : vector<32xf32>
    %227 = vector.multi_reduction <add>, %226, %cst_85 [1] : vector<32x128xf32> to vector<32xf32>
    %228 = vector.shape_cast %227 : vector<32xf32> to vector<32x1xf32>
    %cst_86 = arith.constant 1.280000e+02 : f32
    %229 = vector.broadcast %cst_86 : f32 to vector<32x1xf32>
    %230 = arith.divf %228, %229 : vector<32x1xf32>
    %cst_87 = arith.constant 9.99999997E-7 : f32
    %231 = vector.broadcast %cst_87 : f32 to vector<32x1xf32>
    %232 = arith.addf %230, %231 : vector<32x1xf32>
    %233 = math.rsqrt %232 : vector<32x1xf32>
    %234 = vector.broadcast %233 : vector<32x1xf32> to vector<32x128xf32>
    %235 = arith.mulf %225, %234 : vector<32x128xf32>
    %236 = vector.broadcast %217 : vector<1x128xf32> to vector<32x128xf32>
    %237 = arith.mulf %235, %236 : vector<32x128xf32>
    %238 = vector.broadcast %219 : vector<1x128xf32> to vector<32x128xf32>
    %239 = arith.addf %237, %238 : vector<32x128xf32>
    %240 = arith.truncf %239 : vector<32x128xf32> to vector<32x128xbf16>
    %c0_88 = arith.constant 0 : index
    %c0_89 = arith.constant 0 : index
    %c0_90 = arith.constant 0 : index
    %241 = vector.load %arg21[%c0_88, %c0_89, %c0_90] : memref<1x1x128xf32, #tpu.memory_space<vmem>>, vector<1x1x128xf32>
    %242 = vector.shape_cast %241 : vector<1x1x128xf32> to vector<1x128xf32>
    %243 = vector.broadcast %242 : vector<1x128xf32> to vector<32x128xf32>
    %244 = arith.addf %215, %243 : vector<32x128xf32>
    %c0_91 = arith.constant 0 : index
    %c0_92 = arith.constant 0 : index
    %c0_93 = arith.constant 0 : index
    %245 = vector.load %arg18[%c0_91, %c0_92, %c0_93] : memref<1x128x256xbf16, #tpu.memory_space<vmem>>, vector<1x128x256xbf16>
    %246 = vector.shape_cast %245 : vector<1x128x256xbf16> to vector<128x256xbf16>
    %cst_94 = arith.constant dense<0.000000e+00> : vector<32x256xf32>
    %247 = tpu.matmul %240, %246, %cst_94 {dimension_numbers = #tpu.dot_dimension_numbers<[1], [0], [0], [1], [0, 0, 1, 1], [], []>} : vector<32x128xbf16>, vector<128x256xbf16>, vector<32x256xf32> -> vector<32x256xf32>
    %c0_95 = arith.constant 0 : index
    %c0_96 = arith.constant 0 : index
    %c0_97 = arith.constant 0 : index
    %248 = vector.load %arg19[%c0_95, %c0_96, %c0_97] : memref<1x1x256xf32, #tpu.memory_space<vmem>>, vector<1x1x256xf32>
    %249 = vector.shape_cast %248 : vector<1x1x256xf32> to vector<1x256xf32>
    %250 = vector.broadcast %249 : vector<1x256xf32> to vector<32x256xf32>
    %251 = arith.addf %247, %250 : vector<32x256xf32>
    %cst_98 = arith.constant 5.000000e-01 : f32
    %252 = vector.broadcast %cst_98 : f32 to vector<32x256xf32>
    %253 = arith.mulf %252, %251 : vector<32x256xf32>
    %cst_99 = arith.constant 4.471500e-02 : f32
    %254 = vector.broadcast %cst_99 : f32 to vector<32x256xf32>
    %255 = arith.mulf %254, %251 : vector<32x256xf32>
    %256 = arith.mulf %255, %251 : vector<32x256xf32>
    %257 = arith.mulf %256, %251 : vector<32x256xf32>
    %258 = arith.addf %251, %257 : vector<32x256xf32>
    %cst_100 = arith.constant 0.797884583 : f32
    %259 = vector.broadcast %cst_100 : f32 to vector<32x256xf32>
    %260 = arith.mulf %259, %258 : vector<32x256xf32>
    %261 = math.tanh %260 : vector<32x256xf32>
    %cst_101 = arith.constant 1.000000e+00 : f32
    %262 = vector.broadcast %cst_101 : f32 to vector<32x256xf32>
    %263 = arith.addf %262, %261 : vector<32x256xf32>
    %264 = arith.mulf %253, %263 : vector<32x256xf32>
    %265 = arith.truncf %264 : vector<32x256xf32> to vector<32x256xbf16>
    %c0_102 = arith.constant 0 : index
    %c0_103 = arith.constant 0 : index
    %c0_104 = arith.constant 0 : index
    %266 = vector.load %arg20[%c0_102, %c0_103, %c0_104] : memref<1x256x128xbf16, #tpu.memory_space<vmem>>, vector<1x256x128xbf16>
    %267 = vector.shape_cast %266 : vector<1x256x128xbf16> to vector<256x128xbf16>
    %cst_105 = arith.constant dense<0.000000e+00> : vector<32x128xf32>
    %268 = tpu.matmul %265, %267, %cst_105 {dimension_numbers = #tpu.dot_dimension_numbers<[1], [0], [0], [1], [0, 0, 1, 1], [], []>} : vector<32x256xbf16>, vector<256x128xbf16>, vector<32x128xf32> -> vector<32x128xf32>
    %269 = arith.addf %244, %268 : vector<32x128xf32>
    %c0_106 = arith.constant 0 : index
    %c0_107 = arith.constant 0 : index
    %270 = vector.load %arg25[%c0_106, %c0_107] : memref<32x128xf32, #tpu.memory_space<vmem>>, vector<32x128xf32>
    tpu.vector_store %arg25[%c0_106, %c0_107], %269 {strides = array<i32>} : memref<32x128xf32, #tpu.memory_space<vmem>>, vector<32x128xf32>,
    %c1_i32 = arith.constant 1 : i32
    %271 = arith.cmpi eq, %arg1, %c1_i32 : i32
    %272 = arith.extui %271 : i1 to i32
    %c0_i32_108 = arith.constant 0 : i32
    %273 = arith.cmpi ne, %272, %c0_i32_108 : i32
    scf.if %273 {
      %c0_109 = arith.constant 0 : index
      %c0_110 = arith.constant 0 : index
      %274 = vector.load %arg22[%c0_109, %c0_110] : memref<1x128xf32, #tpu.memory_space<vmem>>, vector<1x128xf32>
      %c0_111 = arith.constant 0 : index
      %c0_112 = arith.constant 0 : index
      %275 = vector.load %arg23[%c0_111, %c0_112] : memref<1x128xf32, #tpu.memory_space<vmem>>, vector<1x128xf32>
      %cst_113 = arith.constant dense<0.000000e+00> : vector<32xf32>
      %276 = vector.multi_reduction <add>, %269, %cst_113 [1] : vector<32x128xf32> to vector<32xf32>
      %277 = vector.shape_cast %276 : vector<32xf32> to vector<32x1xf32>
      %cst_114 = arith.constant 1.280000e+02 : f32
      %278 = vector.broadcast %cst_114 : f32 to vector<32x1xf32>
      %279 = arith.divf %277, %278 : vector<32x1xf32>
      %280 = vector.broadcast %279 : vector<32x1xf32> to vector<32x128xf32>
      %281 = arith.subf %269, %280 : vector<32x128xf32>
      %282 = arith.mulf %281, %281 : vector<32x128xf32>
      %cst_115 = arith.constant dense<0.000000e+00> : vector<32xf32>
      %283 = vector.multi_reduction <add>, %282, %cst_115 [1] : vector<32x128xf32> to vector<32xf32>
      %284 = vector.shape_cast %283 : vector<32xf32> to vector<32x1xf32>
      %cst_116 = arith.constant 1.280000e+02 : f32
      %285 = vector.broadcast %cst_116 : f32 to vector<32x1xf32>
      %286 = arith.divf %284, %285 : vector<32x1xf32>
      %cst_117 = arith.constant 9.99999997E-7 : f32
      %287 = vector.broadcast %cst_117 : f32 to vector<32x1xf32>
      %288 = arith.addf %286, %287 : vector<32x1xf32>
      %289 = math.rsqrt %288 : vector<32x1xf32>
      %290 = vector.broadcast %289 : vector<32x1xf32> to vector<32x128xf32>
      %291 = arith.mulf %281, %290 : vector<32x128xf32>
      %292 = vector.broadcast %274 : vector<1x128xf32> to vector<32x128xf32>
      %293 = arith.mulf %291, %292 : vector<32x128xf32>
      %294 = vector.broadcast %275 : vector<1x128xf32> to vector<32x128xf32>
      %295 = arith.addf %293, %294 : vector<32x128xf32>
      %296 = vector.shape_cast %295 : vector<32x128xf32> to vector<2x16x128xf32>
      %c0_118 = arith.constant 0 : index
      %c0_119 = arith.constant 0 : index
      %c0_120 = arith.constant 0 : index
      %297 = vector.load %arg24[%c0_118, %c0_119, %c0_120] : memref<2x16x128xf32, #tpu.memory_space<vmem>>, vector<2x16x128xf32>
      tpu.vector_store %arg24[%c0_118, %c0_119, %c0_120], %296 {strides = array<i32>} : memref<2x16x128xf32, #tpu.memory_space<vmem>>, vector<2x16x128xf32>,
    } else {
    }
    return
  }
  func.func @transform_0(%arg0: i32, %arg1: i32) -> (i32, i32, i32) {
    %c0_i32 = arith.constant 0 : i32
    %c0_i32_0 = arith.constant 0 : i32
    %c0_i32_1 = arith.constant 0 : i32
    return %arg0, %c0_i32, %c0_i32_0 : i32, i32, i32
  }
  func.func @transform_1(%arg0: i32, %arg1: i32) -> (i32, i32) {
    %c0_i32 = arith.constant 0 : i32
    %c0_i32_0 = arith.constant 0 : i32
    %c0_i32_1 = arith.constant 0 : i32
    return %c0_i32, %c0_i32_0 : i32, i32
  }
  func.func @transform_2(%arg0: i32, %arg1: i32) -> (i32, i32) {
    %c0_i32 = arith.constant 0 : i32
    %c0_i32_0 = arith.constant 0 : i32
    %c0_i32_1 = arith.constant 0 : i32
    return %c0_i32, %c0_i32_0 : i32, i32
  }
  func.func @transform_3(%arg0: i32, %arg1: i32) -> (i32, i32) {
    %c0_i32 = arith.constant 0 : i32
    %c0_i32_0 = arith.constant 0 : i32
    %c0_i32_1 = arith.constant 0 : i32
    return %c0_i32, %c0_i32_0 : i32, i32
  }
  func.func @transform_4(%arg0: i32, %arg1: i32) -> (i32, i32, i32) {
    %c0_i32 = arith.constant 0 : i32
    %c0_i32_0 = arith.constant 0 : i32
    %c0_i32_1 = arith.constant 0 : i32
    return %arg1, %c0_i32, %c0_i32_0 : i32, i32, i32
  }
  func.func @transform_5(%arg0: i32, %arg1: i32) -> (i32, i32, i32) {
    %c0_i32 = arith.constant 0 : i32
    %c0_i32_0 = arith.constant 0 : i32
    %c0_i32_1 = arith.constant 0 : i32
    return %arg1, %c0_i32, %c0_i32_0 : i32, i32, i32
  }
  func.func @transform_6(%arg0: i32, %arg1: i32) -> (i32, i32, i32) {
    %c0_i32 = arith.constant 0 : i32
    %c0_i32_0 = arith.constant 0 : i32
    %c0_i32_1 = arith.constant 0 : i32
    return %arg1, %c0_i32, %c0_i32_0 : i32, i32, i32
  }
  func.func @transform_7(%arg0: i32, %arg1: i32) -> (i32, i32, i32) {
    %c0_i32 = arith.constant 0 : i32
    %c0_i32_0 = arith.constant 0 : i32
    %c0_i32_1 = arith.constant 0 : i32
    return %arg1, %c0_i32, %c0_i32_0 : i32, i32, i32
  }
  func.func @transform_8(%arg0: i32, %arg1: i32) -> (i32, i32, i32) {
    %c0_i32 = arith.constant 0 : i32
    %c0_i32_0 = arith.constant 0 : i32
    %c0_i32_1 = arith.constant 0 : i32
    return %arg1, %c0_i32, %c0_i32_0 : i32, i32, i32
  }
  func.func @transform_9(%arg0: i32, %arg1: i32) -> (i32, i32, i32) {
    %c0_i32 = arith.constant 0 : i32
    %c0_i32_0 = arith.constant 0 : i32
    %c0_i32_1 = arith.constant 0 : i32
    return %arg1, %c0_i32, %c0_i32_0 : i32, i32, i32
  }
  func.func @transform_10(%arg0: i32, %arg1: i32) -> (i32, i32, i32) {
    %c0_i32 = arith.constant 0 : i32
    %c0_i32_0 = arith.constant 0 : i32
    %c0_i32_1 = arith.constant 0 : i32
    return %arg1, %c0_i32, %c0_i32_0 : i32, i32, i32
  }
  func.func @transform_11(%arg0: i32, %arg1: i32) -> (i32, i32, i32) {
    %c0_i32 = arith.constant 0 : i32
    %c0_i32_0 = arith.constant 0 : i32
    %c0_i32_1 = arith.constant 0 : i32
    return %arg1, %c0_i32, %c0_i32_0 : i32, i32, i32
  }
  func.func @transform_12(%arg0: i32, %arg1: i32) -> (i32, i32, i32) {
    %c0_i32 = arith.constant 0 : i32
    %c0_i32_0 = arith.constant 0 : i32
    %c0_i32_1 = arith.constant 0 : i32
    return %arg1, %c0_i32, %c0_i32_0 : i32, i32, i32
  }
  func.func @transform_13(%arg0: i32, %arg1: i32) -> (i32, i32, i32) {
    %c0_i32 = arith.constant 0 : i32
    %c0_i32_0 = arith.constant 0 : i32
    %c0_i32_1 = arith.constant 0 : i32
    return %arg1, %c0_i32, %c0_i32_0 : i32, i32, i32
  }
  func.func @transform_14(%arg0: i32, %arg1: i32) -> (i32, i32, i32) {
    %c0_i32 = arith.constant 0 : i32
    %c0_i32_0 = arith.constant 0 : i32
    %c0_i32_1 = arith.constant 0 : i32
    return %arg1, %c0_i32, %c0_i32_0 : i32, i32, i32
  }
  func.func @transform_15(%arg0: i32, %arg1: i32) -> (i32, i32, i32) {
    %c0_i32 = arith.constant 0 : i32
    %c0_i32_0 = arith.constant 0 : i32
    %c0_i32_1 = arith.constant 0 : i32
    return %arg1, %c0_i32, %c0_i32_0 : i32, i32, i32
  }
  func.func @transform_16(%arg0: i32, %arg1: i32) -> (i32, i32, i32) {
    %c0_i32 = arith.constant 0 : i32
    %c0_i32_0 = arith.constant 0 : i32
    %c0_i32_1 = arith.constant 0 : i32
    return %arg1, %c0_i32, %c0_i32_0 : i32, i32, i32
  }
  func.func @transform_17(%arg0: i32, %arg1: i32) -> (i32, i32, i32) {
    %c0_i32 = arith.constant 0 : i32
    %c0_i32_0 = arith.constant 0 : i32
    %c0_i32_1 = arith.constant 0 : i32
    return %arg1, %c0_i32, %c0_i32_0 : i32, i32, i32
  }
  func.func @transform_18(%arg0: i32, %arg1: i32) -> (i32, i32, i32) {
    %c0_i32 = arith.constant 0 : i32
    %c0_i32_0 = arith.constant 0 : i32
    %c0_i32_1 = arith.constant 0 : i32
    return %arg1, %c0_i32, %c0_i32_0 : i32, i32, i32
  }
  func.func @transform_19(%arg0: i32, %arg1: i32) -> (i32, i32, i32) {
    %c0_i32 = arith.constant 0 : i32
    %c0_i32_0 = arith.constant 0 : i32
    %c0_i32_1 = arith.constant 0 : i32
    return %arg1, %c0_i32, %c0_i32_0 : i32, i32, i32
  }
  func.func @transform_20(%arg0: i32, %arg1: i32) -> (i32, i32) {
    %c0_i32 = arith.constant 0 : i32
    %c0_i32_0 = arith.constant 0 : i32
    %c0_i32_1 = arith.constant 0 : i32
    return %c0_i32, %c0_i32_0 : i32, i32
  }
  func.func @transform_21(%arg0: i32, %arg1: i32) -> (i32, i32) {
    %c0_i32 = arith.constant 0 : i32
    %c0_i32_0 = arith.constant 0 : i32
    %c0_i32_1 = arith.constant 0 : i32
    return %c0_i32, %c0_i32_0 : i32, i32
  }
  func.func @transform_22(%arg0: i32, %arg1: i32) -> (i32, i32, i32) {
    %c0_i32 = arith.constant 0 : i32
    %c0_i32_0 = arith.constant 0 : i32
    %c0_i32_1 = arith.constant 0 : i32
    return %arg0, %c0_i32, %c0_i32_0 : i32, i32, i32
  }
}

</mosaic_0001>

<bundles_post_ra>
// kernel: tpu_custom_call.1
= control target key start
LH: loop header
LB: loop body
LE: loop exit
PB: predicated region body
PF: predicated region fallthrough
CT: control target
= control target key end

     0   :  { %s5901_s0 = inlined_call_operand.hbm [shape: bf16[2,16,192], index: 0, kind: input, shape index: {}]   ;;  %s5902_s1 = inlined_call_operand.hbm [shape: f32[32,128], index: 1, kind: input, shape index: {}]   ;;  %s5903_s2 = inlined_call_operand.hbm [shape: bf16[192,128], index: 2, kind: input, shape index: {}]   ;;  %s5904_s3 = inlined_call_operand.hbm [shape: f32[1,128], index: 3, kind: input, shape index: {}]   ;;  %s5905_s4 = inlined_call_operand.vmem [shape: f32[2,1,128], index: 4, kind: input, shape index: {}]   ;;  %s5906_s5 = inlined_call_operand.vmem [shape: f32[2,1,128], index: 5, kind: input, shape index: {}]   ;;  %s5907_s6 = inlined_call_operand.hbm [shape: bf16[2,128,128], index: 6, kind: input, shape index: {}]   ;;  %s5908_s7 = inlined_call_operand.vmem [shape: f32[2,1,128], index: 7, kind: input, shape index: {}]   ;;  %s5909_s8 = inlined_call_operand.hbm [shape: bf16[2,128,128], index: 8, kind: input, shape index: {}]   ;;  %s5910_s9 = inlined_call_operand.vmem [shape: f32[2,1,128], index: 9, kind: input, shape index: {}]   ;;  %s5911_s10 = inlined_call_operand.hbm [shape: bf16[2,128,128], index: 10, kind: input, shape index: {}]   ;;  %s5912_s11 = inlined_call_operand.vmem [shape: f32[2,1,128], index: 11, kind: input, shape index: {}]   ;;  %s5913_s12 = inlined_call_operand.hbm [shape: bf16[2,128,128], index: 12, kind: input, shape index: {}]   ;;  %s5914_s13 = inlined_call_operand.vmem [shape: f32[2,1,128], index: 13, kind: input, shape index: {}]   ;;  %s5915_s14 = inlined_call_operand.vmem [shape: f32[2,1,128], index: 14, kind: input, shape index: {}]   ;;  %s5916_s15 = inlined_call_operand.vmem [shape: f32[2,1,128], index: 15, kind: input, shape index: {}]   ;;  %s5917_s16 = inlined_call_operand.hbm [shape: bf16[2,128,256], index: 16, kind: input, shape index: {}]   ;;  %s5918_s17 = inlined_call_operand.vmem [shape: f32[2,1,256], index: 17, kind: input, shape index: {}]   ;;  %s5919_s18 = inlined_call_operand.hbm [shape: bf16[2,256,128], index: 18, kind: input, shape index: {}]   ;;  %s5920_s19 = inlined_call_operand.vmem [shape: f32[2,1,128], index: 19, kind: input, shape index: {}]   ;;  %s5921_s20 = inlined_call_operand.vmem [shape: f32[1,128], index: 20, kind: input, shape index: {}]   ;;  %s5922_s21 = inlined_call_operand.vmem [shape: f32[1,128], index: 21, kind: input, shape index: {}]   ;;  %s5923_s22 = inlined_call_operand.hbm [shape: f32[2,16,128], index: 22, kind: output, shape index: {}]  }
   0x1   :  { %5936 = sst [smem:[#allocation27_spill]] %s5901_s0 }
   0x2   :  { %5937 = sst [smem:[#allocation28_spill]] %s5902_s1 }
   0x3   :  { %5938 = sst [smem:[#allocation29_spill]] %s5903_s2 }
   0x4   :  { %5939 = sst [smem:[#allocation30_spill]] %s5904_s3 }
   0x5   :  { %5940 = sst [smem:[#allocation31_spill]] %s5905_s4 }
   0x6   :  { %5941 = sst [smem:[#allocation32_spill]] %s5906_s5 }
   0x7   :  { %5942 = sst [smem:[#allocation33_spill]] %s5907_s6 }
   0x8   :  { %5943 = sst [smem:[#allocation34_spill]] %s5908_s7 }
   0x9   :  { %5944 = sst [smem:[#allocation35_spill]] %s5909_s8 }
   0xa   :  { %5945 = sst [smem:[#allocation36_spill]] %s5910_s9 }
   0xb   :  { %5946 = sst [smem:[#allocation37_spill]] %s5911_s10 }
   0xc   :  { %5947 = sst [smem:[#allocation38_spill]] %s5912_s11 }
   0xd   :  { %5948 = sst [smem:[#allocation39_spill]] %s5913_s12 }
   0xe   :  { %5949 = sst [smem:[#allocation40_spill]] %s5914_s13 }
   0xf   :  { %5950 = sst [smem:[#allocation41_spill]] %s5915_s14 }
  0x10   :  { %5951 = sst [smem:[#allocation42_spill]] %s5916_s15 }
  0x11   :  { %5952 = sst [smem:[#allocation43_spill]] %s5917_s16 }
  0x12   :  { %5953 = sst [smem:[#allocation44_spill]] %s5918_s17 }
  0x13   :  { %5954 = sst [smem:[#allocation45_spill]] %s5919_s18 }
  0x14   :  { %5955 = sst [smem:[#allocation46_spill]] %s5920_s19 }
  0x15   :  { %5956 = sst [smem:[#allocation47_spill]] %s5921_s20 }
  0x16   :  { %5957 = sst [smem:[#allocation48_spill]] %s5922_s21 }
  0x17   :  { %5958 = sst [smem:[#allocation49_spill]] %s5923_s22 }
  0x18   :  { %27 = vsyncpa [#allocation5], 0 }
  0x19   :  { %28 = vsyncpa [#allocation8], 0 }
  0x1a   :  { %29 = vsyncpa [#allocation11], 0 }
  0x1b   :  { %30 = vsyncpa [#allocation6], 0  ;;  %s5108_s3 = smov 0   ;;  %s5110_s28 = smov 0  }
  0x1c   :  { %s5112_s29 = smov 0   ;;  %s5114_s30 = smov 0  }
  0x1d   :  { %s5116_s4 = smov 0   ;;  %s5118_s0 = smov 0  }
  0x1e LB: > { %5959 = sst [smem:[#allocation24_spill]] %s4967_s0  ;;  %s5137_s23 = sadd.s32 4294967295, %s4967_s0   ;;  %s4967_s0 = sphi %s5118_s0, %s36_s0   ;;  %s4963_s4 = sphi %s5116_s4, %s6024_s4   ;;  %s4959_s30 = sphi %s5114_s30, %s6023_s30   ;;  %s4955_s29 = sphi %s5112_s29, %s6022_s29   ;;  %s4951_s28 = sphi %s5110_s28, %s6021_s28   ;;  %s4947_s3 = sphi %s5108_s3, %s6020_s3  }
  0x1f   : > { %p203_p0 = scmp.ne.s32.totalorder %s4955_s29, %s4951_s28  ;;  %p204_p1 = scmp.eq.s32.totalorder %s4967_s0, 0 }
  0x20   : > { %p209_p2 = scmp.ne.s32.totalorder %s4951_s28, %s4947_s3  ;;  %p5935_p3 = scmp.eq.s32.totalorder %s5137_s23, 0 }
  0x21   : > { %p5145_p4 = por %p204_p1, %p203_p0  ;;  %p3778_p5 = scmp.ge.s32.totalorder %s4967_s0, 1 }
  0x22   : > { %p5152_p6 = por %p5935_p3, %p209_p2  ;;  %p626_p7 = scmp.lt.s32.totalorder %s4967_s0, 3 }
  0x23   : > { %s4969_s25 = smov [#allocation4]   ;;  %s45_s27 = sadd.s32 1, %s4963_s4 }
  0x24   : > { %p5157_p8 = pnand %p3778_p5, %p626_p7  ;;  %s642_s26 = sshll.u32 %s4969_s25, 4  ;;  %s643_s26 = int_to_ptr.vmem [resolvable:$true] %s642_s26 }
  0x25   : > { %p5170_p11 = scmp.ge.s32.totalorder %s45_s27, 2  ;;  %s4616_s1 = scalar_lea.vmem %s643_s26, 512 }
  0x26   : > { %p4268_p9 = pneg %p5157_p8  ;;  %p4617_p13 = scmp.ne.s32.totalorder %s643_s26, %s4616_s1 }
  0x27   : > { %p4624_p2 = scmp.lt.s32.totalorder %s643_s26, %s643_s26  ;;  %p4625_p5 = scmp.lt.s32.totalorder %s4616_s1, %s4616_s1 }
  0x28   : > { %p5165_p10 = pnand %p4268_p9, %p5935_p3 }
  0x29   : > { %p4626_p7 = por %p4625_p5, %p4624_p2 }
  0x2a   : > { %p4607_p12 = pneg %p5165_p10 }
  0x2c   : > { %p4619_p0 = pnand %p4617_p13, %p4607_p12 }
  0x2e   : > { %p4620_p1 = pneg %p4619_p0 }
  0x30   : > { %p4627_p9 = pnand %p4626_p7, %p4620_p1 }
  0x32   : > { %4630 = shalt.err (!%p4627_p9)
}
  0x33   : > { %s5924_s25 = smov 128   ;;  %s5926_s22 = smov 8  }
  0x34   : > { %s5965_s20 = sld [smem:[#allocation27_spill]]  ;;  %s6026_s27 = smov (%p5170_p11, %s45_s27), 0 }
  0x35   : > { %5966 = sst [smem:[#allocation25_spill]] %s6026_s27  ;;  %p4304_p13 = scmp.lt.s32.totalorder %s4967_s0, 2 }
  0x36   : > { %s193_s17 = ssub.s32 %s4963_s4, %s6026_s27  ;;  %s711_s19 = sand.u32 1, %s4967_s0  }
  0x37   : > { %p194_p0 = scmp.eq.s32.totalorder %s193_s17, 0  ;;  %s5928_s15 = sand.u32 1, %s4955_s29  }
  0x38   : > { %s5197_s14 = sshll.u32 %s4963_s4, 10  ;;  %s5967_s13 = sadd.s32 1, %s4955_s29 }
  0x39   : > { %s5202_s11 = scalar_select %p194_p0, %s4955_s29, %s5967_s13  }
  0x3a   : > { %4271 = dma.hbm_to_vmem [thread:$0]  (!%p5165_p10), %s5965_s20, 512, %s643_s26, [#allocation5], %s5924_s25, %s5924_s25, %s5926_s22  }
  0x3b   : > { %5968 = sst [smem:[#allocation26_spill]] %s5202_s11  ;;  %s5206_s9 = sshll.u32 %s5928_s15, 6 }
  0x3c   : > { %s5969_s26 = sld [smem:[#allocation33_spill]]  ;;  %p5214_p11 = pnand %p4304_p13, %p5145_p4 }
  0x3d   : > { %s715_s17 = scalar_lea.vmem [#allocation12], %s5206_s9  ;;  %s5219_s22 = scalar_lea.sflag [#allocation5], %s711_s19 }
  0x3e   : > { %s722_s25 = sshll.u32 %s715_s17, 4  ;;  %p5223_p1 = pneg %p5214_p11  ;;  %s723_s25 = int_to_ptr.vmem [resolvable:$true] %s722_s25 }
  0x3f   : > { %s4644_s21 = scalar_lea.vmem %s723_s25, 1024  ;;  %s4972_s5 = smov [#allocation12]  }
  0x40   : > { %p4645_p2 = scmp.ne.s32.totalorder %s723_s25, %s4644_s21  ;;  %s4649_s20 = sshll.u32 %s4972_s5, 4  ;;  %s4650_s20 = int_to_ptr.vmem [resolvable:$false] %s4649_s20 }
  0x41   : > { %p4652_p7 = scmp.lt.s32.totalorder %s723_s25, %s4650_s20 }
  0x42   : > { %s721_s3 = scalar_lea.hbm %s5969_s26, %s5197_s14  ;;  %p4647_p5 = pnand %p4645_p2, %p5223_p1 }
  0x43   : > { %s4651_s26 = scalar_lea.vmem %s4650_s20, 2048 }
  0x44   : > { %p4648_p4 = pneg %p4647_p5  ;;  %p4653_p9 = scmp.lt.s32.totalorder %s4651_s26, %s4644_s21 }
  0x46   : > { %p4654_p13 = por %p4653_p9, %p4652_p7 }
  0x48   : > { %p4655_p0 = pnand %p4654_p13, %p4648_p4 }
  0x4a   : > { %4658 = shalt.err (!%p4655_p0)
}
  0x4b   : > { %s5931_s19 = smov 64   ;;  %s5933_s17 = smov 4  }
  0x4c   : > { %4284 = dma.hbm_to_vmem [thread:$0]  (!%p5214_p11), %s721_s3, 1024, %s723_s25, %s5219_s22, %s5931_s19, %s5931_s19, %s5933_s17  }
  0x4d   : > { %s5972_s8 = sld [smem:[#allocation35_spill]]  ;;  %s742_s21 = scalar_lea.vmem [#allocation13], %s5206_s9 }
  0x4e   : > { %s749_s26 = sshll.u32 %s742_s21, 4  ;;  %s4975_s11 = smov [#allocation13]   ;;  %s750_s26 = int_to_ptr.vmem [resolvable:$true] %s749_s26 }
  0x4f   : > { %s4672_s27 = scalar_lea.vmem %s750_s26, 1024  ;;  %s4677_s0 = sshll.u32 %s4975_s11, 4  ;;  %s4678_s0 = int_to_ptr.vmem [resolvable:$false] %s4677_s0 }
  0x50   : > { %p4673_p2 = scmp.ne.s32.totalorder %s750_s26, %s4672_s27  ;;  %s4679_s7 = scalar_lea.vmem %s4678_s0, 2048 }
  0x51   : > { %p4680_p7 = scmp.lt.s32.totalorder %s750_s26, %s4678_s0  ;;  %p4681_p9 = scmp.lt.s32.totalorder %s4679_s7, %s4672_s27 }
  0x52   : > { %p4675_p5 = pnand %p4673_p2, %p5223_p1 }
  0x53   : > { %s748_s20 = scalar_lea.hbm %s5972_s8, %s5197_s14  ;;  %p4682_p13 = por %p4681_p9, %p4680_p7 }
  0x54   : > { %p4676_p4 = pneg %p4675_p5 }
  0x56   : > { %p4683_p0 = pnand %p4682_p13, %p4676_p4 }
  0x58   : > { %4686 = shalt.err (!%p4683_p0)
}
  0x59   : > { %4287 = dma.hbm_to_vmem [thread:$0]  (!%p5214_p11), %s748_s20, 1024, %s750_s26, %s5219_s22, %s5931_s19, %s5931_s19, %s5933_s17  }
  0x5a   : > { %s5973_s10 = sld [smem:[#allocation37_spill]]  ;;  %s769_s3 = scalar_lea.vmem [#allocation14], %s5206_s9 }
  0x5b   : > { %s776_s0 = sshll.u32 %s769_s3, 4  ;;  %s4976_s27 = smov [#allocation14]   ;;  %s777_s0 = int_to_ptr.vmem [resolvable:$true] %s776_s0 }
  0x5c   : > { %s4700_s7 = scalar_lea.vmem %s777_s0, 1024  ;;  %s4705_s5 = sshll.u32 %s4976_s27, 4  ;;  %s4706_s5 = int_to_ptr.vmem [resolvable:$false] %s4705_s5 }
  0x5d   : > { %p4701_p2 = scmp.ne.s32.totalorder %s777_s0, %s4700_s7  ;;  %s4707_s21 = scalar_lea.vmem %s4706_s5, 2048 }
  0x5e   : > { %p4708_p7 = scmp.lt.s32.totalorder %s777_s0, %s4706_s5  ;;  %p4709_p9 = scmp.lt.s32.totalorder %s4707_s21, %s4700_s7 }
  0x5f   : > { %p4703_p5 = pnand %p4701_p2, %p5223_p1 }
  0x60   : > { %s775_s11 = scalar_lea.hbm %s5973_s10, %s5197_s14  ;;  %p4710_p13 = por %p4709_p9, %p4708_p7 }
  0x61   : > { %p4704_p4 = pneg %p4703_p5 }
  0x63   : > { %p4711_p0 = pnand %p4710_p13, %p4704_p4 }
  0x65   : > { %4714 = shalt.err (!%p4711_p0)
}
  0x66   : > { %4290 = dma.hbm_to_vmem [thread:$0]  (!%p5214_p11), %s775_s11, 1024, %s777_s0, %s5219_s22, %s5931_s19, %s5931_s19, %s5933_s17  }
  0x67   : > { %s5974_s12 = sld [smem:[#allocation39_spill]]  ;;  %s796_s25 = scalar_lea.vmem [#allocation15], %s5206_s9 }
  0x68   : > { %s803_s3 = sshll.u32 %s796_s25, 4  ;;  %s4977_s27 = smov [#allocation15]   ;;  %s804_s3 = int_to_ptr.vmem [resolvable:$true] %s803_s3 }
  0x69   : > { %s4728_s7 = scalar_lea.vmem %s804_s3, 1024  ;;  %s4733_s5 = sshll.u32 %s4977_s27, 4  ;;  %s4734_s5 = int_to_ptr.vmem [resolvable:$false] %s4733_s5 }
  0x6a   : > { %p4729_p2 = scmp.ne.s32.totalorder %s804_s3, %s4728_s7  ;;  %s4735_s21 = scalar_lea.vmem %s4734_s5, 2048 }
  0x6b   : > { %p4736_p7 = scmp.lt.s32.totalorder %s804_s3, %s4734_s5  ;;  %p4737_p9 = scmp.lt.s32.totalorder %s4735_s21, %s4728_s7 }
  0x6c   : > { %p4731_p5 = pnand %p4729_p2, %p5223_p1 }
  0x6d   : > { %s802_s15 = scalar_lea.hbm %s5974_s12, %s5197_s14  ;;  %p4738_p13 = por %p4737_p9, %p4736_p7 }
  0x6e   : > { %p4732_p4 = pneg %p4731_p5 }
  0x70   : > { %p4739_p0 = pnand %p4738_p13, %p4732_p4 }
  0x72   : > { %4742 = shalt.err (!%p4739_p0)
}
  0x73   : > { %4293 = dma.hbm_to_vmem [thread:$0]  (!%p5214_p11), %s802_s15, 1024, %s804_s3, %s5219_s22, %s5931_s19, %s5931_s19, %s5933_s17  }
  0x74   : > { %s4978_s9 = smov [#allocation7]   ;;  %s5975_s11 = sand.u32 1, %s4955_s29  }
  0x75   : > { %s655_s14 = sshll.u32 %s4978_s9, 4  ;;  %s5276_s0 = sshll.u32 %s5975_s11, 7  ;;  %s656_s14 = int_to_ptr.vmem [resolvable:$true] %s655_s14 }
  0x76   : > { %s4754_s20 = scalar_lea.vmem %s656_s14, 512  ;;  %p4762_p7 = scmp.lt.s32.totalorder %s656_s14, %s656_s14 }
  0x77   : > { %p4755_p2 = scmp.ne.s32.totalorder %s656_s14, %s4754_s20  ;;  %p4763_p9 = scmp.lt.s32.totalorder %s4754_s20, %s4754_s20 }
  0x79   : > { %p4757_p5 = pnand %p4755_p2, %p4607_p12  ;;  %p4764_p13 = por %p4763_p9, %p4762_p7 }
  0x7b   : > { %p4758_p4 = pneg %p4757_p5 }
  0x7d   : > { %p4765_p0 = pnand %p4764_p13, %p4758_p4 }
  0x7f   : > { %4768 = shalt.err (!%p4765_p0)
}
  0x80   : > { %s5976_s26 = smov 8   ;;  %s5977_s15 = smov 128  }
  0x81   : > { %s5978_s7 = sld [smem:[#allocation28_spill]]  ;;  %s3934_s27 = sshll.u32 %s4963_s4, 11 }
  0x82   : > { %s835_s5 = scalar_lea.vmem [#allocation16], %s5276_s0  ;;  %s5979_s16 = sld [smem:[#allocation43_spill]] }
  0x83   : > { %s842_s21 = sshll.u32 %s835_s5, 4  ;;  %s4979_s25 = smov [#allocation16]   ;;  %s843_s21 = int_to_ptr.vmem [resolvable:$true] %s842_s21 }
  0x84   : > { %s4782_s19 = scalar_lea.vmem %s843_s21, 2048  ;;  %s4787_s3 = sshll.u32 %s4979_s25, 4  ;;  %s4788_s3 = int_to_ptr.vmem [resolvable:$false] %s4787_s3 }
  0x85   : > { %p4783_p2 = scmp.ne.s32.totalorder %s843_s21, %s4782_s19  ;;  %s4789_s17 = scalar_lea.vmem %s4788_s3, 4096 }
  0x86   : > { %p4790_p7 = scmp.lt.s32.totalorder %s843_s21, %s4788_s3  ;;  %p4791_p9 = scmp.lt.s32.totalorder %s4789_s17, %s4782_s19 }
  0x87   : > { %4274 = dma.hbm_to_vmem [thread:$0]  (!%p5165_p10), %s5978_s7, 512, %s656_s14, [#allocation8], %s5977_s15, %s5977_s15, %s5976_s26  }
  0x88   : > { %s841_s20 = scalar_lea.hbm %s5979_s16, %s3934_s27  ;;  %p4785_p5 = pnand %p4783_p2, %p5223_p1 }
  0x89   : > { %p4792_p13 = por %p4791_p9, %p4790_p7 }
  0x8a   : > { %p4786_p4 = pneg %p4785_p5 }
  0x8c   : > { %p4793_p0 = pnand %p4792_p13, %p4786_p4 }
  0x8e   : > { %4796 = shalt.err (!%p4793_p0)
}
  0x8f   : > { %4296 = dma.hbm_to_vmem [thread:$0]  (!%p5214_p11), %s841_s20, 2048, %s843_s21, %s5219_s22, %s5977_s15, %s5977_s15, %s5976_s26  }
  0x90   : > { %s4980_s14 = smov [#allocation9]   ;;  %s4981_s5 = smov [#allocation10]  }
  0x91   : > { %s668_s7 = sshll.u32 %s4980_s14, 4  ;;  %s682_s9 = sshll.u32 %s4981_s5, 4  ;;  %s669_s7 = int_to_ptr.vmem [resolvable:$true] %s668_s7  ;;  %s683_s9 = int_to_ptr.vmem [resolvable:$true] %s682_s9 }
  0x92   : > { %s4808_s11 = scalar_lea.vmem %s669_s7, 1536  ;;  %p4816_p7 = scmp.lt.s32.totalorder %s669_s7, %s669_s7 }
  0x93   : > { %p4809_p2 = scmp.ne.s32.totalorder %s669_s7, %s4808_s11  ;;  %p4817_p9 = scmp.lt.s32.totalorder %s4808_s11, %s4808_s11 }
  0x95   : > { %p4811_p5 = pnand %p4809_p2, %p4607_p12  ;;  %p4818_p13 = por %p4817_p9, %p4816_p7 }
  0x97   : > { %p4812_p4 = pneg %p4811_p5 }
  0x99   : > { %p4819_p0 = pnand %p4818_p13, %p4812_p4 }
  0x9b   : > { %4822 = shalt.err (!%p4819_p0)
}
  0x9c   : > { %s5980_s19 = smov 4   ;;  %s5981_s17 = smov 64  }
  0x9d   : > { %s5982_s21 = sld [smem:[#allocation29_spill]]  ;;  %s4834_s20 = scalar_lea.vmem %s683_s9, 16 }
  0x9e   : > { %p4835_p3 = scmp.ne.s32.totalorder %s683_s9, %s4834_s20  ;;  %s4841_s25 = scalar_lea.vmem %s683_s9, 32 }
  0x9f   : > { %p4842_p7 = scmp.lt.s32.totalorder %s683_s9, %s683_s9  ;;  %p4843_p4 = scmp.lt.s32.totalorder %s4841_s25, %s4834_s20 }
  0xa0   : > { %p4837_p2 = pnand %p4835_p3, %p4607_p12 }
  0xa1   : > { %p4844_p9 = por %p4843_p4, %p4842_p7 }
  0xa2   : > { %p4838_p5 = pneg %p4837_p2 }
  0xa3   : > { %4277 = dma.hbm_to_vmem [thread:$0]  (!%p5165_p10), %s5982_s21, 1536, %s669_s7, [#allocation8], %s5981_s17, %s5981_s17, %s5980_s19  }
  0xa4   : > { %p4845_p13 = pnand %p4844_p9, %p4838_p5 }
  0xa6   : > { %4848 = shalt.err (!%p4845_p13)
}
  0xa7   : > { %s5983_s5 = sld [smem:[#allocation30_spill]]  ;;  %s863_s15 = scalar_lea.vmem [#allocation17], %s5276_s0 }
  0xa8   : > { %s5984_s18 = sld [smem:[#allocation45_spill]]  ;;  %s870_s21 = sshll.u32 %s863_s15, 4  ;;  %s871_s21 = int_to_ptr.vmem [resolvable:$true] %s870_s21 }
  0xa9   : > { %s4862_s20 = scalar_lea.vmem %s871_s21, 2048  ;;  %s4982_s2 = smov [#allocation17]  }
  0xaa   : > { %p4863_p3 = scmp.ne.s32.totalorder %s871_s21, %s4862_s20  ;;  %s4867_s25 = sshll.u32 %s4982_s2, 4  ;;  %s4868_s25 = int_to_ptr.vmem [resolvable:$false] %s4867_s25 }
  0xab   : > { %s4869_s3 = scalar_lea.vmem %s4868_s25, 4096  ;;  %p4870_p2 = scmp.lt.s32.totalorder %s871_s21, %s4868_s25 }
  0xac   : > { %p4865_p12 = pnand %p4863_p3, %p5223_p1  ;;  %p4871_p5 = scmp.lt.s32.totalorder %s4869_s3, %s4862_s20 }
  0xad   : > { %4280 = dma.hbm_to_vmem [thread:$0]  (!%p5165_p10), %s5983_s5, 16, %s683_s9, [#allocation11]  }
  0xae   : > { %s869_s26 = scalar_lea.hbm %s5984_s18, %s3934_s27  ;;  %p4866_p0 = pneg %p4865_p12 }
  0xaf   : > { %p4872_p10 = por %p4871_p5, %p4870_p2 }
  0xb1   : > { %p4873_p7 = pnand %p4872_p10, %p4866_p0 }
  0xb3   : > { %4876 = shalt.err (!%p4873_p7)
}
  0xb4   : > { %4299 = dma.hbm_to_vmem [thread:$0]  (!%p5214_p11), %s869_s26, 2048, %s871_s21, %s5219_s22, %s5981_s17, %s5981_s17, %s5980_s19  }
  0xb5   : > { %888 = sbr.rel (%p5157_p8) target bundleno = 4721 (0x1271), region = 108  ;;  %p5985_p1 = scmp.eq.s32.totalorder (!%p5157_p8), %s5137_s23, 0 }
  0xba   : > { %4926 = dma.done.wait (%p5985_p1), [#allocation5], 512   ;;  %p5986_p4 = pmov %p5985_p1 }
  0xbb   : > { %p5987_p9 = pmov %p5985_p1 }
  0xbc   : > { %4928 = vsyncadd (%p5986_p4), [#allocation5], 4294966784 }
  0xbd   : > { %4930 = dma.done.wait (%p5987_p9), [#allocation8], 2048   ;;  %p5988_p13 = pmov %p5985_p1 }
  0xbe   : > { %p5989_p3 = pmov %p5985_p1 }
  0xbf   : > { %4932 = vsyncadd (%p5988_p13), [#allocation8], 4294965248 }
  0xc0   : > { %4934 = dma.done.wait (%p5989_p3), [#allocation11], 16   ;;  %p5990_p11 = pmov %p5985_p1 }
  0xc1   : > { %s906_s22 = sand.u32 1, %s5137_s23   ;;  %s908_s6 = sand.u32 1, %s4951_s28  }
  0xc2   : > { %4936 = vsyncadd (%p5990_p11), [#allocation11], 4294967280  ;;  %s3807_s1 = sshll.u32 %s908_s6, 6  ;;  %s907_s13 = scalar_lea.sflag [#allocation5], %s906_s22 }
  0xc3   : > { %s5353_s0 = scalar_lea.vmem [#allocation12], %s3807_s1 }
  0xc4   : > { %4938 = dma.done.wait (%p5152_p6), %s907_s13, 8192  }
  0xc5   : > { %4940 = vsyncadd (%p5152_p6), %s907_s13, 4294959104  ;;  %s3811_s27 = sshll.u32 %s908_s6, 7  ;;  %p1068_p8 = scmp.lt.s32.totalorder %s4959_s30, 1 }
  0xc6   : > { %s5995_s17 = sld [smem:[#allocation38_spill]]  ;;  %s5405_s10 = scalar_lea.vmem [#allocation13], %s3807_s1 }
  0xc7   : > { %s5361_s9 = scalar_select %p1068_p8, %s4959_s30, 1 }
  0xc8   : > { %s5996_s16 = sld [smem:[#allocation40_spill]]  ;;  %s5407_s12 = scalar_lea.vmem [#allocation14], %s3807_s1 }
  0xc9   : > { %s5997_s5 = sld [smem:[#allocation41_spill]]  ;;  %s3813_s20 = sshll.u32 %s5361_s9, 1 }
  0xca   : > { %s5998_s15 = sld [smem:[#allocation42_spill]]  ;;  %s5411_s18 = scalar_lea.vmem [#allocation16], %s3811_s27 }
  0xcb   : > { %s5999_s3 = sld [smem:[#allocation46_spill]]  ;;  %s5413_s24 = scalar_lea.vmem [#allocation17], %s3811_s27 }
  0xcc   : > { %s1082_s8 = scalar_lea.vmem %s5995_s17, %s5361_s9  ;;  %s6000_s19 = sld [smem:[#allocation44_spill]] }
  0xcd   : > { %p3814_p6 = scmp.ne.s32.totalorder %s4959_s30, 0 }
  0xce   : > { %s1085_s14 = scalar_lea.vmem %s5996_s16, %s5361_s9  ;;  %s5409_s16 = scalar_lea.vmem [#allocation15], %s3807_s1 }
  0xcf   : > { %s1088_s7 = scalar_lea.vmem %s5997_s5, %s5361_s9  ;;  %1104 = sbr.rel (%p3814_p6) target bundleno = 463 (0x1cf), region = 152 }
  0xd0   : > { %s1091_s21 = scalar_lea.vmem %s5998_s15, %s5361_s9 }
  0xd1   : > { %s1098_s22 = scalar_lea.vmem %s5999_s3, %s5361_s9 }
  0xd2   : > { %s5403_s17 = scalar_lea.vmem %s6000_s19, %s3813_s20 }
  0xd4   : > { %v4377_v0 = vld [vmem:[#allocation9 + $0x38] sm:$0xff]   ;;  %v4983_v1 = vmov 0   ;;  %v4378_v2 = vld [vmem:[#allocation9 + $0x30] sm:$0xff]   ;;  %v4379_v3 = vld [vmem:[#allocation9 + $0x28] sm:$0xff]   ;;  %vm1230_vm0 = vcmask 523264  }
  0xd5   : > { %1237 = vmatprep.subr.bf16.mxu0 %v4983_v1  ;;  %4212 = vmatprep.subr.bf16.mxu1 %v4983_v1  ;;  %v4380_v4 = vld [vmem:[#allocation9 + $0x20] sm:$0xff]   ;;  %v4381_v6 = vld [vmem:[#allocation9 + $0x18] sm:$0xff]   ;;  %v4382_v8 = vld [vmem:[#allocation9 + $0x10] sm:$0xff]  }
  0xd6   : > { %1238 = vmatpush1.bf16.msra.mxu0 %v4377_v0  ;;  %4224 = vmatpush1.bf16.msra.mxu1 %v4377_v0  ;;  %v4391_v5 = vld [vmem:[#allocation4 + $0x4] ss:$8 sps:$4 sm:$0xff]   ;;  %v4394_v7 = vld [vmem:[#allocation4 + $0x14] ss:$8 sps:$4 sm:$0xff]   ;;  %v4389_v15 = vld [vmem:[#allocation4] ss:$8 sps:$4 sm:$0xff]  }
  0xd7   : > { %1239 = vmatprep.subr.bf16.mxu0 %v4983_v1  ;;  %4213 = vmatprep.subr.bf16.mxu1 %v4983_v1  ;;  %v4383_v9 = vld [vmem:[#allocation9 + $0x8] sm:$0xff]   ;;  %v4384_v10 = vld [vmem:[#allocation9] sm:$0xff]   ;;  %v4385_v11 = vld [vmem:[#allocation9 + $0x58] sm:$0xff]  }
  0xd8   : > { %3832 = vmatprep.mubr.msk.bf16.mxu0 %vm1230_vm0, %v4391_v5  ;;  %3833 = vmatprep.mubr.msk.bf16.mxu1 %vm1230_vm0, %v4394_v7  ;;  %v4386_v12 = vld [vmem:[#allocation9 + $0x50] sm:$0xff]   ;;  %v4387_v13 = vld [vmem:[#allocation9 + $0x48] sm:$0xff]   ;;  %v4388_v14 = vld [vmem:[#allocation9 + $0x40] sm:$0xff]  }
  0xd9   : > { %v4392_v16 = vld [vmem:[#allocation4 + $0x10] ss:$8 sps:$4 sm:$0xff]   ;;  %v3815_v17 = vld [vmem:[#allocation10] ss:$0 sm:$0xff]  ;;  %v1287_v29 = vld [vmem:[#allocation7 + $0x8] sm:$0xff] }
  0xda   : > { %1240 = vmatpush1.bf16.msra.mxu0 %v4378_v2  ;;  %4225 = vmatpush1.bf16.msra.mxu1 %v4378_v2  ;;  %v1286_v19 = vld [vmem:[#allocation7] sm:$0xff]  ;;  %v1288_v21 = vld [vmem:[#allocation7 + $0x10] sm:$0xff]  ;;  %v1289_v31 = vld [vmem:[#allocation7 + $0x18] sm:$0xff] }
  0xdb   : > { %1241 = vmatprep.subr.bf16.mxu0 %v4983_v1  ;;  %4214 = vmatprep.subr.bf16.mxu1 %v4983_v1 }
  0xde   : > { %1242 = vmatpush1.bf16.msra.mxu0 %v4379_v3  ;;  %4226 = vmatpush1.bf16.msra.mxu1 %v4379_v3 }
  0xdf   : > { %1243 = vmatprep.subr.bf16.mxu0 %v4983_v1  ;;  %4215 = vmatprep.subr.bf16.mxu1 %v4983_v1 }
  0xe2   : > { %1244 = vmatpush1.bf16.msra.mxu0 %v4380_v4  ;;  %4227 = vmatpush1.bf16.msra.mxu1 %v4380_v4 }
  0xe3   : > { %1245 = vmatprep.subr.bf16.mxu0 %v4983_v1  ;;  %4216 = vmatprep.subr.bf16.mxu1 %v4983_v1 }
  0xe6   : > { %1246 = vmatpush1.bf16.msra.mxu0 %v4381_v6  ;;  %4228 = vmatpush1.bf16.msra.mxu1 %v4381_v6 }
  0xe7   : > { %1247 = vmatprep.subr.bf16.mxu0 %v4983_v1  ;;  %4217 = vmatprep.subr.bf16.mxu1 %v4983_v1 }
  0xea   : > { %1248 = vmatpush1.bf16.msra.mxu0 %v4382_v8  ;;  %4229 = vmatpush1.bf16.msra.mxu1 %v4382_v8 }
  0xeb   : > { %1249 = vmatprep.subr.bf16.mxu0 %v4983_v1  ;;  %4218 = vmatprep.subr.bf16.mxu1 %v4983_v1 }
  0xee   : > { %1250 = vmatpush1.bf16.msra.mxu0 %v4383_v9  ;;  %4230 = vmatpush1.bf16.msra.mxu1 %v4383_v9 }
  0xef   : > { %1251 = vmatprep.subr.bf16.mxu0 %v4983_v1  ;;  %4219 = vmatprep.subr.bf16.mxu1 %v4983_v1 }
  0xf2   : > { %1252 = vmatpush1.bf16.msra.mxu0 %v4384_v10  ;;  %4231 = vmatpush1.bf16.msra.mxu1 %v4384_v10 }
  0xf3   : > { %1261 = vmatprep.subr.bf16.mxu0 %v4983_v1  ;;  %4220 = vmatprep.subr.bf16.mxu1 %v4983_v1 }
  0xf6   : > { %1262 = vmatpush2.bf16.msra.mxu0 %v4385_v11  ;;  %4232 = vmatpush2.bf16.msra.mxu1 %v4385_v11 }
  0xf7   : > { %1263 = vmatprep.subr.bf16.mxu0 %v4983_v1  ;;  %4221 = vmatprep.subr.bf16.mxu1 %v4983_v1 }
  0xfa   : > { %1264 = vmatpush2.bf16.msra.mxu0 %v4386_v12  ;;  %4233 = vmatpush2.bf16.msra.mxu1 %v4386_v12 }
  0xfb   : > { %1265 = vmatprep.subr.bf16.mxu0 %v4983_v1  ;;  %4222 = vmatprep.subr.bf16.mxu1 %v4983_v1 }
  0xfe   : > { %1266 = vmatpush2.bf16.msra.mxu0 %v4387_v13  ;;  %4234 = vmatpush2.bf16.msra.mxu1 %v4387_v13 }
  0xff   : > { %1267 = vmatprep.subr.bf16.mxu0 %v4983_v1  ;;  %4223 = vmatprep.subr.bf16.mxu1 %v4983_v1 }
 0x102   : > { %1268 = vmatpush2.bf16.msra.mxu0 %v4388_v14  ;;  %4235 = vmatpush2.bf16.msra.mxu1 %v4388_v14 }
 0x105   : > { %1270 = vmatmul.mubr.bf16.vlgmr.msra.gmra.mxu0 %v4389_v15  ;;  %1278 = vmatmul.mubr.bf16.vlgmr.msra.gmra.mxu1 %v4392_v16 }
 0x1c5   : > { %v1271_v18 = vpop.f32.mrf.mxu0  ;;  %v1279_v20 = vpop.f32.mrf.mxu1 }
 0x1c6   : > { %v1272_v22 = vadd.f32 %v3815_v17, %v1271_v18  ;;  %v1280_v23 = vadd.f32 %v3815_v17, %v1279_v20 }
 0x1c7   : > { %v1273_v24 = vpop.f32.mrf.mxu0  ;;  %v1281_v25 = vpop.f32.mrf.mxu1 }
 0x1c8   : > { %v1290_v26 = vadd.f32 %v1286_v19, %v1272_v22  ;;  %v1292_v27 = vadd.f32 %v1288_v21, %v1280_v23 }
 0x1c9   : > { %v1274_v28 = vpop.f32.mrf.mxu0  ;;  %v1282_v30 = vpop.f32.mrf.mxu1 }
 0x1ca   : > { %1294 = vst [vmem:[#allocation2 + $0x10] sm:$0xff] %v1290_v26  ;;  %1296 = vst [vmem:[#allocation2 + $0x18] sm:$0xff] %v1292_v27  ;;  %v1275_v32 = vadd.f32 %v3815_v17, %v1274_v28  ;;  %v1283_v33 = vadd.f32 %v3815_v17, %v1282_v30 }
 0x1cb   : > { %v1276_v34 = vpop.f32.mrf.mxu0  ;;  %v1284_v35 = vpop.f32.mrf.mxu1 }
 0x1cc   : > { %v1291_v36 = vadd.f32 %v1287_v29, %v1275_v32  ;;  %v1293_v37 = vadd.f32 %v1289_v31, %v1283_v33 }
 0x1ce   : > { %1295 = vst [vmem:[#allocation2] sm:$0xff] %v1291_v36  ;;  %1297 = vst [vmem:[#allocation2 + $0x8] sm:$0xff] %v1293_v37 }
 0x1cf PF: > { %v4425_v58 = vld [vmem:[%s5353_s0 + $0x38] sm:$0xff]   ;;  %v4427_v60 = vld [vmem:[%s5353_s0 + $0x30] sm:$0xff]   ;;  %v4429_v62 = vld [vmem:[%s5353_s0 + $0x28] sm:$0xff]   ;;  %s6001_s27 = sld [smem:[#allocation31_spill]]  ;;  %vm4985_vm1 = vmmov 0   ;;  %vm1734_vm2 = vcmask 261120  }
 0x1d0   : > { %v4426_v59 = vld [vmem:[%s5405_s10 + $0x38] sm:$0xff]   ;;  %4036 = vmatprep.subr.bf16.mxu0 %v4425_v58  ;;  %v4428_v61 = vld [vmem:[%s5405_s10 + $0x30] sm:$0xff]   ;;  %v4430_v63 = vld [vmem:[%s5405_s10 + $0x28] sm:$0xff]   ;;  %s6003_s5 = sld [smem:[#allocation32_spill]]  ;;  %vm1782_vm3 = vcmask 130048   ;;  %s4988_s2 = smov 32  }
 0x1d1   : > { %v1298_v38 = vld [vmem:[#allocation2 + $0x10] sm:$0xff]  ;;  %v1300_v39 = vld [vmem:[#allocation2 + $0x18] sm:$0xff]  ;;  %4037 = vmatpush3.bf16.msra.mxu0 %v4425_v58  ;;  %4056 = vmatprep.subr.bf16.mxu1 %v4426_v59  ;;  %v4431_v0 = vld [vmem:[%s5353_s0 + $0x20] sm:$0xff]   ;;  %s6005_s25 = sld [smem:[#allocation36_spill]]  ;;  %vm2242_vm4 = vcmask 523264   ;;  %vm2245_vm5 = vcmask 785408  }
 0x1d2   : > { %1304 = vadd.xlane.f32.xlu0 %v1298_v38  ;;  %1308 = vadd.xlane.f32.xlu1 %v1300_v39  ;;  %v4432_v1 = vld [vmem:[%s5405_s10 + $0x20] sm:$0xff]   ;;  %v4433_v2 = vld [vmem:[%s5353_s0 + $0x18] sm:$0xff]   ;;  %v4435_v4 = vld [vmem:[%s5353_s0 + $0x10] sm:$0xff]   ;;  %p3923_p12 = scmp.ne.s32.totalorder %s4959_s30, 1 }
 0x1d3   : > { %4057 = vmatpush3.bf16.msra.mxu1 %v4426_v59  ;;  %4038 = vmatprep.subr.bf16.mxu0 %v4427_v60  ;;  %v4434_v3 = vld [vmem:[%s5405_s10 + $0x18] sm:$0xff]   ;;  %v4436_v5 = vld [vmem:[%s5405_s10 + $0x10] sm:$0xff]   ;;  %v4437_v6 = vld [vmem:[%s5353_s0 + $0x8] sm:$0xff]   ;;  %s6015_s13 = sld [smem:[#allocation48_spill]] (!%p3923_p12) }
 0x1d4   : > { %4058 = vmatprep.subr.bf16.mxu1 %v4428_v61  ;;  %v4438_v7 = vld [vmem:[%s5405_s10 + $0x8] sm:$0xff]   ;;  %v4439_v8 = vld [vmem:[%s5353_s0] sm:$0xff]   ;;  %v4441_v10 = vld [vmem:[%s5407_s12 + $0x38] sm:$0xff]  }
 0x1d5   : > { %v1299_v40 = vld [vmem:[#allocation2] sm:$0xff]  ;;  %v1301_v41 = vld [vmem:[#allocation2 + $0x8] sm:$0xff]  ;;  %4039 = vmatpush3.bf16.msra.mxu0 %v4427_v60  ;;  %s6002_s26 = scalar_lea.vmem %s6001_s27, %s5361_s9 }
 0x1d6   : > { %1306 = vadd.xlane.f32.xlu0 %v1299_v40  ;;  %1310 = vadd.xlane.f32.xlu1 %v1301_v41  ;;  %v4440_v9 = vld [vmem:[%s5405_s10] sm:$0xff]   ;;  %v3834_v25 = vld [vmem:[%s6002_s26] ss:$0 sm:$0xff]  ;;  %s6004_s11 = scalar_lea.vmem %s6003_s5, %s5361_s9  ;;  %s6007_s10 = sld [smem:[#allocation34_spill]] }
 0x1d7   : > { %4059 = vmatpush3.bf16.msra.mxu1 %v4428_v61  ;;  %4040 = vmatprep.subr.bf16.mxu0 %v4429_v62  ;;  %v3835_v30 = vld [vmem:[%s6004_s11] ss:$0 sm:$0xff]  ;;  %s6006_s3 = scalar_lea.vmem %s6005_s25, %s5361_s9  ;;  %s4987_s26 = smov 64  }
 0x1d8   : > { %4060 = vmatprep.subr.bf16.mxu1 %v4430_v63 }
 0x1d9   : > { %4041 = vmatpush3.bf16.msra.mxu0 %v4429_v62 }
 0x1da   : > { %4042 = vmatprep.subr.bf16.mxu0 %v4431_v0 }
 0x1db   : > { %4061 = vmatpush3.bf16.msra.mxu1 %v4430_v63 }
 0x1dc   : > { %4062 = vmatprep.subr.bf16.mxu1 %v4432_v1 }
 0x1dd   : > { %4043 = vmatpush3.bf16.msra.mxu0 %v4431_v0 }
 0x1de   : > { %4044 = vmatprep.subr.bf16.mxu0 %v4433_v2 }
 0x1df   : > { %4063 = vmatpush3.bf16.msra.mxu1 %v4432_v1 }
 0x1e0   : > { %4064 = vmatprep.subr.bf16.mxu1 %v4434_v3 }
 0x1e1   : > { %4045 = vmatpush3.bf16.msra.mxu0 %v4433_v2 }
 0x1e2   : > { %4046 = vmatprep.subr.bf16.mxu0 %v4435_v4 }
 0x1e3   : > { %4065 = vmatpush3.bf16.msra.mxu1 %v4434_v3 }
 0x1e4   : > { %4066 = vmatprep.subr.bf16.mxu1 %v4436_v5 }
 0x1e5   : > { %4047 = vmatpush3.bf16.msra.mxu0 %v4435_v4 }
 0x1e6   : > { %4048 = vmatprep.subr.bf16.mxu0 %v4437_v6 }
 0x1e7   : > { %4067 = vmatpush3.bf16.msra.mxu1 %v4436_v5 }
 0x1e8   : > { %4068 = vmatprep.subr.bf16.mxu1 %v4438_v7 }
 0x1e9   : > { %4049 = vmatpush3.bf16.msra.mxu0 %v4437_v6 }
 0x1ea   : > { %4050 = vmatprep.subr.bf16.mxu0 %v4439_v8 }
 0x1eb   : > { %4069 = vmatpush3.bf16.msra.mxu1 %v4438_v7 }
 0x1ec   : > { %4070 = vmatprep.subr.bf16.mxu1 %v4440_v9 }
 0x1ed   : > { %4051 = vmatpush3.bf16.msra.mxu0 %v4439_v8 }
 0x1ee   : > { %4076 = vmatprep.subr.bf16.mxu0 %v4441_v10 }
 0x1ef   : > { %4071 = vmatpush3.bf16.msra.mxu1 %v4440_v9 }
 0x25b   : > { %v1305_v42 = vpop.xlane.xlu0 %1304  ;;  %v1309_v43 = vpop.xlane.xlu1 %1308 }
 0x25c   : > { %v1313_v44 = vmul.f32 0.0078125, %v1305_v42  ;;  %v1315_v45 = vmul.f32 0.0078125, %v1309_v43  ;;  %v4442_v43 = vld [vmem:[%s5407_s12 + $0x30] sm:$0xff]  }
 0x25e   : > { %v5416_v46 = vsub.f32 %v1298_v38, %v1313_v44  ;;  %v5418_v47 = vsub.f32 %v1300_v39, %v1315_v45  ;;  %v4443_v44 = vld [vmem:[%s5407_s12 + $0x28] sm:$0xff]   ;;  %v4444_v45 = vld [vmem:[%s5407_s12 + $0x20] sm:$0xff]  }
 0x25f   : > { %v1307_v48 = vpop.xlane.xlu0 %1306  ;;  %v1311_v49 = vpop.xlane.xlu1 %1310 }
 0x260   : > { %v1314_v50 = vmul.f32 0.0078125, %v1307_v48  ;;  %v1321_v51 = vmul.f32 %v5416_v46, %v5416_v46  ;;  %v1316_v52 = vmul.f32 0.0078125, %v1311_v49  ;;  %v1323_v55 = vmul.f32 %v5418_v47, %v5418_v47  ;;  %v4447_v48 = vld [vmem:[%s5407_s12 + $0x8] sm:$0xff]   ;;  %v4448_v49 = vld [vmem:[%s5407_s12] sm:$0xff]  }
 0x262   : > { %v5422_v53 = vsub.f32 %v1299_v40, %v1314_v50  ;;  %1325 = vadd.xlane.f32.xlu0 %v1321_v51  ;;  %v5424_v54 = vsub.f32 %v1301_v41, %v1316_v52  ;;  %v4984_v50 = vmov 0.0  }
 0x263   : > { %4096 = vmatprep.subr.bf16.mxu1 %v4984_v50 }
 0x264   : > { %v1322_v56 = vmul.f32 %v5422_v53, %v5422_v53  ;;  %v1324_v57 = vmul.f32 %v5424_v54, %v5424_v54 }
 0x266   : > { %1329 = vadd.xlane.f32.xlu0 %v1323_v55  ;;  %1327 = vadd.xlane.f32.xlu1 %v1322_v56 }
 0x26a   : > { %1331 = vadd.xlane.f32.xlu1 %v1324_v57 }
 0x2eb   : > { %v1326_v11 = vpop.xlane.xlu0 %1325 }
 0x2ec   : > { %v1333_v12 = vmul.f32 0.0078125, %v1326_v11  ;;  %v3854_v11 = vld [vmem:[%s1082_s8] ss:$0 sm:$0xff]  ;;  %s4986_s8 = smov 96  }
 0x2ee   : > { %v1337_v13 = vadd.f32 1e-06, %v1333_v12 }
 0x2ef   : > { %v1328_v14 = vpop.xlane.xlu1 %1327  ;;  %v1330_v15 = vpop.xlane.xlu0 %1329 }
 0x2f0   : > { %4497 = vrsqrt.f32 %v1337_v13  ;;  %v1334_v16 = vmul.f32 0.0078125, %v1328_v14  ;;  %v1335_v17 = vmul.f32 0.0078125, %v1330_v15 }
 0x2f2   : > { %v1338_v18 = vadd.f32 1e-06, %v1334_v16  ;;  %v1339_v19 = vadd.f32 1e-06, %v1335_v17 }
 0x2f3   : > { %v1332_v20 = vpop.xlane.xlu1 %1331 }
 0x2f4   : > { %4499 = vrsqrt.f32 %v1338_v18  ;;  %v1336_v21 = vmul.f32 0.0078125, %v1332_v20 }
 0x2f5   : > { %4501 = vrsqrt.f32 %v1339_v19 }
 0x2f6   : > { %v1340_v22 = vadd.f32 1e-06, %v1336_v21 }
 0x2f8   : > { %4503 = vrsqrt.f32 %v1340_v22 }
 0x2fd   : > { %v4498_v23 = vpop.eup %4497 }
 0x2fe   : > { %v1345_v24 = vmul.f32 %v4498_v23, %v5416_v46  ;;  %v4445_v46 = vld [vmem:[%s5407_s12 + $0x18] sm:$0xff]  }
 0x300   : > { %v1355_v29 = vmul.f32 %v3834_v25, %v1345_v24 }
 0x301   : > { %v4500_v26 = vpop.eup %4499 }
 0x302   : > { %v4502_v27 = vpop.eup %4501  ;;  %v1346_v28 = vmul.f32 %v4500_v26, %v5422_v53  ;;  %v1365_v34 = vadd.f32 %v3835_v30, %v1355_v29  ;;  %v3845_v53 = vld [vmem:[%s6006_s3] ss:$0 sm:$0xff] }
 0x303   : > { %v1347_v31 = vmul.f32 %v4502_v27, %v5418_v47  ;;  %v4446_v47 = vld [vmem:[%s5407_s12 + $0x10] sm:$0xff]   ;;  %s6008_s12 = scalar_lea.vmem %s6007_s10, %s5361_s9 }
 0x304   : > { %v1356_v32 = vmul.f32 %v3834_v25, %v1346_v28  ;;  %v3836_v2 = vld [vmem:[%s6008_s12] ss:$0 sm:$0xff] }
 0x305   : > { %v4504_v33 = vpop.eup %4503  ;;  %v1357_v37 = vmul.f32 %v3834_v25, %v1347_v31 }
 0x306   : > { %v1366_v35 = vadd.f32 %v3835_v30, %v1356_v32  ;;  %v1348_v36 = vmul.f32 %v4504_v33, %v5424_v54 }
 0x307   : > { %v1367_v40 = vadd.f32 %v3835_v30, %v1357_v37 }
 0x308   : > { %v1369_v38 = vpack.c.bf16 %v1366_v35, %v1365_v34  ;;  %v1358_v39 = vmul.f32 %v3834_v25, %v1348_v36 }
 0x30a   : > { %4052 = vmatprep.mubr.bf16.mxu0 %v1369_v38  ;;  %4072 = vmatprep.mubr.bf16.mxu1 %v1369_v38  ;;  %v1368_v41 = vadd.f32 %v3835_v30, %v1358_v39 }
 0x30c   : > { %v1370_v42 = vpack.c.bf16 %v1368_v41, %v1367_v40 }
 0x30e   : > { %4053 = vmatmul.mubr.bf16.vlgmr.msra.gmra.mxu0 %v1370_v42  ;;  %4073 = vmatmul.mubr.bf16.vlgmr.msra.gmra.mxu1 %v1370_v42 }
 0x30f   : > { %4077 = vmatpush3.bf16.msra.mxu0 %v4441_v10  ;;  %4092 = vmatprep.mubr.bf16.mxu0 %v1369_v38 }
 0x310   : > { %4078 = vmatprep.subr.bf16.mxu0 %v4442_v43  ;;  %4098 = vmatprep.mubr.msk.bf16.mxu1 %vm4985_vm1, %v4984_v50 }
 0x313   : > { %4079 = vmatpush3.bf16.msra.mxu0 %v4442_v43 }
 0x314   : > { %4080 = vmatprep.subr.bf16.mxu0 %v4443_v44 }
 0x317   : > { %4081 = vmatpush3.bf16.msra.mxu0 %v4443_v44 }
 0x318   : > { %4082 = vmatprep.subr.bf16.mxu0 %v4444_v45 }
 0x31b   : > { %4083 = vmatpush3.bf16.msra.mxu0 %v4444_v45 }
 0x31c   : > { %4084 = vmatprep.subr.bf16.mxu0 %v4445_v46 }
 0x31f   : > { %4085 = vmatpush3.bf16.msra.mxu0 %v4445_v46 }
 0x320   : > { %4086 = vmatprep.subr.bf16.mxu0 %v4446_v47 }
 0x323   : > { %4087 = vmatpush3.bf16.msra.mxu0 %v4446_v47 }
 0x324   : > { %4088 = vmatprep.subr.bf16.mxu0 %v4447_v48 }
 0x327   : > { %4089 = vmatpush3.bf16.msra.mxu0 %v4447_v48 }
 0x328   : > { %4090 = vmatprep.subr.bf16.mxu0 %v4448_v49 }
 0x32b   : > { %4091 = vmatpush3.bf16.msra.mxu0 %v4448_v49 }
 0x32c   : > { %4144 = vmatprep.subr.bf16.mxu0 %v4984_v50 }
 0x32e   : > { %4093 = vmatmul.mubr.bf16.vlgmr.msra.gmra.mxu0 %v1370_v42 }
 0x32f   : > { %4146 = vmatprep.mubr.msk.bf16.mxu0 %vm4985_vm1, %v4984_v50 }
 0x3ce   : > { %v4054_v51 = vpop.f32.mrf.mxu0  ;;  %v4074_v52 = vpop.f32.mrf.mxu1 }
 0x3cf   : > { %v1605_v57 = vadd.f32 %v4074_v52, %v3845_v53  ;;  %v1485_v6 = vadd.f32 %v4054_v51, %v3836_v2 }
 0x3d0   : > { %v1476_v54 = vpop.f32.mrf.mxu0  ;;  %v1596_v55 = vpop.f32.mrf.mxu1 }
 0x3d1   : > { %v1597_v61 = vadd.f32 %v3845_v53, %v1596_v55  ;;  %v1477_v8 = vadd.f32 %v3836_v2, %v1476_v54 }
 0x3d2   : > { %v4075_v56 = vpop.f32.mrf.mxu1  ;;  %v4055_v59 = vpop.f32.mrf.mxu0 }
 0x3d3   : > { %v1608_v58 = vadd.f32 %v4075_v56, %v3845_v53  ;;  %v1488_v4 = vadd.f32 %v4055_v59, %v3836_v2 }
 0x3d4   : > { %v1599_v60 = vpop.f32.mrf.mxu1  ;;  %v1479_v3 = vpop.f32.mrf.mxu0 }
 0x3d5   : > { %v5481_v62 = vpack.c.bf16 %v1608_v58, %v1605_v57  ;;  %v1600_v63 = vadd.f32 %v3845_v53, %v1599_v60  ;;  %v1480_v7 = vadd.f32 %v3836_v2, %v1479_v3  ;;  %v5496_v9 = vpack.c.bf16 %v1488_v4, %v1485_v6 }
 0x3d7   : > { %v5483_v0 = vpack.c.bf16 %v1600_v63, %v1597_v61  ;;  %v2257_v1 = vsel %vm1734_vm2, %v5481_v62, 0  ;;  %v5498_v10 = vpack.c.bf16 %v1480_v7, %v1477_v8 }
 0x3d8   : > { %4145 = vmatpush3.bf16.xpose.msra.mxu0 %v2257_v1 }
 0x3d9   : > { %v1739_v5 = vsel %vm1734_vm2, %v5483_v0, 0  ;;  %4156 = vmatprep.subr.bf16.mxu0 %v4984_v50 }
 0x3da   : > { %4097 = vmatpush3.bf16.xpose.msra.mxu1 %v1739_v5 }
 0x3db   : > { %4102 = vmatprep.subr.bf16.mxu1 %v4984_v50 }
 0x3df   : > { %4147 = vmatmul.mubr.msk.bf16.vlgmr.msra.gmra.mxu0 %vm1734_vm2, %v5496_v9 }
 0x3e0   : > { %4158 = vmatprep.mubr.msk.bf16.mxu0 %vm4985_vm1, %v4984_v50 }
 0x3e1   : > { %4099 = vmatmul.mubr.msk.bf16.vlgmr.msra.gmra.mxu1 %vm1734_vm2, %v5498_v10 }
 0x3e2   : > { %4104 = vmatprep.mubr.msk.bf16.mxu1 %vm4985_vm1, %v4984_v50 }
 0x3ee   : > { %v4094_v12 = vpop.f32.mrf.mxu0 }
 0x3ef   : > { %v1725_v13 = vadd.f32 %v4094_v12, %v3854_v11 }
 0x3f0   : > { %v1716_v14 = vpop.f32.mrf.mxu0 }
 0x3f1   : > { %v1717_v18 = vadd.f32 %v3854_v11, %v1716_v14 }
 0x3f2   : > { %v4095_v15 = vpop.f32.mrf.mxu0 }
 0x3f3   : > { %v1728_v16 = vadd.f32 %v4095_v15, %v3854_v11 }
 0x3f4   : > { %v1719_v17 = vpop.f32.mrf.mxu0 }
 0x3f5   : > { %v5513_v19 = vpack.c.bf16 %v1728_v16, %v1725_v13  ;;  %v1720_v20 = vadd.f32 %v3854_v11, %v1719_v17 }
 0x3f7   : > { %v5515_v21 = vpack.c.bf16 %v1720_v20, %v1717_v18 }
 0x3f9   : > { %4103 = vmatpush3.bf16.msra.mxu1 %v5515_v21 }
 0x3fa   : > { %4108 = vmatprep.subr.bf16.mxu1 %v4984_v50 }
 0x49f   : > { %v5519_v22 = vpop.f32.mrf.mxu0 }
 0x4a1   : > { %v1775_v23 = vpop.f32.mrf.mxu1  ;;  %v4148_v24 = vpop.f32.mrf.mxu0 }
 0x4a2   : > { %v1783_v25 = vsel %vm1782_vm3, %v1775_v23, -inf }
 0x4a3   : > { %v5522_v26 = vpop.f32.mrf.mxu0  ;;  %1784 = vmax.xlane.f32.xlu0 %v1783_v25  ;;  %v4100_v27 = vpop.f32.mrf.mxu1 }
 0x4a5   : > { %v1778_v28 = vpop.f32.mrf.mxu1  ;;  %v4149_v29 = vpop.f32.mrf.mxu0 }
 0x4a6   : > { %v1786_v30 = vsel %vm1782_vm3, %v1778_v28, -inf }
 0x4a7   : > { %1787 = vmax.xlane.f32.xlu1 %v1786_v30  ;;  %v4101_v31 = vpop.f32.mrf.mxu1 }
 0x52c   : > { %v1785_v32 = vpop.xlane.xlu0 %1784 }
 0x52d   : > { %v1789_v33 = vsub.f32 %v1775_v23, %v1785_v32 }
 0x52f   : > { %v1791_v34 = vmul.f32 1.442695, %v1789_v33 }
 0x530   : > { %v1788_v35 = vpop.xlane.xlu1 %1787 }
 0x531   : > { %4505 = vpow2.f32 %v1791_v34  ;;  %v1790_v36 = vsub.f32 %v1778_v28, %v1788_v35 }
 0x533   : > { %v1793_v37 = vmul.f32 1.442695, %v1790_v36 }
 0x535   : > { %4507 = vpow2.f32 %v1793_v37 }
 0x53e   : > { %v4506_v38 = vpop.eup %4505 }
 0x53f   : > { %v1795_v39 = vsel %vm1782_vm3, %v4506_v38, 0.0 }
 0x540   : > { %1796 = vadd.xlane.f32.xlu0 %v1795_v39 }
 0x542   : > { %v4508_v40 = vpop.eup %4507 }
 0x543   : > { %v1798_v41 = vsel %vm1782_vm3, %v4508_v40, 0.0 }
 0x544   : > { %1799 = vadd.xlane.f32.xlu1 %v1798_v41 }
 0x555   : > { %1851 = vrot.lane.b32.xlu1 %v5498_v10, %s4986_s8 }
 0x556   : > { %1854 = vrot.lane.b32.xlu0 %v5483_v0, %s4986_s8 }
 0x5c9   : > { %v1797_v42 = vpop.xlane.xlu0 %1796 }
 0x5ca   : > { %4509 = vrcp.f32 %v1797_v42 }
 0x5cd   : > { %v1800_v43 = vpop.xlane.xlu1 %1799  ;;  %v1855_v48 = vpop.permute.xlu0 %1854 }
 0x5ce   : > { %4511 = vrcp.f32 %v1800_v43  ;;  %v1860_v51 = vsel %vm1734_vm2, %v1855_v48, 0 }
 0x5d1   : > { %v1852_v52 = vpop.permute.xlu1 %1851 }
 0x5d7   : > { %v4510_v44 = vpop.eup %4509 }
 0x5d8   : > { %v1803_v46 = vmul.f32 %v4510_v44, %v4506_v38 }
 0x5db   : > { %v4512_v45 = vpop.eup %4511 }
 0x5dc   : > { %v1804_v47 = vmul.f32 %v4512_v45, %v4508_v40 }
 0x5de   : > { %v1805_v49 = vpack.c.bf16 %v1804_v47, %v1803_v46 }
 0x5e0   : > { %4105 = vmatmul.mubr.msk.bf16.vlgmr.msra.gmra.mxu1 %vm1782_vm3, %v1805_v49 }
 0x5e1   : > { %4109 = vmatpush3.bf16.xpose.msra.mxu1 %v1860_v51  ;;  %4110 = vmatprep.mubr.msk.bf16.mxu1 %vm4985_vm1, %v4984_v50 }
 0x5e2   : > { %4114 = vmatprep.subr.bf16.mxu1 %v4984_v50 }
 0x5e8   : > { %4111 = vmatmul.mubr.msk.bf16.vlgmr.msra.gmra.mxu1 %vm1734_vm2, %v1852_v52 }
 0x5e9   : > { %4116 = vmatprep.mubr.msk.bf16.mxu1 %vm4985_vm1, %v4984_v50 }
 0x6a0   : > { %v5539_v53 = vpop.f32.mrf.mxu1 }
 0x6a2   : > { %v4106_v54 = vpop.f32.mrf.mxu1 }
 0x6a4   : > { %v5541_v55 = vpop.f32.mrf.mxu1 }
 0x6a6   : > { %v4107_v56 = vpop.f32.mrf.mxu1 }
 0x6a8   : > { %v1896_v57 = vpop.f32.mrf.mxu1 }
 0x6a9   : > { %v1903_v58 = vsel %vm1782_vm3, %v1896_v57, -inf }
 0x6aa   : > { %1904 = vmax.xlane.f32.xlu1 %v1903_v58  ;;  %v4112_v59 = vpop.f32.mrf.mxu1 }
 0x6ac   : > { %v1899_v60 = vpop.f32.mrf.mxu1 }
 0x6ad   : > { %v1906_v61 = vsel %vm1782_vm3, %v1899_v60, -inf }
 0x6ae   : > { %1907 = vmax.xlane.f32.xlu0 %v1906_v61  ;;  %v4113_v63 = vpop.f32.mrf.mxu1 }
 0x733   : > { %v1905_v1 = vpop.xlane.xlu1 %1904 }
 0x734   : > { %v1909_v2 = vsub.f32 %v1896_v57, %v1905_v1 }
 0x736   : > { %v1911_v3 = vmul.f32 1.442695, %v1909_v2 }
 0x737   : > { %v1908_v4 = vpop.xlane.xlu0 %1907 }
 0x738   : > { %4513 = vpow2.f32 %v1911_v3  ;;  %v1910_v5 = vsub.f32 %v1899_v60, %v1908_v4 }
 0x73a   : > { %v1913_v6 = vmul.f32 1.442695, %v1910_v5 }
 0x73c   : > { %4515 = vpow2.f32 %v1913_v6 }
 0x745   : > { %v4514_v7 = vpop.eup %4513 }
 0x746   : > { %v1915_v8 = vsel %vm1782_vm3, %v4514_v7, 0.0 }
 0x747   : > { %1916 = vadd.xlane.f32.xlu0 %v1915_v8 }
 0x749   : > { %v4516_v11 = vpop.eup %4515 }
 0x74a   : > { %v1918_v12 = vsel %vm1782_vm3, %v4516_v11, 0.0 }
 0x74b   : > { %1919 = vadd.xlane.f32.xlu1 %v1918_v12 }
 0x75c   : > { %1976 = vrot.lane.b32.xlu1 %v5483_v0, %s4987_s26 }
 0x75d   : > { %1927 = vrot.lane.b32.xlu0 %v5515_v21, %s4986_s8 }
 0x760   : > { %1974 = vrot.lane.b32.xlu1 %v5498_v10, %s4987_s26 }
 0x7d0   : > { %v1917_v13 = vpop.xlane.xlu0 %1916 }
 0x7d1   : > { %4517 = vrcp.f32 %v1917_v13 }
 0x7d4   : > { %v1920_v14 = vpop.xlane.xlu1 %1919  ;;  %v1928_v15 = vpop.permute.xlu0 %1927 }
 0x7d5   : > { %4519 = vrcp.f32 %v1920_v14  ;;  %4115 = vmatpush3.bf16.msra.mxu1 %v1928_v15 }
 0x7d6   : > { %4120 = vmatprep.subr.bf16.mxu1 %v4984_v50 }
 0x7d8   : > { %v1977_v23 = vpop.permute.xlu1 %1976 }
 0x7d9   : > { %v1982_v25 = vsel %vm1734_vm2, %v1977_v23, 0 }
 0x7dc   : > { %v1975_v27 = vpop.permute.xlu1 %1974 }
 0x7de   : > { %v4518_v16 = vpop.eup %4517 }
 0x7df   : > { %v1923_v18 = vmul.f32 %v4518_v16, %v4514_v7 }
 0x7e2   : > { %v4520_v17 = vpop.eup %4519 }
 0x7e3   : > { %v1924_v20 = vmul.f32 %v4520_v17, %v4516_v11 }
 0x7e5   : > { %v1925_v24 = vpack.c.bf16 %v1924_v20, %v1923_v18 }
 0x7e7   : > { %4117 = vmatmul.mubr.msk.bf16.vlgmr.msra.gmra.mxu1 %vm1782_vm3, %v1925_v24 }
 0x7e8   : > { %4121 = vmatpush3.bf16.xpose.msra.mxu1 %v1982_v25  ;;  %4122 = vmatprep.mubr.msk.bf16.mxu1 %vm4985_vm1, %v4984_v50 }
 0x7e9   : > { %4126 = vmatprep.subr.bf16.mxu1 %v4984_v50 }
 0x7ef   : > { %4123 = vmatmul.mubr.msk.bf16.vlgmr.msra.gmra.mxu1 %vm1734_vm2, %v1975_v27 }
 0x7f0   : > { %4128 = vmatprep.mubr.msk.bf16.mxu1 %vm4985_vm1, %v4984_v50 }
 0x8a7   : > { %v5562_v28 = vpop.f32.mrf.mxu1 }
 0x8a9   : > { %v4118_v29 = vpop.f32.mrf.mxu1 }
 0x8ab   : > { %v5564_v30 = vpop.f32.mrf.mxu1 }
 0x8ac   : > { %v4395_v31 = vpack.i.bf16 %v5564_v30, %v5562_v28 }
 0x8ad   : > { %v4119_v32 = vpop.f32.mrf.mxu1 }
 0x8af   : > { %v2018_v33 = vpop.f32.mrf.mxu1 }
 0x8b0   : > { %v2025_v34 = vsel %vm1782_vm3, %v2018_v33, -inf }
 0x8b1   : > { %2026 = vmax.xlane.f32.xlu1 %v2025_v34  ;;  %v4124_v35 = vpop.f32.mrf.mxu1 }
 0x8b3   : > { %v2021_v36 = vpop.f32.mrf.mxu1 }
 0x8b4   : > { %v2028_v37 = vsel %vm1782_vm3, %v2021_v36, -inf }
 0x8b5   : > { %2029 = vmax.xlane.f32.xlu0 %v2028_v37  ;;  %v4125_v38 = vpop.f32.mrf.mxu1 }
 0x8c2   : > { %2048 = vrot.lane.b32.xlu1 %v5515_v21, %s4987_s26 }
 0x8c6   : > { %2095 = vrot.lane.b32.xlu1 %v5498_v10, %s4988_s2 }
 0x8ca   : > { %2371 = vrot.lane.b32.xlu1 %v5481_v62, %s4986_s8 }
 0x8ce   : > { %2368 = vrot.lane.b32.xlu1 %v5496_v9, %s4986_s8 }
 0x8d2   : > { %2491 = vrot.lane.b32.xlu1 %v5496_v9, %s4987_s26 }
 0x8d6   : > { %2612 = vrot.lane.b32.xlu1 %v5496_v9, %s4988_s2 }
 0x93a   : > { %v2027_v39 = vpop.xlane.xlu1 %2026 }
 0x93b   : > { %v2031_v40 = vsub.f32 %v2018_v33, %v2027_v39  ;;  %v2303_v39 = vsel %vm1782_vm3, %v5522_v26, -inf }
 0x93d   : > { %v2033_v41 = vmul.f32 1.442695, %v2031_v40 }
 0x93e   : > { %v2049_v42 = vpop.permute.xlu1 %2048  ;;  %v2030_v43 = vpop.xlane.xlu0 %2029 }
 0x93f   : > { %4521 = vpow2.f32 %v2033_v41  ;;  %v2032_v44 = vsub.f32 %v2021_v36, %v2030_v43  ;;  %4127 = vmatpush3.bf16.msra.mxu1 %v2049_v42  ;;  %v2300_v36 = vsel %vm1782_vm3, %v5519_v22, -inf }
 0x940   : > { %4132 = vmatprep.subr.bf16.mxu1 %v4984_v50 }
 0x941   : > { %v2035_v10 = vmul.f32 1.442695, %v2032_v44 }
 0x942   : > { %v2096_v45 = vpop.permute.xlu1 %2095 }
 0x943   : > { %4523 = vpow2.f32 %v2035_v10 }
 0x946   : > { %v2372_v46 = vpop.permute.xlu1 %2371 }
 0x947   : > { %v2377_v47 = vsel %vm1734_vm2, %v2372_v46, 0 }
 0x948   : > { %4157 = vmatpush3.bf16.xpose.msra.mxu0 %v2377_v47 }
 0x949   : > { %4168 = vmatprep.subr.bf16.mxu0 %v4984_v50 }
 0x94a   : > { %v2369_v49 = vpop.permute.xlu1 %2368 }
 0x94c   : > { %v4522_v9 = vpop.eup %4521 }
 0x94d   : > { %v2037_v48 = vsel %vm1782_vm3, %v4522_v9, 0.0 }
 0x94e   : > { %2038 = vadd.xlane.f32.xlu0 %v2037_v48  ;;  %v2492_v2 = vpop.permute.xlu1 %2491 }
 0x94f   : > { %4159 = vmatmul.mubr.msk.bf16.vlgmr.msra.gmra.mxu0 %vm1734_vm2, %v2369_v49 }
 0x950   : > { %v4524_v51 = vpop.eup %4523  ;;  %4170 = vmatprep.mubr.msk.bf16.mxu0 %vm4985_vm1, %v4984_v50 }
 0x951   : > { %v2040_v52 = vsel %vm1782_vm3, %v4524_v51, 0.0 }
 0x952   : > { %2041 = vadd.xlane.f32.xlu0 %v2040_v52  ;;  %v2613_v5 = vpop.permute.xlu1 %2612 }
 0x968   : > { %2097 = vrot.lane.b32.xlu0 %v5483_v0, %s4988_s2 }
 0x96c   : > { %2493 = vrot.lane.b32.xlu0 %v5481_v62, %s4987_s26 }
 0x970   : > { %2614 = vrot.lane.b32.xlu0 %v5481_v62, %s4988_s2 }
 0x9d7   : > { %v2039_v54 = vpop.xlane.xlu0 %2038 }
 0x9d8   : > { %4525 = vrcp.f32 %v2039_v54 }
 0x9db   : > { %v2042_v56 = vpop.xlane.xlu0 %2041 }
 0x9dc   : > { %4527 = vrcp.f32 %v2042_v56 }
 0x9df   : > { %v2098_v57 = vpop.permute.xlu0 %2097 }
 0x9e0   : > { %v2103_v4 = vsel %vm1734_vm2, %v2098_v57, 0 }
 0x9e3   : > { %v2494_v58 = vpop.permute.xlu0 %2493 }
 0x9e4   : > { %v2499_v59 = vsel %vm1734_vm2, %v2494_v58, 0 }
 0x9e5   : > { %4169 = vmatpush3.bf16.xpose.msra.mxu0 %v2499_v59  ;;  %v4526_v60 = vpop.eup %4525 }
 0x9e6   : > { %4180 = vmatprep.subr.bf16.mxu0 %v4984_v50  ;;  %v2045_v63 = vmul.f32 %v4526_v60, %v4522_v9 }
 0x9e7   : > { %v2615_v0 = vpop.permute.xlu0 %2614 }
 0x9e8   : > { %v2620_v3 = vsel %vm1734_vm2, %v2615_v0, 0 }
 0x9e9   : > { %v4528_v61 = vpop.eup %4527 }
 0x9ea   : > { %v2046_v1 = vmul.f32 %v4528_v61, %v4524_v51 }
 0x9ec   : > { %4171 = vmatmul.mubr.msk.bf16.vlgmr.msra.gmra.mxu0 %vm1734_vm2, %v2492_v2  ;;  %v2047_v62 = vpack.c.bf16 %v2046_v1, %v2045_v63 }
 0x9ed   : > { %4181 = vmatpush3.bf16.xpose.msra.mxu0 %v2620_v3  ;;  %4182 = vmatprep.mubr.msk.bf16.mxu0 %vm4985_vm1, %v4984_v50 }
 0x9ee   : > { %4129 = vmatmul.mubr.msk.bf16.vlgmr.msra.gmra.mxu1 %vm1782_vm3, %v2047_v62 }
 0x9ef   : > { %4133 = vmatpush3.bf16.xpose.msra.mxu1 %v2103_v4  ;;  %4134 = vmatprep.mubr.msk.bf16.mxu1 %vm4985_vm1, %v4984_v50 }
 0x9f0   : > { %4138 = vmatprep.subr.bf16.mxu1 %v4984_v50 }
 0x9f4   : > { %4183 = vmatmul.mubr.msk.bf16.vlgmr.msra.gmra.mxu0 %vm1734_vm2, %v2613_v5 }
 0x9f6   : > { %4135 = vmatmul.mubr.msk.bf16.vlgmr.msra.gmra.mxu1 %vm1734_vm2, %v2096_v45 }
 0x9f7   : > { %4140 = vmatprep.mubr.msk.bf16.mxu1 %vm4985_vm1, %v4984_v50 }
 0xa0f   : > { %v2413_v6 = vpop.f32.mrf.mxu0 }
 0xa10   : > { %v2420_v41 = vsel %vm1782_vm3, %v2413_v6, -inf }
 0xa11   : > { %v4160_v7 = vpop.f32.mrf.mxu0 }
 0xa13   : > { %v2416_v8 = vpop.f32.mrf.mxu0 }
 0xa14   : > { %v2423_v40 = vsel %vm1782_vm3, %v2416_v8, -inf }
 0xa15   : > { %v4161_v11 = vpop.f32.mrf.mxu0 }
 0xaac   : > { %v5611_v12 = vpop.f32.mrf.mxu0 }
 0xaad   : > { %v2542_v43 = vsel %vm1782_vm3, %v5611_v12, -inf }
 0xaae   : > { %v5613_v13 = vpop.f32.mrf.mxu1  ;;  %v4172_v14 = vpop.f32.mrf.mxu0 }
 0xab0   : > { %v4130_v15 = vpop.f32.mrf.mxu1  ;;  %v2538_v16 = vpop.f32.mrf.mxu0 }
 0xab1   : > { %v2545_v42 = vsel %vm1782_vm3, %v2538_v16, -inf }
 0xab2   : > { %v5615_v17 = vpop.f32.mrf.mxu1  ;;  %v4173_v18 = vpop.f32.mrf.mxu0 }
 0xab3   : > { %v4400_v20 = vpack.i.bf16 %v5615_v17, %v5613_v13 }
 0xab4   : > { %v4131_v23 = vpop.f32.mrf.mxu1  ;;  %v5619_v24 = vpop.f32.mrf.mxu0 }
 0xab5   : > { %v2663_v10 = vsel %vm1782_vm3, %v5619_v24, -inf }
 0xab6   : > { %v2139_v25 = vpop.f32.mrf.mxu1  ;;  %v4184_v27 = vpop.f32.mrf.mxu0 }
 0xab7   : > { %v2146_v29 = vsel %vm1782_vm3, %v2139_v25, -inf }
 0xab8   : > { %v5622_v32 = vpop.f32.mrf.mxu0  ;;  %2147 = vmax.xlane.f32.xlu0 %v2146_v29  ;;  %v4136_v33 = vpop.f32.mrf.mxu1 }
 0xab9   : > { %v2666_v44 = vsel %vm1782_vm3, %v5622_v32, -inf }
 0xaba   : > { %v2142_v34 = vpop.f32.mrf.mxu1  ;;  %v4185_v35 = vpop.f32.mrf.mxu0 }
 0xabb   : > { %v2149_v37 = vsel %vm1782_vm3, %v2142_v34, -inf }
 0xabc   : > { %2301 = vmax.xlane.f32.xlu0 %v2300_v36  ;;  %2150 = vmax.xlane.f32.xlu1 %v2149_v37  ;;  %v4137_v38 = vpop.f32.mrf.mxu1 }
 0xac0   : > { %2304 = vmax.xlane.f32.xlu0 %v2303_v39  ;;  %2424 = vmax.xlane.f32.xlu1 %v2423_v40 }
 0xac4   : > { %2421 = vmax.xlane.f32.xlu0 %v2420_v41  ;;  %2546 = vmax.xlane.f32.xlu1 %v2545_v42 }
 0xac8   : > { %2543 = vmax.xlane.f32.xlu0 %v2542_v43  ;;  %2667 = vmax.xlane.f32.xlu1 %v2666_v44 }
 0xacc   : > { %2664 = vmax.xlane.f32.xlu0 %v2663_v10 }
 0xb41   : > { %v2148_v45 = vpop.xlane.xlu0 %2147 }
 0xb42   : > { %v2152_v0 = vsub.f32 %v2139_v25, %v2148_v45 }
 0xb44   : > { %v2154_v62 = vmul.f32 1.442695, %v2152_v0 }
 0xb45   : > { %v2302_v46 = vpop.xlane.xlu0 %2301  ;;  %v2151_v47 = vpop.xlane.xlu1 %2150 }
 0xb46   : > { %v2306_v9 = vsub.f32 %v5519_v22, %v2302_v46  ;;  %v2153_v63 = vsub.f32 %v2142_v34, %v2151_v47 }
 0xb48   : > { %v2308_v48 = vmul.f32 1.442695, %v2306_v9  ;;  %v2156_v4 = vmul.f32 1.442695, %v2153_v63 }
 0xb49   : > { %v2305_v49 = vpop.xlane.xlu0 %2304  ;;  %v2425_v51 = vpop.xlane.xlu1 %2424 }
 0xb4a   : > { %4529 = vpow2.f32 %v2308_v48  ;;  %v2307_v52 = vsub.f32 %v5522_v26, %v2305_v49  ;;  %v2427_v54 = vsub.f32 %v2416_v8, %v2425_v51 }
 0xb4c   : > { %v2310_v56 = vmul.f32 1.442695, %v2307_v52  ;;  %v2430_v57 = vmul.f32 1.442695, %v2427_v54 }
 0xb4d   : > { %v2422_v58 = vpop.xlane.xlu0 %2421  ;;  %v2547_v59 = vpop.xlane.xlu1 %2546 }
 0xb4e   : > { %4531 = vpow2.f32 %v2310_v56  ;;  %v2426_v60 = vsub.f32 %v2413_v6, %v2422_v58  ;;  %v2549_v61 = vsub.f32 %v2538_v16, %v2547_v59 }
 0xb4f   : > { %4533 = vpow2.f32 %v2430_v57 }
 0xb50   : > { %v2428_v1 = vmul.f32 1.442695, %v2426_v60  ;;  %v2552_v2 = vmul.f32 1.442695, %v2549_v61 }
 0xb51   : > { %v2544_v22 = vpop.xlane.xlu0 %2543  ;;  %v2668_v5 = vpop.xlane.xlu1 %2667 }
 0xb52   : > { %4535 = vpow2.f32 %v2428_v1  ;;  %v2548_v3 = vsub.f32 %v5611_v12, %v2544_v22  ;;  %v2670_v11 = vsub.f32 %v5622_v32, %v2668_v5 }
 0xb53   : > { %4537 = vpow2.f32 %v2552_v2 }
 0xb54   : > { %v2550_v26 = vmul.f32 1.442695, %v2548_v3  ;;  %v2673_v16 = vmul.f32 1.442695, %v2670_v11  ;;  %v4449_v11 = vld [vmem:[%s5409_s16 + $0x38] sm:$0xff]  }
 0xb55   : > { %v2665_v7 = vpop.xlane.xlu0 %2664  ;;  %4192 = vmatprep.subr.bf16.mxu0 %v4449_v11 }
 0xb56   : > { %4539 = vpow2.f32 %v2550_v26  ;;  %v2669_v8 = vsub.f32 %v5619_v24, %v2665_v7  ;;  %4193 = vmatpush3.bf16.msra.mxu0 %v4449_v11 }
 0xb57   : > { %v5642_v6 = vpop.eup %4529  ;;  %4541 = vpow2.f32 %v2154_v62 }
 0xb58   : > { %4543 = vpow2.f32 %v2156_v4  ;;  %v2671_v14 = vmul.f32 1.442695, %v2669_v8  ;;  %v2312_v15 = vsel %vm1782_vm3, %v5642_v6, 0.0 }
 0xb59   : > { %2313 = vadd.xlane.f32.xlu0 %v2312_v15  ;;  %v4451_v15 = vld [vmem:[%s5409_s16 + $0x28] sm:$0xff]  }
 0xb5a   : > { %4545 = vpow2.f32 %v2671_v14  ;;  %v4450_v14 = vld [vmem:[%s5409_s16 + $0x30] sm:$0xff]  }
 0xb5b   : > { %v5647_v12 = vpop.eup %4531  ;;  %4547 = vpow2.f32 %v2673_v16  ;;  %4194 = vmatprep.subr.bf16.mxu0 %v4450_v14 }
 0xb5c   : > { %v2315_v18 = vsel %vm1782_vm3, %v5647_v12, 0.0  ;;  %v5651_v23 = vpop.eup %4533  ;;  %4195 = vmatpush3.bf16.msra.mxu0 %v4450_v14  ;;  %v3879_v14 = vld [vmem:[%s1085_s14] ss:$0 sm:$0xff] }
 0xb5d   : > { %2316 = vadd.xlane.f32.xlu1 %v2315_v18  ;;  %v2435_v27 = vsel %vm1782_vm3, %v5651_v23, 0.0  ;;  %4196 = vmatprep.subr.bf16.mxu0 %v4451_v15 }
 0xb5f   : > { %v5653_v24 = vpop.eup %4535 }
 0xb60   : > { %v2432_v25 = vsel %vm1782_vm3, %v5653_v24, 0.0  ;;  %v5659_v29 = vpop.eup %4537  ;;  %4197 = vmatpush3.bf16.msra.mxu0 %v4451_v15 }
 0xb61   : > { %2433 = vadd.xlane.f32.xlu0 %v2432_v25  ;;  %2436 = vadd.xlane.f32.xlu1 %v2435_v27  ;;  %v2557_v35 = vsel %vm1782_vm3, %v5659_v29, 0.0  ;;  %v4452_v27 = vld [vmem:[%s5409_s16 + $0x20] sm:$0xff]  }
 0xb62   : > { %4198 = vmatprep.subr.bf16.mxu0 %v4452_v27 }
 0xb63   : > { %v5661_v32 = vpop.eup %4539 }
 0xb64   : > { %v4542_v33 = vpop.eup %4541  ;;  %v2554_v34 = vsel %vm1782_vm3, %v5661_v32, 0.0  ;;  %4199 = vmatpush3.bf16.msra.mxu0 %v4452_v27  ;;  %v4594_v27 = vld [vmem:[#allocation2 + $0x18] sm:$0xff] }
 0xb65   : > { %v4544_v36 = vpop.eup %4543  ;;  %2555 = vadd.xlane.f32.xlu0 %v2554_v34  ;;  %2558 = vadd.xlane.f32.xlu1 %v2557_v35  ;;  %v2158_v37 = vsel %vm1782_vm3, %v4542_v33, 0.0 }
 0xb66   : > { %v2161_v38 = vsel %vm1782_vm3, %v4544_v36, 0.0 }
 0xb67   : > { %v5669_v39 = vpop.eup %4545 }
 0xb68   : > { %v2675_v40 = vsel %vm1782_vm3, %v5669_v39, 0.0  ;;  %v5673_v41 = vpop.eup %4547 }
 0xb69   : > { %2159 = vadd.xlane.f32.xlu0 %v2158_v37  ;;  %2162 = vadd.xlane.f32.xlu1 %v2161_v38  ;;  %v2678_v42 = vsel %vm1782_vm3, %v5673_v41, 0.0  ;;  %v4455_v38 = vld [vmem:[%s5409_s16 + $0x8] sm:$0xff]  }
 0xb6d   : > { %2676 = vadd.xlane.f32.xlu1 %v2675_v40 }
 0xb71   : > { %2679 = vadd.xlane.f32.xlu1 %v2678_v42 }
 0xb7f   : > { %2169 = vrot.lane.b32.xlu0 %v5515_v21, %s4988_s2 }
 0xb82   : > { %2444 = vrot.lane.b32.xlu1 %v5513_v19, %s4986_s8 }
 0xb83   : > { %2565 = vrot.lane.b32.xlu0 %v5513_v19, %s4987_s26 }
 0xb86   : > { %2686 = vrot.lane.b32.xlu1 %v5513_v19, %s4988_s2 }
 0xb87   : > { %4396 = vrot.lane.b32.xlu0 %v4395_v31, %s4988_s2 }
 0xb8a   : > { %4401 = vrot.lane.b32.xlu1 %v4400_v20, %s4987_s26 }
 0xbe2   : > { %v2314_v21 = vpop.xlane.xlu0 %2313 }
 0xbe6   : > { %v2317_v43 = vpop.xlane.xlu1 %2316 }
 0xbea   : > { %v2434_v44 = vpop.xlane.xlu0 %2433  ;;  %v2437_v10 = vpop.xlane.xlu1 %2436 }
 0xbee   : > { %v2556_v45 = vpop.xlane.xlu0 %2555  ;;  %v2559_v46 = vpop.xlane.xlu1 %2558 }
 0xbf2   : > { %v2160_v47 = vpop.xlane.xlu0 %2159  ;;  %v2163_v9 = vpop.xlane.xlu1 %2162 }
 0xbf3   : > { %4549 = vrcp.f32 %v2160_v47 }
 0xbf4   : > { %4551 = vrcp.f32 %v2163_v9 }
 0xbf5   : > { %4553 = vrcp.f32 %v2317_v43 }
 0xbf6   : > { %v2170_v48 = vpop.permute.xlu0 %2169  ;;  %4555 = vrcp.f32 %v2314_v21  ;;  %v2677_v13 = vpop.xlane.xlu1 %2676  ;;  %v4456_v21 = vld [vmem:[%s5409_s16] sm:$0xff]  }
 0xbf7   : > { %4139 = vmatpush3.bf16.msra.mxu1 %v2170_v48  ;;  %4557 = vrcp.f32 %v2434_v44 }
 0xbf8   : > { %4150 = vmatprep.subr.bf16.mxu1 %v4984_v50  ;;  %4559 = vrcp.f32 %v2437_v10 }
 0xbf9   : > { %4561 = vrcp.f32 %v2556_v45 }
 0xbfa   : > { %4563 = vrcp.f32 %v2559_v46  ;;  %v2680_v52 = vpop.xlane.xlu1 %2679  ;;  %v2566_v2 = vpop.permute.xlu0 %2565 }
 0xbfb   : > { %4565 = vrcp.f32 %v2680_v52 }
 0xbfc   : > { %4567 = vrcp.f32 %v2677_v13 }
 0xbfe   : > { %v2445_v60 = vpop.permute.xlu1 %2444 }
 0xc00   : > { %v4550_v28 = vpop.eup %4549 }
 0xc01   : > { %v4552_v30 = vpop.eup %4551  ;;  %v2166_v31 = vmul.f32 %v4550_v28, %v4542_v33  ;;  %v4397_v28 = vpop.permute.xlu0 %4396 }
 0xc02   : > { %v2167_v17 = vmul.f32 %v4552_v30, %v4544_v36  ;;  %v4554_v49 = vpop.eup %4553  ;;  %v2687_v26 = vpop.permute.xlu1 %2686  ;;  %v4454_v36 = vld [vmem:[%s5409_s16 + $0x10] sm:$0xff]   ;;  %v4398_v13 = vunpack.i.l.bf16 %v4397_v28 }
 0xc03   : > { %v4556_v51 = vpop.eup %4555  ;;  %v2321_v54 = vmul.f32 %v4554_v49, %v5647_v12 }
 0xc04   : > { %v2168_v20 = vpack.c.bf16 %v2167_v17, %v2166_v31  ;;  %v2320_v56 = vmul.f32 %v4556_v51, %v5642_v6  ;;  %v4558_v57 = vpop.eup %4557  ;;  %v4399_v31 = vunpack.i.h.bf16 %v4397_v28  ;;  %v2240_v52 = vsel %vm1734_vm2, %v5539_v53, %v4398_v13  ;;  %v4462_v13 = vld [vmem:[%s5411_s18 + $0x64] ss:$8 sps:$4 sm:$0xff]  }
 0xc05   : > { %v4560_v59 = vpop.eup %4559 }
 0xc06   : > { %4141 = vmatmul.mubr.msk.bf16.vlgmr.msra.gmra.mxu1 %vm1782_vm3, %v2168_v20  ;;  %v2322_v58 = vpack.c.bf16 %v2321_v54, %v2320_v56  ;;  %v2441_v61 = vmul.f32 %v4560_v59, %v5651_v23  ;;  %v4562_v0 = vpop.eup %4561  ;;  %v4402_v30 = vpop.permute.xlu1 %4401  ;;  %v2241_v51 = vsel %vm1734_vm2, %v5541_v55, %v4399_v31 }
 0xc07   : > { %4151 = vmatpush3.bf16.msra.mxu1 %v5513_v19  ;;  %4152 = vmatprep.mubr.msk.bf16.mxu1 %vm4985_vm1, %v4984_v50  ;;  %v2440_v19 = vmul.f32 %v4558_v57, %v5653_v24  ;;  %v4564_v1 = vpop.eup %4563  ;;  %v2562_v22 = vmul.f32 %v4562_v0, %v5661_v32  ;;  %v4453_v32 = vld [vmem:[%s5409_s16 + $0x18] sm:$0xff]   ;;  %v4404_v17 = vunpack.i.h.bf16 %v4402_v30  ;;  %v4403_v20 = vunpack.i.l.bf16 %v4402_v30 }
 0xc08   : > { %4162 = vmatprep.subr.bf16.mxu1 %v4984_v50  ;;  %v2563_v3 = vmul.f32 %v4564_v1, %v5659_v29  ;;  %v4566_v4 = vpop.eup %4565  ;;  %4200 = vmatprep.subr.bf16.mxu0 %v4453_v32 }
 0xc09   : > { %v2442_v63 = vpack.c.bf16 %v2441_v61, %v2440_v19  ;;  %v4568_v5 = vpop.eup %4567  ;;  %v2684_v7 = vmul.f32 %v4566_v4, %v5673_v41  ;;  %4201 = vmatpush3.bf16.msra.mxu0 %v4453_v32  ;;  %v2244_v57 = vsel %vm2242_vm4, %v2241_v51, %v4404_v17  ;;  %v4460_v17 = vld [vmem:[%s5411_s18 + $0x60] ss:$8 sps:$4 sm:$0xff]   ;;  %v4468_v51 = vld [vmem:[%s5411_s18 + $0x44] ss:$8 sps:$4 sm:$0xff]  }
 0xc0a   : > { %v2564_v62 = vpack.c.bf16 %v2563_v3, %v2562_v22  ;;  %v2683_v8 = vmul.f32 %v4568_v5, %v5669_v39  ;;  %4202 = vmatprep.subr.bf16.mxu0 %v4454_v36 }
 0xc0c   : > { %v2685_v6 = vpack.c.bf16 %v2684_v7, %v2683_v8 }
 0xc0d   : > { %4203 = vmatpush3.bf16.msra.mxu0 %v4454_v36 }
 0xc0e   : > { %4153 = vmatmul.mubr.msk.bf16.vlgmr.msra.gmra.mxu1 %vm1782_vm3, %v2322_v58  ;;  %4204 = vmatprep.subr.bf16.mxu0 %v4455_v38  ;;  %v2243_v58 = vsel %vm2242_vm4, %v2240_v52, %v4403_v20  ;;  %v4465_v20 = vld [vmem:[%s5411_s18 + $0x54] ss:$8 sps:$4 sm:$0xff]   ;;  %v4466_v52 = vld [vmem:[%s5411_s18 + $0x40] ss:$8 sps:$4 sm:$0xff]  }
 0xc0f   : > { %4163 = vmatpush3.bf16.msra.mxu1 %v2445_v60  ;;  %4164 = vmatprep.mubr.msk.bf16.mxu1 %vm4985_vm1, %v4984_v50 }
 0xc10   : > { %4174 = vmatprep.subr.bf16.mxu1 %v4984_v50 }
 0xc11   : > { %4205 = vmatpush3.bf16.msra.mxu0 %v4455_v38  ;;  %v4459_v38 = vld [vmem:[%s5411_s18 + $0x74] ss:$8 sps:$4 sm:$0xff]  }
 0xc12   : > { %4206 = vmatprep.subr.bf16.mxu0 %v4456_v21 }
 0xc15   : > { %4207 = vmatpush3.bf16.msra.mxu0 %v4456_v21 }
 0xc16   : > { %4165 = vmatmul.mubr.msk.bf16.vlgmr.msra.gmra.mxu1 %vm1782_vm3, %v2442_v63 }
 0xc17   : > { %4175 = vmatpush3.bf16.msra.mxu1 %v2566_v2  ;;  %4176 = vmatprep.mubr.msk.bf16.mxu1 %vm4985_vm1, %v4984_v50 }
 0xc18   : > { %4186 = vmatprep.subr.bf16.mxu1 %v4984_v50 }
 0xc1e   : > { %4177 = vmatmul.mubr.msk.bf16.vlgmr.msra.gmra.mxu1 %vm1782_vm3, %v2564_v62 }
 0xc1f   : > { %4187 = vmatpush3.bf16.msra.mxu1 %v2687_v26  ;;  %4188 = vmatprep.mubr.msk.bf16.mxu1 %vm4985_vm1, %v4984_v50 }
 0xc20   : > { %3082 = vmatprep.subr.bf16.mxu1 %v4459_v38 }
 0xc26   : > { %4189 = vmatmul.mubr.msk.bf16.vlgmr.msra.gmra.mxu1 %vm1782_vm3, %v2685_v6 }
 0xcc6   : > { %v2209_v12 = vpop.f32.mrf.mxu1 }
 0xcc8   : > { %v4142_v16 = vpop.f32.mrf.mxu1 }
 0xcca   : > { %v2212_v50 = vpop.f32.mrf.mxu1 }
 0xccb   : > { %v4405_v18 = vpack.i.bf16 %v2212_v50, %v2209_v12 }
 0xccc   : > { %v4143_v23 = vpop.f32.mrf.mxu1 }
 0xccd   : > { %4406 = vrot.lane.b32.xlu1 %v4405_v18, %s4986_s8  ;;  %v4593_v18 = vld [vmem:[#allocation2 + $0x10] sm:$0xff] }
 0xcce   : > { %v5723_v24 = vpop.f32.mrf.mxu1 }
 0xcd0   : > { %v4154_v25 = vpop.f32.mrf.mxu1 }
 0xcd2   : > { %v2363_v29 = vpop.f32.mrf.mxu1 }
 0xcd4   : > { %v4155_v33 = vpop.f32.mrf.mxu1 }
 0xcd5   : > { %v4595_v33 = vld [vmem:[#allocation2] sm:$0xff] }
 0xcd6   : > { %v2484_v34 = vpop.f32.mrf.mxu1 }
 0xcd8   : > { %v4166_v35 = vpop.f32.mrf.mxu1 }
 0xcd9   : > { %v4596_v35 = vld [vmem:[#allocation2 + $0x8] sm:$0xff] }
 0xcda   : > { %v2487_v37 = vpop.f32.mrf.mxu1 }
 0xcdb   : > { %v4410_v39 = vpack.i.bf16 %v2487_v37, %v2484_v34  ;;  %v4457_v37 = vld [vmem:[%s5411_s18 + $0x70] ss:$8 sps:$4 sm:$0xff]  }
 0xcdc   : > { %v4167_v40 = vpop.f32.mrf.mxu1  ;;  %3083 = vmatpush1.bf16.msra.mxu1 %v4457_v37 }
 0xcdd   : > { %4411 = vrot.lane.b32.xlu0 %v4410_v39, %s4988_s2  ;;  %3084 = vmatprep.subr.bf16.mxu1 %v4462_v13  ;;  %v4494_v13 = vld [vmem:[%s5413_s24 + $0x8] sm:$0xff]  }
 0xcde   : > { %v2605_v41 = vpop.f32.mrf.mxu1 }
 0xce0   : > { %v4178_v42 = vpop.f32.mrf.mxu1  ;;  %3085 = vmatpush1.bf16.msra.mxu1 %v4460_v17  ;;  %v4495_v17 = vld [vmem:[%s5413_s24 + $0x40] sm:$0xff]  }
 0xce1   : > { %3086 = vmatprep.subr.bf16.mxu1 %v4465_v20  ;;  %v4496_v20 = vld [vmem:[%s5413_s24] sm:$0xff]  }
 0xce2   : > { %v2608_v43 = vpop.f32.mrf.mxu1 }
 0xce3   : > { %v4415_v44 = vpack.i.bf16 %v2608_v43, %v2605_v41 }
 0xce4   : > { %v4179_v10 = vpop.f32.mrf.mxu1 }
 0xce5   : > { %4416 = vrot.lane.b32.xlu0 %v4415_v44, %s4987_s26 }
 0xce6   : > { %v2726_v45 = vpop.f32.mrf.mxu1 }
 0xce8   : > { %v4190_v46 = vpop.f32.mrf.mxu1 }
 0xcea   : > { %v2729_v47 = vpop.f32.mrf.mxu1 }
 0xceb   : > { %v4420_v9 = vpack.i.bf16 %v2729_v47, %v2726_v45 }
 0xcec   : > { %v4191_v48 = vpop.f32.mrf.mxu1 }
 0xced   : > { %4421 = vrot.lane.b32.xlu1 %v4420_v9, %s4986_s8 }
 0xd3f   : > { %v4407_v49 = vpop.permute.xlu1 %4406 }
 0xd40   : > { %v4409_v54 = vunpack.i.h.bf16 %v4407_v49  ;;  %v4408_v56 = vunpack.i.l.bf16 %v4407_v49  ;;  %v4463_v49 = vld [vmem:[%s5411_s18 + $0x50] ss:$8 sps:$4 sm:$0xff]  }
 0xd41   : > { %3087 = vmatpush1.bf16.msra.mxu1 %v4463_v49  ;;  %v2992_v49 = vlaneseq }
 0xd42   : > { %v2246_v59 = vsel %vm2245_vm5, %v2243_v58, %v4408_v56  ;;  %v2247_v60 = vsel %vm2245_vm5, %v2244_v57, %v4409_v54  ;;  %3088 = vmatprep.subr.bf16.mxu1 %v4468_v51  ;;  %v4469_v54 = vld [vmem:[%s5411_s18 + $0x30] ss:$8 sps:$4 sm:$0xff]   ;;  %v4471_v56 = vld [vmem:[%s5411_s18 + $0x34] ss:$8 sps:$4 sm:$0xff]   ;;  %v4474_v57 = vld [vmem:[%s5411_s18 + $0x24] ss:$8 sps:$4 sm:$0xff]  }
 0xd43   : > { %v2769_v19 = vpack.c.bf16 %v2247_v60, %v2246_v59  ;;  %v4989_v58 = vmov 0   ;;  %v4472_v59 = vld [vmem:[%s5411_s18 + $0x20] ss:$8 sps:$4 sm:$0xff]   ;;  %v4477_v60 = vld [vmem:[%s5411_s18 + $0x14] ss:$8 sps:$4 sm:$0xff]   ;;  %v2993_v51 = vshrl.u32 %v2992_v49, 7 }
 0xd44   : > { %3114 = vmatprep.mubr.bf16.mxu1 %v4989_v58 }
 0xd45   : > { %4208 = vmatprep.mubr.bf16.mxu0 %v2769_v19  ;;  %3089 = vmatpush1.bf16.msra.mxu1 %v4466_v52  ;;  %v4475_v19 = vld [vmem:[%s5411_s18 + $0x10] ss:$8 sps:$4 sm:$0xff]   ;;  %v2994_v52 = vsub.s32 0, %v2993_v51 }
 0xd46   : > { %3090 = vmatprep.subr.bf16.mxu1 %v4471_v56  ;;  %v2998_v56 = vsub.s32 1, %v2993_v51 }
 0xd49   : > { %3091 = vmatpush1.bf16.msra.mxu1 %v4469_v54  ;;  %v2990_v54 = vld [vmem:[%s5403_s17] sm:$0x3] }
 0xd4a   : > { %3092 = vmatprep.subr.bf16.mxu1 %v4474_v57  ;;  %v2995_v57 = vrot.slane %v2990_v54, %v2994_v52 }
 0xd4d   : > { %3093 = vmatpush1.bf16.msra.mxu1 %v4472_v59 }
 0xd4e   : > { %3094 = vmatprep.subr.bf16.mxu1 %v4477_v60 }
 0xd4f   : > { %v4412_v61 = vpop.permute.xlu0 %4411 }
 0xd50   : > { %v4414_v63 = vunpack.i.h.bf16 %v4412_v61  ;;  %v4413_v55 = vunpack.i.l.bf16 %v4412_v61  ;;  %v4480_v61 = vld [vmem:[%s5411_s18 + $0x4] ss:$8 sps:$4 sm:$0xff]  }
 0xd51   : > { %3095 = vmatpush1.bf16.msra.mxu1 %v4475_v19 }
 0xd52   : > { %v2758_v22 = vsel %vm1734_vm2, %v2363_v29, %v4414_v63  ;;  %v2757_v3 = vsel %vm1734_vm2, %v5723_v24, %v4413_v55  ;;  %3096 = vmatprep.subr.bf16.mxu1 %v4480_v61 }
 0xd57   : > { %v4417_v0 = vpop.permute.xlu0 %4416 }
 0xd58   : > { %v4419_v1 = vunpack.i.h.bf16 %v4417_v0  ;;  %v4418_v2 = vunpack.i.l.bf16 %v4417_v0  ;;  %v4478_v0 = vld [vmem:[%s5411_s18] ss:$8 sps:$4 sm:$0xff]  }
 0xd59   : > { %3097 = vmatpush1.bf16.msra.mxu1 %v4478_v0 }
 0xd5a   : > { %v2760_v26 = vsel %vm2242_vm4, %v2758_v22, %v4419_v1  ;;  %v2759_v5 = vsel %vm2242_vm4, %v2757_v3, %v4418_v2 }
 0xd5f   : > { %v4422_v53 = vpop.permute.xlu1 %4421 }
 0xd60   : > { %v4424_v62 = vunpack.i.h.bf16 %v4422_v53  ;;  %v4423_v4 = vunpack.i.l.bf16 %v4422_v53 }
 0xd62   : > { %v2762_v7 = vsel %vm2245_vm5, %v2760_v26, %v4424_v62  ;;  %v2761_v8 = vsel %vm2245_vm5, %v2759_v5, %v4423_v4 }
 0xd63   : > { %v2770_v6 = vpack.c.bf16 %v2762_v7, %v2761_v8 }
 0xd65   : > { %4209 = vmatmul.mubr.bf16.vlgmr.msra.gmra.mxu0 %v2770_v6 }
 0xe25   : > { %v4210_v11 = vpop.f32.mrf.mxu0 }
 0xe26   : > { %v2885_v50 = vadd.f32 %v4210_v11, %v3879_v14  ;;  %v3888_v11 = vld [vmem:[%s1088_s7] ss:$0 sm:$0xff] }
 0xe27   : > { %v2876_v15 = vpop.f32.mrf.mxu0 }
 0xe28   : > { %v2877_v12 = vadd.f32 %v3879_v14, %v2876_v15  ;;  %v5756_v29 = vadd.f32 %v4594_v27, %v2885_v50  ;;  %v3889_v50 = vld [vmem:[%s1091_s21] ss:$0 sm:$0xff] }
 0xe29   : > { %v4211_v16 = vpop.f32.mrf.mxu0 }
 0xe2a   : > { %v5753_v23 = vadd.f32 %v4593_v18, %v2877_v12  ;;  %v2888_v32 = vadd.f32 %v4211_v16, %v3879_v14 }
 0xe2b   : > { %v2879_v24 = vpop.f32.mrf.mxu0 }
 0xe2c   : > { %v2880_v25 = vadd.f32 %v3879_v14, %v2879_v24  ;;  %2897 = vadd.xlane.f32.xlu0 %v5753_v23  ;;  %v5762_v36 = vadd.f32 %v4596_v35, %v2888_v32 }
 0xe2e   : > { %v5758_v34 = vadd.f32 %v4595_v33, %v2880_v25 }
 0xe30   : > { %2899 = vadd.xlane.f32.xlu1 %v5758_v34  ;;  %2901 = vadd.xlane.f32.xlu0 %v5756_v29 }
 0xe34   : > { %2903 = vadd.xlane.f32.xlu0 %v5762_v36 }
 0xeb5   : > { %v2898_v39 = vpop.xlane.xlu0 %2897 }
 0xeb6   : > { %v2905_v40 = vmul.f32 0.0078125, %v2898_v39 }
 0xeb8   : > { %v5768_v41 = vsub.f32 %v5753_v23, %v2905_v40 }
 0xeb9   : > { %v2900_v42 = vpop.xlane.xlu1 %2899  ;;  %v2902_v21 = vpop.xlane.xlu0 %2901 }
 0xeba   : > { %v2906_v43 = vmul.f32 0.0078125, %v2900_v42  ;;  %v2907_v44 = vmul.f32 0.0078125, %v2902_v21  ;;  %v2913_v10 = vmul.f32 %v5768_v41, %v5768_v41  ;;  %v4481_v42 = vld [vmem:[%s5413_s24 + $0x78] sm:$0xff]  }
 0xebb   : > { %v4482_v21 = vld [vmem:[%s5413_s24 + $0x38] sm:$0xff]   ;;  %4008 = vmatprep.subr.bf16.mxu0 %v4481_v42 }
 0xebc   : > { %v2910_v45 = vsub.f32 %v5758_v34, %v2906_v43  ;;  %v5774_v46 = vsub.f32 %v5756_v29, %v2907_v44  ;;  %2917 = vadd.xlane.f32.xlu0 %v2913_v10  ;;  %4009 = vmatpush3.bf16.msra.mxu0 %v4482_v21  ;;  %v4483_v43 = vld [vmem:[%s5413_s24 + $0x70] sm:$0xff]   ;;  %v4485_v10 = vld [vmem:[%s5413_s24 + $0x68] sm:$0xff]  }
 0xebd   : > { %v2904_v47 = vpop.xlane.xlu0 %2903  ;;  %v4484_v44 = vld [vmem:[%s5413_s24 + $0x30] sm:$0xff]   ;;  %4010 = vmatprep.subr.bf16.mxu0 %v4483_v43 }
 0xebe   : > { %v2908_v9 = vmul.f32 0.0078125, %v2904_v47  ;;  %v2914_v48 = vmul.f32 %v2910_v45, %v2910_v45  ;;  %v2915_v28 = vmul.f32 %v5774_v46, %v5774_v46  ;;  %v4488_v47 = vld [vmem:[%s5413_s24 + $0x20] sm:$0xff]  }
 0xec0   : > { %v5779_v30 = vsub.f32 %v5762_v36, %v2908_v9  ;;  %2919 = vadd.xlane.f32.xlu1 %v2914_v48  ;;  %2921 = vadd.xlane.f32.xlu0 %v2915_v28  ;;  %v4489_v9 = vld [vmem:[%s5413_s24 + $0x58] sm:$0xff]   ;;  %v4491_v28 = vld [vmem:[%s5413_s24 + $0x50] sm:$0xff]  }
 0xec1   : > { %4011 = vmatpush3.bf16.msra.mxu0 %v4484_v44  ;;  %v4490_v48 = vld [vmem:[%s5413_s24 + $0x18] sm:$0xff]  }
 0xec2   : > { %v2916_v31 = vmul.f32 %v5779_v30, %v5779_v30  ;;  %4012 = vmatprep.subr.bf16.mxu0 %v4485_v10 }
 0xec4   : > { %2923 = vadd.xlane.f32.xlu1 %v2916_v31  ;;  %v4493_v31 = vld [vmem:[%s5413_s24 + $0x48] sm:$0xff]  }
 0xf45   : > { %v2918_v63 = vpop.xlane.xlu0 %2917 }
 0xf46   : > { %v2925_v55 = vmul.f32 0.0078125, %v2918_v63 }
 0xf48   : > { %v2929_v1 = vadd.f32 1e-06, %v2925_v55 }
 0xf49   : > { %v2920_v2 = vpop.xlane.xlu1 %2919  ;;  %v2922_v53 = vpop.xlane.xlu0 %2921 }
 0xf4a   : > { %4569 = vrsqrt.f32 %v2929_v1  ;;  %v2926_v22 = vmul.f32 0.0078125, %v2920_v2  ;;  %v2927_v3 = vmul.f32 0.0078125, %v2922_v53 }
 0xf4c   : > { %v2930_v62 = vadd.f32 1e-06, %v2926_v22  ;;  %v2931_v4 = vadd.f32 1e-06, %v2927_v3 }
 0xf4d   : > { %v2924_v26 = vpop.xlane.xlu1 %2923 }
 0xf4e   : > { %4571 = vrsqrt.f32 %v2930_v62  ;;  %v2928_v5 = vmul.f32 0.0078125, %v2924_v26 }
 0xf4f   : > { %4573 = vrsqrt.f32 %v2931_v4 }
 0xf50   : > { %v2932_v7 = vadd.f32 1e-06, %v2928_v5 }
 0xf52   : > { %4575 = vrsqrt.f32 %v2932_v7 }
 0xf57   : > { %v4570_v8 = vpop.eup %4569 }
 0xf58   : > { %v2937_v6 = vmul.f32 %v4570_v8, %v5768_v41 }
 0xf5a   : > { %v2947_v12 = vmul.f32 %v3888_v11, %v2937_v6 }
 0xf5b   : > { %v4572_v14 = vpop.eup %4571 }
 0xf5c   : > { %v2938_v15 = vmul.f32 %v4572_v14, %v2910_v45  ;;  %v4574_v16 = vpop.eup %4573  ;;  %v2957_v25 = vadd.f32 %v3889_v50, %v2947_v12  ;;  %v4486_v45 = vld [vmem:[%s5413_s24 + $0x28] sm:$0xff]  }
 0xf5d   : > { %v2939_v32 = vmul.f32 %v4574_v16, %v5774_v46  ;;  %4013 = vmatpush3.bf16.msra.mxu0 %v4486_v45  ;;  %v4487_v46 = vld [vmem:[%s5413_s24 + $0x60] sm:$0xff]  }
 0xf5e   : > { %v2948_v18 = vmul.f32 %v3888_v11, %v2938_v15  ;;  %4014 = vmatprep.subr.bf16.mxu0 %v4487_v46 }
 0xf5f   : > { %v4576_v24 = vpop.eup %4575  ;;  %v2949_v38 = vmul.f32 %v3888_v11, %v2939_v32 }
 0xf60   : > { %v2958_v27 = vadd.f32 %v3889_v50, %v2948_v18  ;;  %v2940_v33 = vmul.f32 %v4576_v24, %v5779_v30  ;;  %v4492_v30 = vld [vmem:[%s5413_s24 + $0x10] sm:$0xff]  }
 0xf61   : > { %v2959_v40 = vadd.f32 %v3889_v50, %v2949_v38  ;;  %4015 = vmatpush3.bf16.msra.mxu0 %v4488_v47 }
 0xf62   : > { %v2961_v35 = vpack.c.bf16 %v2958_v27, %v2957_v25  ;;  %v2950_v37 = vmul.f32 %v3888_v11, %v2940_v33  ;;  %4016 = vmatprep.subr.bf16.mxu0 %v4489_v9 }
 0xf64   : > { %3115 = vmatmul.mubr.bf16.vlgmr.msra.gmra.mxu1 %v2961_v35  ;;  %v2960_v39 = vadd.f32 %v3889_v50, %v2950_v37 }
 0xf65   : > { %3124 = vmatprep.mubr.bf16.mxu1 %v4989_v58  ;;  %4017 = vmatpush3.bf16.msra.mxu0 %v4490_v48  ;;  %v2999_v58 = vrot.slane %v2990_v54, %v2998_v56 }
 0xf66   : > { %v2962_v41 = vpack.c.bf16 %v2960_v39, %v2959_v40  ;;  %4018 = vmatprep.subr.bf16.mxu0 %v4491_v28 }
 0xf69   : > { %4019 = vmatpush3.bf16.msra.mxu0 %v4492_v30 }
 0xf6a   : > { %4020 = vmatprep.subr.bf16.mxu0 %v4493_v31 }
 0xf6c   : > { %3125 = vmatmul.mubr.bf16.gmra.mxu1 %v2962_v41 }
 0xf6d   : > { %4021 = vmatpush3.bf16.msra.mxu0 %v4494_v13 }
 0xf6e   : > { %4022 = vmatprep.subr.bf16.mxu0 %v4495_v17 }
 0xf71   : > { %4023 = vmatpush3.bf16.msra.mxu0 %v4496_v20 }
0x1024   : > { %v3116_v59 = vpop.f32.mrf.mxu1 }
0x1025   : > { %v5827_v60 = vadd.f32 %v3116_v59, %v2995_v57 }
0x1026   : > { %v3118_v19 = vpop.f32.mrf.mxu1 }
0x1027   : > { %v3143_v61 = vmul.f32 0.044715, %v5827_v60  ;;  %v5830_v0 = vadd.f32 %v3118_v19, %v2999_v58 }
0x1028   : > { %v3120_v63 = vpop.f32.mrf.mxu1 }
0x1029   : > { %v3151_v55 = vmul.f32 %v3143_v61, %v5827_v60  ;;  %v3144_v1 = vmul.f32 0.044715, %v5830_v0  ;;  %v3121_v2 = vadd.f32 %v3120_v63, %v2995_v57 }
0x102a   : > { %v3122_v53 = vpop.f32.mrf.mxu1 }
0x102b   : > { %v3159_v22 = vmul.f32 %v3151_v55, %v5827_v60  ;;  %v3152_v3 = vmul.f32 %v3144_v1, %v5830_v0  ;;  %v3145_v62 = vmul.f32 0.044715, %v3121_v2  ;;  %v3123_v4 = vadd.f32 %v3122_v53, %v2999_v58 }
0x102c   : > { %v3126_v26 = vpop.f32.mrf.mxu1  ;;  %v3137_v61 = vmul.f32 0.5, %v3121_v2  ;;  %v3136_v55 = vmul.f32 0.5, %v5830_v0 }
0x102d   : > { %v3167_v5 = vadd.f32 %v3159_v22, %v5827_v60  ;;  %v3160_v7 = vmul.f32 %v3152_v3, %v5830_v0  ;;  %v3153_v8 = vmul.f32 %v3145_v62, %v3121_v2  ;;  %v3146_v6 = vmul.f32 0.044715, %v3123_v4 }
0x102e   : > { %v5838_v11 = vadd.f32 %v3126_v26, %v2995_v57  ;;  %v3128_v14 = vpop.f32.mrf.mxu1  ;;  %v3138_v1 = vmul.f32 0.5, %v3123_v4  ;;  %v3135_v22 = vmul.f32 0.5, %v5827_v60 }
0x102f   : > { %v3175_v15 = vmul.f32 0.7978846, %v3167_v5  ;;  %v3161_v12 = vmul.f32 %v3153_v8, %v3121_v2  ;;  %v3154_v16 = vmul.f32 %v3146_v6, %v3123_v4  ;;  %v5840_v50 = vadd.f32 %v3128_v14, %v2999_v58 }
0x1030   : > { %v3147_v18 = vmul.f32 0.044715, %v5838_v11  ;;  %v3130_v24 = vpop.f32.mrf.mxu1  ;;  %v3168_v25 = vadd.f32 %v3160_v7, %v5830_v0 }
0x1031   : > { %v3169_v27 = vadd.f32 %v3161_v12, %v3121_v2  ;;  %v3162_v32 = vmul.f32 %v3154_v16, %v3123_v4  ;;  %v3148_v33 = vmul.f32 0.044715, %v5840_v50  ;;  %4577 = vtanh.f32 %v3175_v15 }
0x1032   : > { %v3155_v35 = vmul.f32 %v3147_v18, %v5838_v11  ;;  %v3131_v37 = vadd.f32 %v3130_v24, %v2995_v57  ;;  %v3132_v38 = vpop.f32.mrf.mxu1  ;;  %v3176_v39 = vmul.f32 0.7978846, %v3168_v25  ;;  %v3140_v18 = vmul.f32 0.5, %v5840_v50 }
0x1033   : > { %v3177_v40 = vmul.f32 0.7978846, %v3169_v27  ;;  %v3156_v41 = vmul.f32 %v3148_v33, %v5840_v50  ;;  %v3133_v42 = vadd.f32 %v3132_v38, %v2999_v58  ;;  %v3170_v21 = vadd.f32 %v3162_v32, %v3123_v4 }
0x1034   : > { %v3163_v43 = vmul.f32 %v3155_v35, %v5838_v11  ;;  %v3149_v44 = vmul.f32 0.044715, %v3131_v37  ;;  %4579 = vtanh.f32 %v3176_v39  ;;  %v3141_v2 = vmul.f32 0.5, %v3131_v37 }
0x1035   : > { %4581 = vtanh.f32 %v3177_v40  ;;  %v3164_v10 = vmul.f32 %v3156_v41, %v5840_v50  ;;  %v3150_v45 = vmul.f32 0.044715, %v3133_v42  ;;  %v3178_v46 = vmul.f32 0.7978846, %v3170_v21 }
0x1036   : > { %v3157_v47 = vmul.f32 %v3149_v44, %v3131_v37  ;;  %v3171_v9 = vadd.f32 %v3163_v43, %v5838_v11  ;;  %v3142_v60 = vmul.f32 0.5, %v3133_v42  ;;  %v3139_v25 = vmul.f32 0.5, %v5838_v11 }
0x1037   : > { %v3158_v48 = vmul.f32 %v3150_v45, %v3133_v42  ;;  %4583 = vtanh.f32 %v3178_v46  ;;  %v3172_v28 = vadd.f32 %v3164_v10, %v5840_v50 }
0x1038   : > { %v3165_v30 = vmul.f32 %v3157_v47, %v3131_v37  ;;  %v3179_v31 = vmul.f32 0.7978846, %v3171_v9 }
0x1039   : > { %v3166_v13 = vmul.f32 %v3158_v48, %v3133_v42  ;;  %v3180_v17 = vmul.f32 0.7978846, %v3172_v28 }
0x103a   : > { %v3173_v20 = vadd.f32 %v3165_v30, %v3131_v37  ;;  %v3890_v37 = vld [vmem:[%s1098_s22] ss:$0 sm:$0xff]  ;;  %s6014_s22 = sld [smem:[#allocation47_spill]] (!%p3923_p12) }
0x103b   : > { %v3174_v49 = vadd.f32 %v3166_v13, %v3133_v42  ;;  %4585 = vtanh.f32 %v3180_v17  ;;  %v2970_v50 = vadd.f32 %v3890_v37, %v5753_v23  ;;  %v2971_v44 = vadd.f32 %v3890_v37, %v5758_v34 }
0x103c   : > { %v3181_v51 = vmul.f32 0.7978846, %v3173_v20  ;;  %4587 = vtanh.f32 %v3179_v31  ;;  %v2972_v9 = vadd.f32 %v3890_v37, %v5756_v29  ;;  %v2973_v23 = vadd.f32 %v3890_v37, %v5762_v36 }
0x103d   : > { %v3182_v52 = vmul.f32 0.7978846, %v3174_v49 }
0x103e   : > { %4589 = vtanh.f32 %v3181_v51  ;;  %v4578_v54 = vpop.eup %4577 }
0x103f   : > { %4591 = vtanh.f32 %v3182_v52  ;;  %v3191_v63 = vadd.f32 1.0, %v4578_v54 }
0x1041   : > { %v4580_v56 = vpop.eup %4579  ;;  %v3199_v7 = vmul.f32 %v3191_v63, %v3135_v22 }
0x1042   : > { %v4582_v57 = vpop.eup %4581  ;;  %v3192_v58 = vadd.f32 1.0, %v4580_v56 }
0x1043   : > { %v3193_v59 = vadd.f32 1.0, %v4582_v57 }
0x1044   : > { %v4584_v19 = vpop.eup %4583  ;;  %v3200_v62 = vmul.f32 %v3192_v58, %v3136_v55 }
0x1045   : > { %v3194_v53 = vadd.f32 1.0, %v4584_v19  ;;  %v3201_v3 = vmul.f32 %v3193_v59, %v3137_v61 }
0x1047   : > { %v3202_v26 = vmul.f32 %v3194_v53, %v3138_v1  ;;  %v3207_v14 = vpack.c.bf16 %v3201_v3, %v3199_v7 }
0x1048   : > { %v4586_v5 = vpop.eup %4585 }
0x1049   : > { %v4588_v8 = vpop.eup %4587  ;;  %v3208_v6 = vpack.c.bf16 %v3202_v26, %v3200_v62  ;;  %v3196_v12 = vadd.f32 1.0, %v4586_v5 }
0x104a   : > { %v3195_v0 = vadd.f32 1.0, %v4588_v8 }
0x104b   : > { %v4590_v15 = vpop.eup %4589  ;;  %3371 = vmatprep.mubr.bf16.mxu0 %v3208_v6  ;;  %v3204_v32 = vmul.f32 %v3196_v12, %v3140_v18 }
0x104c   : > { %v4592_v16 = vpop.eup %4591  ;;  %3372 = vmatmul.mubr.bf16.vlgmr.msra.gmra.mxu0 %v3207_v14  ;;  %v3197_v4 = vadd.f32 1.0, %v4590_v15  ;;  %v3203_v35 = vmul.f32 %v3195_v0, %v3139_v25 }
0x104d   : > { %v3198_v24 = vadd.f32 1.0, %v4592_v16 }
0x104e   : > { %v3205_v27 = vmul.f32 %v3197_v4, %v3141_v2 }
0x104f   : > { %v3206_v33 = vmul.f32 %v3198_v24, %v3142_v60 }
0x1050   : > { %v3209_v39 = vpack.c.bf16 %v3205_v27, %v3203_v35 }
0x1051   : > { %v3210_v38 = vpack.c.bf16 %v3206_v33, %v3204_v32 }
0x1053   : > { %3379 = vmatprep.mubr.bf16.mxu0 %v3210_v38 }
0x1054   : > { %3380 = vmatmul.mubr.bf16.gmra.mxu0 %v3209_v39 }
0x110c   : > { %v4024_v40 = vpop.f32.mrf.mxu0 }
0x110e   : > { %v4025_v41 = vpop.f32.mrf.mxu0 }
0x110f   : > { %v4026_v42 = vadd.f32 %v4025_v41, %v4024_v40 }
0x1110   : > { %v4027_v21 = vpop.f32.mrf.mxu0 }
0x1111   : > { %v3388_v11 = vadd.f32 %v4026_v42, %v2970_v50 }
0x1112   : > { %v4028_v43 = vpop.f32.mrf.mxu0 }
0x1113   : > { %3392 = vst [vmem:[#allocation2 + $0x10] sm:$0xff] %v3388_v11  ;;  %v4029_v10 = vadd.f32 %v4028_v43, %v4027_v21 }
0x1114   : > { %v4030_v45 = vpop.f32.mrf.mxu0 }
0x1115   : > { %v3389_v46 = vadd.f32 %v4029_v10, %v2971_v44 }
0x1116   : > { %v4031_v47 = vpop.f32.mrf.mxu0 }
0x1117   : > { %3393 = vst [vmem:[#allocation2] sm:$0xff] %v3389_v46  ;;  %v4032_v48 = vadd.f32 %v4031_v47, %v4030_v45 }
0x1118   : > { %v4033_v28 = vpop.f32.mrf.mxu0 }
0x1119   : > { %v3390_v30 = vadd.f32 %v4032_v48, %v2972_v9 }
0x111a   : > { %v4034_v31 = vpop.f32.mrf.mxu0 }
0x111b   : > { %3394 = vst [vmem:[#allocation2 + $0x18] sm:$0xff] %v3390_v30  ;;  %v4035_v13 = vadd.f32 %v4034_v31, %v4033_v28  ;;  %3399 = sbr.rel (%p3923_p12) target bundleno = 4699 (0x125b), region = 156 }
0x111d   : > { %v3391_v17 = vadd.f32 %v4035_v13, %v2973_v23 }
0x111f   : > { %3395 = vst [vmem:[#allocation2 + $0x8] sm:$0xff] %v3391_v17 }
0x1120   : > { %3402 = vadd.xlane.f32.xlu0 %v3388_v11  ;;  %3406 = vadd.xlane.f32.xlu1 %v3390_v30  ;;  %v3924_v16 = vld [vmem:[%s6014_s22] ss:$0 sm:$0xff] }
0x1121   : > { %v3925_v0 = vld [vmem:[%s6015_s13] ss:$0 sm:$0xff] }
0x1124   : > { %3404 = vadd.xlane.f32.xlu0 %v3389_v46  ;;  %3408 = vadd.xlane.f32.xlu1 %v3391_v17 }
0x11a9   : > { %v3403_v34 = vpop.xlane.xlu0 %3402  ;;  %v3407_v20 = vpop.xlane.xlu1 %3406 }
0x11aa   : > { %v3410_v29 = vmul.f32 0.0078125, %v3403_v34  ;;  %v3412_v49 = vmul.f32 0.0078125, %v3407_v20 }
0x11ac   : > { %v3414_v51 = vsub.f32 %v3388_v11, %v3410_v29  ;;  %v3416_v52 = vsub.f32 %v3390_v30, %v3412_v49 }
0x11ad   : > { %v3405_v54 = vpop.xlane.xlu0 %3404  ;;  %v3409_v56 = vpop.xlane.xlu1 %3408 }
0x11ae   : > { %v3411_v57 = vmul.f32 0.0078125, %v3405_v54  ;;  %v3418_v36 = vmul.f32 %v3414_v51, %v3414_v51  ;;  %v3413_v58 = vmul.f32 0.0078125, %v3409_v56  ;;  %v3420_v61 = vmul.f32 %v3416_v52, %v3416_v52 }
0x11b0   : > { %v3415_v59 = vsub.f32 %v3389_v46, %v3411_v57  ;;  %3422 = vadd.xlane.f32.xlu0 %v3418_v36  ;;  %v3417_v19 = vsub.f32 %v3391_v17, %v3413_v58 }
0x11b2   : > { %v3419_v63 = vmul.f32 %v3415_v59, %v3415_v59  ;;  %v3421_v55 = vmul.f32 %v3417_v19, %v3417_v19 }
0x11b4   : > { %3426 = vadd.xlane.f32.xlu0 %v3420_v61  ;;  %3424 = vadd.xlane.f32.xlu1 %v3419_v63 }
0x11b8   : > { %3428 = vadd.xlane.f32.xlu1 %v3421_v55 }
0x1239   : > { %v3423_v1 = vpop.xlane.xlu0 %3422 }
0x123a   : > { %v3430_v53 = vmul.f32 0.0078125, %v3423_v1 }
0x123c   : > { %v3434_v22 = vadd.f32 1e-06, %v3430_v53 }
0x123d   : > { %v3425_v3 = vpop.xlane.xlu1 %3424  ;;  %v3427_v62 = vpop.xlane.xlu0 %3426 }
0x123e   : > { %4597 = vrsqrt.f32 %v3434_v22  ;;  %v3431_v26 = vmul.f32 0.0078125, %v3425_v3  ;;  %v3432_v5 = vmul.f32 0.0078125, %v3427_v62 }
0x1240   : > { %v3435_v7 = vadd.f32 1e-06, %v3431_v26  ;;  %v3436_v8 = vadd.f32 1e-06, %v3432_v5 }
0x1241   : > { %v3429_v6 = vpop.xlane.xlu1 %3428 }
0x1242   : > { %4599 = vrsqrt.f32 %v3435_v7  ;;  %v3433_v14 = vmul.f32 0.0078125, %v3429_v6 }
0x1243   : > { %4601 = vrsqrt.f32 %v3436_v8 }
0x1244   : > { %v3437_v15 = vadd.f32 1e-06, %v3433_v14 }
0x1246   : > { %4603 = vrsqrt.f32 %v3437_v15 }
0x124b   : > { %v4598_v12 = vpop.eup %4597 }
0x124c   : > { %v3442_v2 = vmul.f32 %v4598_v12, %v3414_v51 }
0x124e   : > { %v3452_v4 = vmul.f32 %v3924_v16, %v3442_v2 }
0x124f   : > { %v4600_v18 = vpop.eup %4599 }
0x1250   : > { %v4602_v60 = vpop.eup %4601  ;;  %v3462_v24 = vadd.f32 %v3925_v0, %v3452_v4  ;;  %v3443_v25 = vmul.f32 %v4600_v18, %v3415_v59 }
0x1251   : > { %v3444_v27 = vmul.f32 %v4602_v60, %v3416_v52 }
0x1252   : > { %3466 = vst [vmem:[#allocation18] sm:$0xff] %v3462_v24  ;;  %v3453_v32 = vmul.f32 %v3924_v16, %v3443_v25 }
0x1253   : > { %v4604_v33 = vpop.eup %4603  ;;  %v3454_v35 = vmul.f32 %v3924_v16, %v3444_v27 }
0x1254   : > { %v3463_v38 = vadd.f32 %v3925_v0, %v3453_v32  ;;  %v3445_v39 = vmul.f32 %v4604_v33, %v3417_v19 }
0x1255   : > { %v3464_v40 = vadd.f32 %v3925_v0, %v3454_v35 }
0x1256   : > { %3467 = vst [vmem:[#allocation18 + $0x8] sm:$0xff] %v3463_v38  ;;  %v3455_v37 = vmul.f32 %v3924_v16, %v3445_v39 }
0x1257   : > { %3468 = vst [vmem:[#allocation18 + $0x10] sm:$0xff] %v3464_v40 }
0x1258   : > { %v3465_v41 = vadd.f32 %v3925_v0, %v3455_v37 }
0x125a   : > { %3469 = vst [vmem:[#allocation18 + $0x18] sm:$0xff] %v3465_v41 }
0x125b PF: > { %p4309_p0 = scmp.eq.s32.totalorder %s5137_s23, 1  ;;  %s4990_s19 = smov [#allocation18]  }
0x125c   : > { %s3480_s10 = sshll.u32 %s4990_s19, 4  ;;  %s3481_s10 = int_to_ptr.vmem [resolvable:$true] %s3480_s10 }
0x125d   : > { %s4877_s12 = scalar_lea.vmem %s3481_s10, 512  ;;  %p4884_p7 = scmp.lt.s32.totalorder %s3481_s10, %s3481_s10 }
0x125e   : > { %p4878_p2 = scmp.ne.s32.totalorder %s3481_s10, %s4877_s12  ;;  %p4885_p1 = scmp.lt.s32.totalorder %s4877_s12, %s4877_s12 }
0x1260   : > { %p4879_p5 = pnand %p4878_p2, %p4309_p0  ;;  %p4886_p4 = por %p4885_p1, %p4884_p7 }
0x1262   : > { %p4880_p10 = pneg %p4879_p5 }
0x1264   : > { %p4887_p9 = pnand %p4886_p4, %p4880_p10 }
0x1266   : > { %4890 = shalt.err (!%p4887_p9)
}
0x1267   : > { %s4991_s1 = smov 128   ;;  %s4992_s0 = smov 8  }
0x1268   : > { %s6016_s26 = sld [smem:[#allocation49_spill]] }
0x126e   : > { %4265 = dma.vmem_to_hbm [thread:$0]  (%p4309_p0), %s3481_s10, 512, %s6016_s26, [#allocation6], %s4991_s1, %s4991_s1, %s4992_s0  }
0x126f   : > { %4942 = dma.done.wait (%p4309_p0), [#allocation6], 512  }
0x1270   : > { %4944 = vsyncadd (%p4309_p0), [#allocation6], 4294966784 }
0x1271 PF: > { %s6017_s2 = sld [smem:[#allocation24_spill]]  ;;  %s6020_s3 = smov %s4951_s28 }
0x1272   : > { %s6018_s16 = sld [smem:[#allocation26_spill]]  ;;  %s6021_s28 = smov %s4955_s29 }
0x1273   : > { %s6019_s6 = sld [smem:[#allocation25_spill]]  ;;  %s6023_s30 = smov %s4963_s4 }
0x1277   : > { %s36_s0 = sadd.s32 1, %s6017_s2  }
0x1278   : > { %p33_p13 = scmp.ge.s32.totalorder %s36_s0, 4   ;;  %s6022_s29 = smov %s6018_s16 }
0x1279   : > { %s6024_s4 = smov %s6019_s6 }
0x127a   :  { %35 = sbr.rel (!%p33_p13) target bundleno = 30 (0x1e), region = 255 }
0x127f   :  { %3496 = vsyncpa [#allocation5], 1 }
0x1280   :  { %3498 = vsyncpa [#allocation5 + $0x1], 1 }
0x1281   :  { %3499 = vsyncpa [#allocation8], 1 }
0x1282   :  { %3500 = vsyncpa [#allocation11], 1 }
0x1283   :  { %3501 = vsyncpa [#allocation6], 1 }
0x1284   :  { %3503 = vsyncpa [#allocation6 + $0x1], 1 }

</bundles_post_ra>
